<compile_context>
chip_gen: v7x
topology: tpu7x:2x2x1
jax: 0.10.0
libtpu: 0.0.40
codegen_flags: <defaults>
</compile_context>

<pallas_src>
import jax
import jax.numpy as jnp
from jax.experimental import pallas as pl
from jax.experimental.pallas import tpu as pltpu

PAD = 128       # lane-dense padded feature width
N_BLOCKS = 4


# ----------------------------------------------------------------------------
# Fused Pallas kernel: conv1..conv4 -> global_mean_pool -> MLP head
# (one grid step == one independent data batch)
# ----------------------------------------------------------------------------
def gnn_fused_kernel(alpha_ref,          # SMEM [4]                 PReLU alphas
                     x_ref,              # VMEM [1, N, PAD]   f32   padded node features
                     a_ref,              # VMEM [1, N, N]     bf16  mean-normalized adjacency
                     p_ref,              # VMEM [1, G, N]     bf16  row-normalized pooling matrix
                     wcat_ref,           # VMEM [4, 2*PAD, PAD] bf16  vstack([W_self, W_nbr])
                     bias_ref,           # VMEM [4, 1, PAD]   f32
                     gamma_ref,          # VMEM [4, 1, PAD]   f32
                     beta_ref,           # VMEM [4, 1, PAD]   f32
                     hw1_ref, hb1_ref,   # VMEM [PAD, PAD] bf16, [1, PAD] f32
                     hw2_ref, hb2_ref,   # VMEM [PAD, PAD] bf16, [1, PAD] f32
                     o_ref):             # VMEM [1, G, PAD]   f32
    h = x_ref[0]                                   # [N, PAD] f32
    a = a_ref[0]                                   # [N, N]   bf16

    for blk in range(wcat_ref.shape[0]):           # fully unrolled; weights resident
        hb = h.astype(jnp.bfloat16)
        # Neighbor mean-aggregation first (issues early, overlaps the big matmul).
        ah = jnp.dot(a, hb, preferred_element_type=jnp.float32)            # [N, PAD] f32
        # K-concat form:  [h | A@h] @ [W_self ; W_nbr]  -> one [N, PAD] MXU result.
        hcat = jnp.concatenate([hb, ah.astype(jnp.bfloat16)], axis=1)      # [N, 2*PAD] bf16
        h = jnp.dot(hcat, wcat_ref[blk], preferred_element_type=jnp.float32) + bias_ref[blk]
        # Padded feature cols: zero weight rows/cols + zero bias -> stay exactly 0.

        # PReLU with a single scalar alpha (SMEM scalar path); f32 VPU math.
        alpha = alpha_ref[blk]
        h = jnp.where(h >= 0.0, h, alpha * h)

        # BatchNorm1d over the node axis (training-mode batch stats, two-pass var).
        # Padded cols: mean=0, var=0 -> output stays 0 (gamma/beta padded with 0).
        mean = jnp.mean(h, axis=0, keepdims=True)
        cen = h - mean
        var = jnp.mean(cen * cen, axis=0, keepdims=True)
        h = cen * jax.lax.rsqrt(var + 1e-5)
        h = h * gamma_ref[blk] + beta_ref[blk]

    # global_mean_pool via row-normalized assignment matrix, then MLP head
    # (Linear -> ReLU -> Linear, norm=None).  Lane-dense (PAD-wide) output store.
    pooled = jnp.dot(p_ref[0], h.astype(jnp.bfloat16),
                     preferred_element_type=jnp.float32)                   # [G, PAD]
    hh = jnp.dot(pooled.astype(jnp.bfloat16), hw1_ref[...],
                 preferred_element_type=jnp.float32) + hb1_ref[...]
    hh = jnp.maximum(hh, 0.0)
    out = jnp.dot(hh.astype(jnp.bfloat16), hw2_ref[...],
                  preferred_element_type=jnp.float32) + hb2_ref[...]
    o_ref[0] = out.astype(o_ref.dtype)


# ----------------------------------------------------------------------------
# Wrapper: grid over independent data batches; weights constant-indexed.
# ----------------------------------------------------------------------------
@jax.jit
def gnn_forward(x_pad, a_bf16, p_bf16, packed):
    nb, n, _ = x_pad.shape
    g = p_bf16.shape[1]
    return pl.pallas_call(
        gnn_fused_kernel,
        out_shape=jax.ShapeDtypeStruct((nb, g, PAD), jnp.float32),
        grid=(nb,),
        in_specs=[
            pl.BlockSpec(memory_space=pltpu.MemorySpace.SMEM),             # alphas
            pl.BlockSpec((1, n, PAD), lambda b: (b, 0, 0)),                # x (streams)
            pl.BlockSpec((1, n, n), lambda b: (b, 0, 0)),                  # adjacency (streams)
            pl.BlockSpec((1, g, n), lambda b: (b, 0, 0)),                  # pool matrix (streams)
            pl.BlockSpec((N_BLOCKS, 2 * PAD, PAD), lambda b: (0, 0, 0)),   # wcat  (VMEM-resident)
            pl.BlockSpec((N_BLOCKS, 1, PAD), lambda b: (0, 0, 0)),         # bias
            pl.BlockSpec((N_BLOCKS, 1, PAD), lambda b: (0, 0, 0)),         # gamma
            pl.BlockSpec((N_BLOCKS, 1, PAD), lambda b: (0, 0, 0)),         # beta
            pl.BlockSpec((PAD, PAD), lambda b: (0, 0)),                    # hw1
            pl.BlockSpec((1, PAD), lambda b: (0, 0)),                      # hb1
            pl.BlockSpec((PAD, PAD), lambda b: (0, 0)),                    # hw2
            pl.BlockSpec((1, PAD), lambda b: (0, 0)),                      # hb2
        ],
        out_specs=pl.BlockSpec((1, g, PAD), lambda b: (b, 0, 0)),
        compiler_params=pltpu.CompilerParams(
            dimension_semantics=("parallel",)),                            # v7x: 2 TCs split batches
    )(packed["alphas"], x_pad, a_bf16, p_bf16,
      packed["wcat"], packed["bias"], packed["gamma"], packed["beta"],
      packed["hw1"], packed["hb1"], packed["hw2"], packed["hb2"])


# ----------------------------------------------------------------------------
# Parameter init, packing & graph preprocessing (plain-JAX glue)
# ----------------------------------------------------------------------------
def init_block_params(key, d_in, d_out):
    k1, k2, k3 = jax.random.split(key, 3)
    scale = 1.0 / jnp.sqrt(jnp.float32(d_in))
    return {
        "w_self": jax.random.uniform(k1, (d_in, d_out), jnp.float32, -scale, scale),
        "w_nbr":  jax.random.uniform(k2, (d_in, d_out), jnp.float32, -scale, scale),
        "bias":   jax.random.uniform(k3, (1, d_out), jnp.float32, -scale, scale),
        "alpha":  jnp.full((1, 1), 0.25, jnp.float32),     # PReLU default
        "gamma":  jnp.ones((1, d_out), jnp.float32),       # BatchNorm weight
        "beta":   jnp.zeros((1, d_out), jnp.float32),      # BatchNorm bias
    }


def init_head_params(key, h, o):
    k1, k2, k3, k4 = jax.random.split(key, 4)
    s1 = 1.0 / jnp.sqrt(jnp.float32(h))
    return {
        "w1": jax.random.uniform(k1, (h, h), jnp.float32, -s1, s1),
        "b1": jax.random.uniform(k2, (1, h), jnp.float32, -s1, s1),
        "w2": jax.random.uniform(k3, (h, o), jnp.float32, -s1, s1),
        "b2": jax.random.uniform(k4, (1, o), jnp.float32, -s1, s1),
    }


def _pad2(arr, rows, cols):
    out = jnp.zeros((rows, cols), jnp.float32)
    return out.at[:arr.shape[0], :arr.shape[1]].set(arr)


def pack_params(params):
    """Pad to 128-lane width, stack [W_self; W_nbr] along K, bf16 MXU operands."""
    wcats, biases, gammas, betas, alphas = [], [], [], [], []
    for name in ("conv1", "conv2", "conv3", "conv4"):
        p = params[name]
        w_self = _pad2(p["w_self"], PAD, PAD)
        w_nbr = _pad2(p["w_nbr"], PAD, PAD)
        wcats.append(jnp.concatenate([w_self, w_nbr], axis=0))   # [2*PAD, PAD]
        biases.append(_pad2(p["bias"], 1, PAD))
        gammas.append(_pad2(p["gamma"], 1, PAD))
        betas.append(_pad2(p["beta"], 1, PAD))
        alphas.append(p["alpha"].reshape(()))
    head = params["head"]
    return {
        "alphas": jnp.stack(alphas),                                   # [4] f32  (SMEM)
        "wcat":   jnp.stack(wcats).astype(jnp.bfloat16),               # [4, 2*PAD, PAD]
        "bias":   jnp.stack(biases),                                   # [4, 1, PAD] f32
        "gamma":  jnp.stack(gammas),                                   # [4, 1, PAD] f32
        "beta":   jnp.stack(betas),                                    # [4, 1, PAD] f32
        "hw1":    _pad2(head["w1"], PAD, PAD).astype(jnp.bfloat16),    # [PAD, PAD]
        "hb1":    _pad2(head["b1"], 1, PAD),                           # [1, PAD] f32
        "hw2":    _pad2(head["w2"], PAD, PAD).astype(jnp.bfloat16),    # [PAD, PAD] (OUT padded)
        "hb2":    _pad2(head["b2"], 1, PAD),                           # [1, PAD] f32
    }


def build_dense_adjacency(edge_index, num_nodes):
    """Dense adjacency with mean-normalization over in-neighbors."""
    src, dst = edge_index[0], edge_index[1]
    a = jnp.zeros((num_nodes, num_nodes), jnp.float32).at[dst, src].add(1.0)
    deg = jnp.sum(a, axis=1, keepdims=True)
    return a / jnp.maximum(deg, 1.0)


def build_pool_matrix(batch, num_graphs):
    """Row-normalized one-hot assignment: pooled = P @ X == per-graph mean."""
    onehot = (batch[None, :] == jnp.arange(num_graphs)[:, None]).astype(jnp.float32)
    counts = jnp.sum(onehot, axis=1, keepdims=True)
    return onehot / jnp.maximum(counts, 1.0)


# ----------------------------------------------------------------------------
# Pure-JAX f32 reference (unpadded) for correctness checking
# ----------------------------------------------------------------------------
def _ref_block(h, a, p):
    h = jnp.dot(h, p["w_self"]) + jnp.dot(a, jnp.dot(h, p["w_nbr"])) + p["bias"]
    alpha = p["alpha"][0, 0]
    h = jnp.where(h >= 0.0, h, alpha * h)
    mean = jnp.mean(h, axis=0, keepdims=True)
    var = jnp.mean((h - mean) ** 2, axis=0, keepdims=True)
    h = (h - mean) * jax.lax.rsqrt(var + 1e-5)
    return h * p["gamma"] + p["beta"]


def reference_forward(x, a, pool_mat, params):
    h = x
    for name in ("conv1", "conv2", "conv3", "conv4"):
        h = _ref_block(h, a, params[name])
    pooled = jnp.dot(pool_mat, h)
    head = params["head"]
    hh = jnp.maximum(jnp.dot(pooled, head["w1"]) + head["b1"], 0.0)
    return jnp.dot(hh, head["w2"]) + head["b2"]


# ----------------------------------------------------------------------------
# Main
# ----------------------------------------------------------------------------
if __name__ == "__main__":
    INDIM, HIDDEN, OUTDIM = 8, 32, 4
    NODES_PER_GRAPH = 16
    GRAPHS_PER_BATCH = 16
    N_NODES = NODES_PER_GRAPH * GRAPHS_PER_BATCH      # 256 nodes per grid step (fills MXU M)
    EDGES_PER_GRAPH = 40
    N_BATCHES = 2                                     # "parallel" grid axis

    key = jax.random.PRNGKey(0)
    kx, ke, k1, k2, k3, k4, kh = jax.random.split(key, 7)

    # synthetic batched graphs: nodes grouped into graphs, random edges within graphs
    x = jax.random.normal(kx, (N_BATCHES, N_NODES, INDIM), jnp.float32)
    e_local = jax.random.randint(
        ke, (N_BATCHES, 2, GRAPHS_PER_BATCH, EDGES_PER_GRAPH), 0, NODES_PER_GRAPH, jnp.int32)
    offsets = (jnp.arange(GRAPHS_PER_BATCH, dtype=jnp.int32)
               * NODES_PER_GRAPH)[None, None, :, None]
    edge_index = (e_local + offsets).reshape(N_BATCHES, 2, GRAPHS_PER_BATCH * EDGES_PER_GRAPH)
    batch_vec = jnp.repeat(jnp.arange(GRAPHS_PER_BATCH, dtype=jnp.int32), NODES_PER_GRAPH)

    a_norm = jax.vmap(lambda ei: build_dense_adjacency(ei, N_NODES))(edge_index)  # [NB,N,N] f32
    pool_mat = build_pool_matrix(batch_vec, GRAPHS_PER_BATCH)                     # [G,N]  f32
    pool_b = jnp.broadcast_to(pool_mat, (N_BATCHES, GRAPHS_PER_BATCH, N_NODES))

    params = {
        "conv1": init_block_params(k1, INDIM, HIDDEN),
        "conv2": init_block_params(k2, HIDDEN, HIDDEN),
        "conv3": init_block_params(k3, HIDDEN, HIDDEN),
        "conv4": init_block_params(k4, HIDDEN, HIDDEN),
        "head":  init_head_params(kh, HIDDEN, OUTDIM),
    }
    packed = pack_params(params)

    # zero-pad node features to the lane-dense width; bf16 MXU operands
    x_pad = jnp.zeros((N_BATCHES, N_NODES, PAD), jnp.float32).at[:, :, :INDIM].set(x)
    a_bf16 = a_norm.astype(jnp.bfloat16)
    p_bf16 = pool_b.astype(jnp.bfloat16)

    out_pad = gnn_forward(x_pad, a_bf16, p_bf16, packed)
    out_pad = jax.block_until_ready(out_pad)
    out = out_pad[:, :, :OUTDIM]                       # slice lane-padded head output

    ref = jnp.stack([reference_forward(x[b], a_norm[b], pool_mat, params)
                     for b in range(N_BATCHES)])

    assert out.shape == (N_BATCHES, GRAPHS_PER_BATCH, OUTDIM)
    assert jnp.all(jnp.isfinite(out))
    # bf16 MXU operands vs. f32 reference across 4 blocks -> relaxed tolerance.
    max_err = float(jnp.max(jnp.abs(out - ref)))
    assert jnp.allclose(out, ref, rtol=5e-2, atol=5e-2), f"max abs err {max_err}"
    print("KERNEL_OK")
</pallas_src>

<mosaic_0001>
module attributes {stable_mosaic.version = 11 : i64} {
  func.func @gnn_fused_kernel(%arg0: i32, %arg1: memref<4xf32, #tpu.memory_space<smem>>, %arg2: memref<1x256x128xf32, #tpu.memory_space<vmem>>, %arg3: memref<1x256x256xbf16, #tpu.memory_space<vmem>>, %arg4: memref<1x16x256xbf16, #tpu.memory_space<vmem>>, %arg5: memref<4x256x128xbf16, #tpu.memory_space<vmem>>, %arg6: memref<4x1x128xf32, #tpu.memory_space<vmem>>, %arg7: memref<4x1x128xf32, #tpu.memory_space<vmem>>, %arg8: memref<4x1x128xf32, #tpu.memory_space<vmem>>, %arg9: memref<128x128xbf16, #tpu.memory_space<vmem>>, %arg10: memref<1x128xf32, #tpu.memory_space<vmem>>, %arg11: memref<128x128xbf16, #tpu.memory_space<vmem>>, %arg12: memref<1x128xf32, #tpu.memory_space<vmem>>, %arg13: memref<1x16x128xf32, #tpu.memory_space<vmem>>) attributes {dimension_semantics = [#tpu.dimension_semantics<parallel>], iteration_bounds = array<i64: 2>, scalar_prefetch = 0 : i64, scratch_operands = 0 : i64, tpu.core_type = #tpu.core_type<tc>, window_params = [{transform_indices = @transform_0, window_bounds = array<i64: 4>}, {transform_indices = @transform_1, window_bounds = array<i64: 1, 256, 128>}, {transform_indices = @transform_2, window_bounds = array<i64: 1, 256, 256>}, {transform_indices = @transform_3, window_bounds = array<i64: 1, 16, 256>}, {pipeline_mode = #tpu.pipeline_mode<synchronous>, transform_indices = @transform_4, window_bounds = array<i64: 4, 256, 128>}, {pipeline_mode = #tpu.pipeline_mode<synchronous>, transform_indices = @transform_5, window_bounds = array<i64: 4, 1, 128>}, {pipeline_mode = #tpu.pipeline_mode<synchronous>, transform_indices = @transform_6, window_bounds = array<i64: 4, 1, 128>}, {pipeline_mode = #tpu.pipeline_mode<synchronous>, transform_indices = @transform_7, window_bounds = array<i64: 4, 1, 128>}, {pipeline_mode = #tpu.pipeline_mode<synchronous>, transform_indices = @transform_8, window_bounds = array<i64: 128, 128>}, {pipeline_mode = #tpu.pipeline_mode<synchronous>, transform_indices = @transform_9, window_bounds = array<i64: 1, 128>}, {pipeline_mode = #tpu.pipeline_mode<synchronous>, transform_indices = @transform_10, window_bounds = array<i64: 128, 128>}, {pipeline_mode = #tpu.pipeline_mode<synchronous>, transform_indices = @transform_11, window_bounds = array<i64: 1, 128>}, {transform_indices = @transform_12, window_bounds = array<i64: 1, 16, 128>}]} {
    %c0 = arith.constant 0 : index
    %c0_0 = arith.constant 0 : index
    %c0_1 = arith.constant 0 : index
    %0 = vector.load %arg2[%c0, %c0_0, %c0_1] : memref<1x256x128xf32, #tpu.memory_space<vmem>>, vector<1x256x128xf32>
    %1 = vector.shape_cast %0 : vector<1x256x128xf32> to vector<256x128xf32>
    %c0_2 = arith.constant 0 : index
    %c0_3 = arith.constant 0 : index
    %c0_4 = arith.constant 0 : index
    %2 = vector.load %arg3[%c0_2, %c0_3, %c0_4] : memref<1x256x256xbf16, #tpu.memory_space<vmem>>, vector<1x256x256xbf16>
    %3 = vector.shape_cast %2 : vector<1x256x256xbf16> to vector<256x256xbf16>
    %4 = arith.truncf %1 : vector<256x128xf32> to vector<256x128xbf16>
    %cst = arith.constant dense<0.000000e+00> : vector<256x128xf32>
    %5 = tpu.matmul %3, %4, %cst {dimension_numbers = #tpu.dot_dimension_numbers<[1], [0], [0], [1], [0, 0, 1, 1], [], []>} : vector<256x256xbf16>, vector<256x128xbf16>, vector<256x128xf32> -> vector<256x128xf32>
    %6 = arith.truncf %5 : vector<256x128xf32> to vector<256x128xbf16>
    %7 = tpu.concatenate %4, %6 in 1 : vector<256x128xbf16>, vector<256x128xbf16> -> vector<256x256xbf16>
    %c0_5 = arith.constant 0 : index
    %c0_6 = arith.constant 0 : index
    %c0_7 = arith.constant 0 : index
    %8 = vector.load %arg5[%c0_5, %c0_6, %c0_7] : memref<4x256x128xbf16, #tpu.memory_space<vmem>>, vector<1x256x128xbf16>
    %9 = vector.shape_cast %8 : vector<1x256x128xbf16> to vector<256x128xbf16>
    %cst_8 = arith.constant dense<0.000000e+00> : vector<256x128xf32>
    %10 = tpu.matmul %7, %9, %cst_8 {dimension_numbers = #tpu.dot_dimension_numbers<[1], [0], [0], [1], [0, 0, 1, 1], [], []>} : vector<256x256xbf16>, vector<256x128xbf16>, vector<256x128xf32> -> vector<256x128xf32>
    %c0_9 = arith.constant 0 : index
    %c0_10 = arith.constant 0 : index
    %c0_11 = arith.constant 0 : index
    %11 = vector.load %arg6[%c0_9, %c0_10, %c0_11] : memref<4x1x128xf32, #tpu.memory_space<vmem>>, vector<1x1x128xf32>
    %12 = vector.shape_cast %11 : vector<1x1x128xf32> to vector<1x128xf32>
    %13 = vector.broadcast %12 : vector<1x128xf32> to vector<256x128xf32>
    %14 = arith.addf %10, %13 : vector<256x128xf32>
    %c0_12 = arith.constant 0 : index
    %15 = memref.load %arg1[%c0_12] : memref<4xf32, #tpu.memory_space<smem>>
    %cst_13 = arith.constant 0.000000e+00 : f32
    %16 = vector.broadcast %cst_13 : f32 to vector<256x128xf32>
    %17 = arith.cmpf oge, %14, %16 : vector<256x128xf32>
    %18 = vector.broadcast %15 : f32 to vector<256x128xf32>
    %19 = arith.mulf %18, %14 : vector<256x128xf32>
    %20 = arith.select %17, %14, %19 : vector<256x128xi1>, vector<256x128xf32>
    %cst_14 = arith.constant dense<0.000000e+00> : vector<128xf32>
    %21 = vector.multi_reduction <add>, %20, %cst_14 [0] : vector<256x128xf32> to vector<128xf32>
    %22 = vector.shape_cast %21 : vector<128xf32> to vector<1x128xf32>
    %cst_15 = arith.constant 2.560000e+02 : f32
    %23 = vector.broadcast %cst_15 : f32 to vector<1x128xf32>
    %24 = arith.divf %22, %23 : vector<1x128xf32>
    %25 = vector.broadcast %24 : vector<1x128xf32> to vector<256x128xf32>
    %26 = arith.subf %20, %25 : vector<256x128xf32>
    %27 = arith.mulf %26, %26 : vector<256x128xf32>
    %cst_16 = arith.constant dense<0.000000e+00> : vector<128xf32>
    %28 = vector.multi_reduction <add>, %27, %cst_16 [0] : vector<256x128xf32> to vector<128xf32>
    %29 = vector.shape_cast %28 : vector<128xf32> to vector<1x128xf32>
    %cst_17 = arith.constant 2.560000e+02 : f32
    %30 = vector.broadcast %cst_17 : f32 to vector<1x128xf32>
    %31 = arith.divf %29, %30 : vector<1x128xf32>
    %cst_18 = arith.constant 9.99999974E-6 : f32
    %32 = vector.broadcast %cst_18 : f32 to vector<1x128xf32>
    %33 = arith.addf %31, %32 : vector<1x128xf32>
    %34 = math.rsqrt %33 : vector<1x128xf32>
    %35 = vector.broadcast %34 : vector<1x128xf32> to vector<256x128xf32>
    %36 = arith.mulf %26, %35 : vector<256x128xf32>
    %c0_19 = arith.constant 0 : index
    %c0_20 = arith.constant 0 : index
    %c0_21 = arith.constant 0 : index
    %37 = vector.load %arg7[%c0_19, %c0_20, %c0_21] : memref<4x1x128xf32, #tpu.memory_space<vmem>>, vector<1x1x128xf32>
    %38 = vector.shape_cast %37 : vector<1x1x128xf32> to vector<1x128xf32>
    %39 = vector.broadcast %38 : vector<1x128xf32> to vector<256x128xf32>
    %40 = arith.mulf %36, %39 : vector<256x128xf32>
    %c0_22 = arith.constant 0 : index
    %c0_23 = arith.constant 0 : index
    %c0_24 = arith.constant 0 : index
    %41 = vector.load %arg8[%c0_22, %c0_23, %c0_24] : memref<4x1x128xf32, #tpu.memory_space<vmem>>, vector<1x1x128xf32>
    %42 = vector.shape_cast %41 : vector<1x1x128xf32> to vector<1x128xf32>
    %43 = vector.broadcast %42 : vector<1x128xf32> to vector<256x128xf32>
    %44 = arith.addf %40, %43 : vector<256x128xf32>
    %45 = arith.truncf %44 : vector<256x128xf32> to vector<256x128xbf16>
    %cst_25 = arith.constant dense<0.000000e+00> : vector<256x128xf32>
    %46 = tpu.matmul %3, %45, %cst_25 {dimension_numbers = #tpu.dot_dimension_numbers<[1], [0], [0], [1], [0, 0, 1, 1], [], []>} : vector<256x256xbf16>, vector<256x128xbf16>, vector<256x128xf32> -> vector<256x128xf32>
    %47 = arith.truncf %46 : vector<256x128xf32> to vector<256x128xbf16>
    %48 = tpu.concatenate %45, %47 in 1 : vector<256x128xbf16>, vector<256x128xbf16> -> vector<256x256xbf16>
    %c1 = arith.constant 1 : index
    %c0_26 = arith.constant 0 : index
    %c0_27 = arith.constant 0 : index
    %49 = vector.load %arg5[%c1, %c0_26, %c0_27] : memref<4x256x128xbf16, #tpu.memory_space<vmem>>, vector<1x256x128xbf16>
    %50 = vector.shape_cast %49 : vector<1x256x128xbf16> to vector<256x128xbf16>
    %cst_28 = arith.constant dense<0.000000e+00> : vector<256x128xf32>
    %51 = tpu.matmul %48, %50, %cst_28 {dimension_numbers = #tpu.dot_dimension_numbers<[1], [0], [0], [1], [0, 0, 1, 1], [], []>} : vector<256x256xbf16>, vector<256x128xbf16>, vector<256x128xf32> -> vector<256x128xf32>
    %c1_29 = arith.constant 1 : index
    %c0_30 = arith.constant 0 : index
    %c0_31 = arith.constant 0 : index
    %52 = vector.load %arg6[%c1_29, %c0_30, %c0_31] : memref<4x1x128xf32, #tpu.memory_space<vmem>>, vector<1x1x128xf32>
    %53 = vector.shape_cast %52 : vector<1x1x128xf32> to vector<1x128xf32>
    %54 = vector.broadcast %53 : vector<1x128xf32> to vector<256x128xf32>
    %55 = arith.addf %51, %54 : vector<256x128xf32>
    %c1_32 = arith.constant 1 : index
    %56 = memref.load %arg1[%c1_32] : memref<4xf32, #tpu.memory_space<smem>>
    %cst_33 = arith.constant 0.000000e+00 : f32
    %57 = vector.broadcast %cst_33 : f32 to vector<256x128xf32>
    %58 = arith.cmpf oge, %55, %57 : vector<256x128xf32>
    %59 = vector.broadcast %56 : f32 to vector<256x128xf32>
    %60 = arith.mulf %59, %55 : vector<256x128xf32>
    %61 = arith.select %58, %55, %60 : vector<256x128xi1>, vector<256x128xf32>
    %cst_34 = arith.constant dense<0.000000e+00> : vector<128xf32>
    %62 = vector.multi_reduction <add>, %61, %cst_34 [0] : vector<256x128xf32> to vector<128xf32>
    %63 = vector.shape_cast %62 : vector<128xf32> to vector<1x128xf32>
    %cst_35 = arith.constant 2.560000e+02 : f32
    %64 = vector.broadcast %cst_35 : f32 to vector<1x128xf32>
    %65 = arith.divf %63, %64 : vector<1x128xf32>
    %66 = vector.broadcast %65 : vector<1x128xf32> to vector<256x128xf32>
    %67 = arith.subf %61, %66 : vector<256x128xf32>
    %68 = arith.mulf %67, %67 : vector<256x128xf32>
    %cst_36 = arith.constant dense<0.000000e+00> : vector<128xf32>
    %69 = vector.multi_reduction <add>, %68, %cst_36 [0] : vector<256x128xf32> to vector<128xf32>
    %70 = vector.shape_cast %69 : vector<128xf32> to vector<1x128xf32>
    %cst_37 = arith.constant 2.560000e+02 : f32
    %71 = vector.broadcast %cst_37 : f32 to vector<1x128xf32>
    %72 = arith.divf %70, %71 : vector<1x128xf32>
    %cst_38 = arith.constant 9.99999974E-6 : f32
    %73 = vector.broadcast %cst_38 : f32 to vector<1x128xf32>
    %74 = arith.addf %72, %73 : vector<1x128xf32>
    %75 = math.rsqrt %74 : vector<1x128xf32>
    %76 = vector.broadcast %75 : vector<1x128xf32> to vector<256x128xf32>
    %77 = arith.mulf %67, %76 : vector<256x128xf32>
    %c1_39 = arith.constant 1 : index
    %c0_40 = arith.constant 0 : index
    %c0_41 = arith.constant 0 : index
    %78 = vector.load %arg7[%c1_39, %c0_40, %c0_41] : memref<4x1x128xf32, #tpu.memory_space<vmem>>, vector<1x1x128xf32>
    %79 = vector.shape_cast %78 : vector<1x1x128xf32> to vector<1x128xf32>
    %80 = vector.broadcast %79 : vector<1x128xf32> to vector<256x128xf32>
    %81 = arith.mulf %77, %80 : vector<256x128xf32>
    %c1_42 = arith.constant 1 : index
    %c0_43 = arith.constant 0 : index
    %c0_44 = arith.constant 0 : index
    %82 = vector.load %arg8[%c1_42, %c0_43, %c0_44] : memref<4x1x128xf32, #tpu.memory_space<vmem>>, vector<1x1x128xf32>
    %83 = vector.shape_cast %82 : vector<1x1x128xf32> to vector<1x128xf32>
    %84 = vector.broadcast %83 : vector<1x128xf32> to vector<256x128xf32>
    %85 = arith.addf %81, %84 : vector<256x128xf32>
    %86 = arith.truncf %85 : vector<256x128xf32> to vector<256x128xbf16>
    %cst_45 = arith.constant dense<0.000000e+00> : vector<256x128xf32>
    %87 = tpu.matmul %3, %86, %cst_45 {dimension_numbers = #tpu.dot_dimension_numbers<[1], [0], [0], [1], [0, 0, 1, 1], [], []>} : vector<256x256xbf16>, vector<256x128xbf16>, vector<256x128xf32> -> vector<256x128xf32>
    %88 = arith.truncf %87 : vector<256x128xf32> to vector<256x128xbf16>
    %89 = tpu.concatenate %86, %88 in 1 : vector<256x128xbf16>, vector<256x128xbf16> -> vector<256x256xbf16>
    %c2 = arith.constant 2 : index
    %c0_46 = arith.constant 0 : index
    %c0_47 = arith.constant 0 : index
    %90 = vector.load %arg5[%c2, %c0_46, %c0_47] : memref<4x256x128xbf16, #tpu.memory_space<vmem>>, vector<1x256x128xbf16>
    %91 = vector.shape_cast %90 : vector<1x256x128xbf16> to vector<256x128xbf16>
    %cst_48 = arith.constant dense<0.000000e+00> : vector<256x128xf32>
    %92 = tpu.matmul %89, %91, %cst_48 {dimension_numbers = #tpu.dot_dimension_numbers<[1], [0], [0], [1], [0, 0, 1, 1], [], []>} : vector<256x256xbf16>, vector<256x128xbf16>, vector<256x128xf32> -> vector<256x128xf32>
    %c2_49 = arith.constant 2 : index
    %c0_50 = arith.constant 0 : index
    %c0_51 = arith.constant 0 : index
    %93 = vector.load %arg6[%c2_49, %c0_50, %c0_51] : memref<4x1x128xf32, #tpu.memory_space<vmem>>, vector<1x1x128xf32>
    %94 = vector.shape_cast %93 : vector<1x1x128xf32> to vector<1x128xf32>
    %95 = vector.broadcast %94 : vector<1x128xf32> to vector<256x128xf32>
    %96 = arith.addf %92, %95 : vector<256x128xf32>
    %c2_52 = arith.constant 2 : index
    %97 = memref.load %arg1[%c2_52] : memref<4xf32, #tpu.memory_space<smem>>
    %cst_53 = arith.constant 0.000000e+00 : f32
    %98 = vector.broadcast %cst_53 : f32 to vector<256x128xf32>
    %99 = arith.cmpf oge, %96, %98 : vector<256x128xf32>
    %100 = vector.broadcast %97 : f32 to vector<256x128xf32>
    %101 = arith.mulf %100, %96 : vector<256x128xf32>
    %102 = arith.select %99, %96, %101 : vector<256x128xi1>, vector<256x128xf32>
    %cst_54 = arith.constant dense<0.000000e+00> : vector<128xf32>
    %103 = vector.multi_reduction <add>, %102, %cst_54 [0] : vector<256x128xf32> to vector<128xf32>
    %104 = vector.shape_cast %103 : vector<128xf32> to vector<1x128xf32>
    %cst_55 = arith.constant 2.560000e+02 : f32
    %105 = vector.broadcast %cst_55 : f32 to vector<1x128xf32>
    %106 = arith.divf %104, %105 : vector<1x128xf32>
    %107 = vector.broadcast %106 : vector<1x128xf32> to vector<256x128xf32>
    %108 = arith.subf %102, %107 : vector<256x128xf32>
    %109 = arith.mulf %108, %108 : vector<256x128xf32>
    %cst_56 = arith.constant dense<0.000000e+00> : vector<128xf32>
    %110 = vector.multi_reduction <add>, %109, %cst_56 [0] : vector<256x128xf32> to vector<128xf32>
    %111 = vector.shape_cast %110 : vector<128xf32> to vector<1x128xf32>
    %cst_57 = arith.constant 2.560000e+02 : f32
    %112 = vector.broadcast %cst_57 : f32 to vector<1x128xf32>
    %113 = arith.divf %111, %112 : vector<1x128xf32>
    %cst_58 = arith.constant 9.99999974E-6 : f32
    %114 = vector.broadcast %cst_58 : f32 to vector<1x128xf32>
    %115 = arith.addf %113, %114 : vector<1x128xf32>
    %116 = math.rsqrt %115 : vector<1x128xf32>
    %117 = vector.broadcast %116 : vector<1x128xf32> to vector<256x128xf32>
    %118 = arith.mulf %108, %117 : vector<256x128xf32>
    %c2_59 = arith.constant 2 : index
    %c0_60 = arith.constant 0 : index
    %c0_61 = arith.constant 0 : index
    %119 = vector.load %arg7[%c2_59, %c0_60, %c0_61] : memref<4x1x128xf32, #tpu.memory_space<vmem>>, vector<1x1x128xf32>
    %120 = vector.shape_cast %119 : vector<1x1x128xf32> to vector<1x128xf32>
    %121 = vector.broadcast %120 : vector<1x128xf32> to vector<256x128xf32>
    %122 = arith.mulf %118, %121 : vector<256x128xf32>
    %c2_62 = arith.constant 2 : index
    %c0_63 = arith.constant 0 : index
    %c0_64 = arith.constant 0 : index
    %123 = vector.load %arg8[%c2_62, %c0_63, %c0_64] : memref<4x1x128xf32, #tpu.memory_space<vmem>>, vector<1x1x128xf32>
    %124 = vector.shape_cast %123 : vector<1x1x128xf32> to vector<1x128xf32>
    %125 = vector.broadcast %124 : vector<1x128xf32> to vector<256x128xf32>
    %126 = arith.addf %122, %125 : vector<256x128xf32>
    %127 = arith.truncf %126 : vector<256x128xf32> to vector<256x128xbf16>
    %cst_65 = arith.constant dense<0.000000e+00> : vector<256x128xf32>
    %128 = tpu.matmul %3, %127, %cst_65 {dimension_numbers = #tpu.dot_dimension_numbers<[1], [0], [0], [1], [0, 0, 1, 1], [], []>} : vector<256x256xbf16>, vector<256x128xbf16>, vector<256x128xf32> -> vector<256x128xf32>
    %129 = arith.truncf %128 : vector<256x128xf32> to vector<256x128xbf16>
    %130 = tpu.concatenate %127, %129 in 1 : vector<256x128xbf16>, vector<256x128xbf16> -> vector<256x256xbf16>
    %c3 = arith.constant 3 : index
    %c0_66 = arith.constant 0 : index
    %c0_67 = arith.constant 0 : index
    %131 = vector.load %arg5[%c3, %c0_66, %c0_67] : memref<4x256x128xbf16, #tpu.memory_space<vmem>>, vector<1x256x128xbf16>
    %132 = vector.shape_cast %131 : vector<1x256x128xbf16> to vector<256x128xbf16>
    %cst_68 = arith.constant dense<0.000000e+00> : vector<256x128xf32>
    %133 = tpu.matmul %130, %132, %cst_68 {dimension_numbers = #tpu.dot_dimension_numbers<[1], [0], [0], [1], [0, 0, 1, 1], [], []>} : vector<256x256xbf16>, vector<256x128xbf16>, vector<256x128xf32> -> vector<256x128xf32>
    %c3_69 = arith.constant 3 : index
    %c0_70 = arith.constant 0 : index
    %c0_71 = arith.constant 0 : index
    %134 = vector.load %arg6[%c3_69, %c0_70, %c0_71] : memref<4x1x128xf32, #tpu.memory_space<vmem>>, vector<1x1x128xf32>
    %135 = vector.shape_cast %134 : vector<1x1x128xf32> to vector<1x128xf32>
    %136 = vector.broadcast %135 : vector<1x128xf32> to vector<256x128xf32>
    %137 = arith.addf %133, %136 : vector<256x128xf32>
    %c3_72 = arith.constant 3 : index
    %138 = memref.load %arg1[%c3_72] : memref<4xf32, #tpu.memory_space<smem>>
    %cst_73 = arith.constant 0.000000e+00 : f32
    %139 = vector.broadcast %cst_73 : f32 to vector<256x128xf32>
    %140 = arith.cmpf oge, %137, %139 : vector<256x128xf32>
    %141 = vector.broadcast %138 : f32 to vector<256x128xf32>
    %142 = arith.mulf %141, %137 : vector<256x128xf32>
    %143 = arith.select %140, %137, %142 : vector<256x128xi1>, vector<256x128xf32>
    %cst_74 = arith.constant dense<0.000000e+00> : vector<128xf32>
    %144 = vector.multi_reduction <add>, %143, %cst_74 [0] : vector<256x128xf32> to vector<128xf32>
    %145 = vector.shape_cast %144 : vector<128xf32> to vector<1x128xf32>
    %cst_75 = arith.constant 2.560000e+02 : f32
    %146 = vector.broadcast %cst_75 : f32 to vector<1x128xf32>
    %147 = arith.divf %145, %146 : vector<1x128xf32>
    %148 = vector.broadcast %147 : vector<1x128xf32> to vector<256x128xf32>
    %149 = arith.subf %143, %148 : vector<256x128xf32>
    %150 = arith.mulf %149, %149 : vector<256x128xf32>
    %cst_76 = arith.constant dense<0.000000e+00> : vector<128xf32>
    %151 = vector.multi_reduction <add>, %150, %cst_76 [0] : vector<256x128xf32> to vector<128xf32>
    %152 = vector.shape_cast %151 : vector<128xf32> to vector<1x128xf32>
    %cst_77 = arith.constant 2.560000e+02 : f32
    %153 = vector.broadcast %cst_77 : f32 to vector<1x128xf32>
    %154 = arith.divf %152, %153 : vector<1x128xf32>
    %cst_78 = arith.constant 9.99999974E-6 : f32
    %155 = vector.broadcast %cst_78 : f32 to vector<1x128xf32>
    %156 = arith.addf %154, %155 : vector<1x128xf32>
    %157 = math.rsqrt %156 : vector<1x128xf32>
    %158 = vector.broadcast %157 : vector<1x128xf32> to vector<256x128xf32>
    %159 = arith.mulf %149, %158 : vector<256x128xf32>
    %c3_79 = arith.constant 3 : index
    %c0_80 = arith.constant 0 : index
    %c0_81 = arith.constant 0 : index
    %160 = vector.load %arg7[%c3_79, %c0_80, %c0_81] : memref<4x1x128xf32, #tpu.memory_space<vmem>>, vector<1x1x128xf32>
    %161 = vector.shape_cast %160 : vector<1x1x128xf32> to vector<1x128xf32>
    %162 = vector.broadcast %161 : vector<1x128xf32> to vector<256x128xf32>
    %163 = arith.mulf %159, %162 : vector<256x128xf32>
    %c3_82 = arith.constant 3 : index
    %c0_83 = arith.constant 0 : index
    %c0_84 = arith.constant 0 : index
    %164 = vector.load %arg8[%c3_82, %c0_83, %c0_84] : memref<4x1x128xf32, #tpu.memory_space<vmem>>, vector<1x1x128xf32>
    %165 = vector.shape_cast %164 : vector<1x1x128xf32> to vector<1x128xf32>
    %166 = vector.broadcast %165 : vector<1x128xf32> to vector<256x128xf32>
    %167 = arith.addf %163, %166 : vector<256x128xf32>
    %c0_85 = arith.constant 0 : index
    %c0_86 = arith.constant 0 : index
    %c0_87 = arith.constant 0 : index
    %168 = vector.load %arg4[%c0_85, %c0_86, %c0_87] : memref<1x16x256xbf16, #tpu.memory_space<vmem>>, vector<1x16x256xbf16>
    %169 = vector.shape_cast %168 : vector<1x16x256xbf16> to vector<16x256xbf16>
    %170 = arith.truncf %167 : vector<256x128xf32> to vector<256x128xbf16>
    %cst_88 = arith.constant dense<0.000000e+00> : vector<16x128xf32>
    %171 = tpu.matmul %169, %170, %cst_88 {dimension_numbers = #tpu.dot_dimension_numbers<[1], [0], [0], [1], [0, 0, 1, 1], [], []>} : vector<16x256xbf16>, vector<256x128xbf16>, vector<16x128xf32> -> vector<16x128xf32>
    %172 = arith.truncf %171 : vector<16x128xf32> to vector<16x128xbf16>
    %c0_89 = arith.constant 0 : index
    %c0_90 = arith.constant 0 : index
    %173 = vector.load %arg9[%c0_89, %c0_90] : memref<128x128xbf16, #tpu.memory_space<vmem>>, vector<128x128xbf16>
    %cst_91 = arith.constant dense<0.000000e+00> : vector<16x128xf32>
    %174 = tpu.matmul %172, %173, %cst_91 {dimension_numbers = #tpu.dot_dimension_numbers<[1], [0], [0], [1], [0, 0, 1, 1], [], []>} : vector<16x128xbf16>, vector<128x128xbf16>, vector<16x128xf32> -> vector<16x128xf32>
    %c0_92 = arith.constant 0 : index
    %c0_93 = arith.constant 0 : index
    %175 = vector.load %arg10[%c0_92, %c0_93] : memref<1x128xf32, #tpu.memory_space<vmem>>, vector<1x128xf32>
    %176 = vector.broadcast %175 : vector<1x128xf32> to vector<16x128xf32>
    %177 = arith.addf %174, %176 : vector<16x128xf32>
    %cst_94 = arith.constant 0.000000e+00 : f32
    %178 = vector.broadcast %cst_94 : f32 to vector<16x128xf32>
    %179 = arith.maximumf %177, %178 : vector<16x128xf32>
    %180 = arith.truncf %179 : vector<16x128xf32> to vector<16x128xbf16>
    %c0_95 = arith.constant 0 : index
    %c0_96 = arith.constant 0 : index
    %181 = vector.load %arg11[%c0_95, %c0_96] : memref<128x128xbf16, #tpu.memory_space<vmem>>, vector<128x128xbf16>
    %cst_97 = arith.constant dense<0.000000e+00> : vector<16x128xf32>
    %182 = tpu.matmul %180, %181, %cst_97 {dimension_numbers = #tpu.dot_dimension_numbers<[1], [0], [0], [1], [0, 0, 1, 1], [], []>} : vector<16x128xbf16>, vector<128x128xbf16>, vector<16x128xf32> -> vector<16x128xf32>
    %c0_98 = arith.constant 0 : index
    %c0_99 = arith.constant 0 : index
    %183 = vector.load %arg12[%c0_98, %c0_99] : memref<1x128xf32, #tpu.memory_space<vmem>>, vector<1x128xf32>
    %184 = vector.broadcast %183 : vector<1x128xf32> to vector<16x128xf32>
    %185 = arith.addf %182, %184 : vector<16x128xf32>
    %c0_100 = arith.constant 0 : index
    %c0_101 = arith.constant 0 : index
    %c0_102 = arith.constant 0 : index
    %186 = vector.load %arg13[%c0_100, %c0_101, %c0_102] : memref<1x16x128xf32, #tpu.memory_space<vmem>>, vector<1x16x128xf32>
    %187 = vector.shape_cast %186 : vector<1x16x128xf32> to vector<16x128xf32>
    %188 = vector.shape_cast %185 : vector<16x128xf32> to vector<1x16x128xf32>
    tpu.vector_store %arg13[%c0_100, %c0_101, %c0_102], %188 {strides = array<i32>} : memref<1x16x128xf32, #tpu.memory_space<vmem>>, vector<1x16x128xf32>,
    return
  }
  func.func @transform_0(%arg0: i32) -> i32 {
    %c0_i32 = arith.constant 0 : i32
    %c0_i32_0 = arith.constant 0 : i32
    return %c0_i32 : i32
  }
  func.func @transform_1(%arg0: i32) -> (i32, i32, i32) {
    %c0_i32 = arith.constant 0 : i32
    %c0_i32_0 = arith.constant 0 : i32
    %c0_i32_1 = arith.constant 0 : i32
    return %arg0, %c0_i32, %c0_i32_0 : i32, i32, i32
  }
  func.func @transform_2(%arg0: i32) -> (i32, i32, i32) {
    %c0_i32 = arith.constant 0 : i32
    %c0_i32_0 = arith.constant 0 : i32
    %c0_i32_1 = arith.constant 0 : i32
    return %arg0, %c0_i32, %c0_i32_0 : i32, i32, i32
  }
  func.func @transform_3(%arg0: i32) -> (i32, i32, i32) {
    %c0_i32 = arith.constant 0 : i32
    %c0_i32_0 = arith.constant 0 : i32
    %c0_i32_1 = arith.constant 0 : i32
    return %arg0, %c0_i32, %c0_i32_0 : i32, i32, i32
  }
  func.func @transform_4(%arg0: i32) -> (i32, i32, i32) {
    %c0_i32 = arith.constant 0 : i32
    %c0_i32_0 = arith.constant 0 : i32
    %c0_i32_1 = arith.constant 0 : i32
    %c0_i32_2 = arith.constant 0 : i32
    return %c0_i32, %c0_i32_0, %c0_i32_1 : i32, i32, i32
  }
  func.func @transform_5(%arg0: i32) -> (i32, i32, i32) {
    %c0_i32 = arith.constant 0 : i32
    %c0_i32_0 = arith.constant 0 : i32
    %c0_i32_1 = arith.constant 0 : i32
    %c0_i32_2 = arith.constant 0 : i32
    return %c0_i32, %c0_i32_0, %c0_i32_1 : i32, i32, i32
  }
  func.func @transform_6(%arg0: i32) -> (i32, i32, i32) {
    %c0_i32 = arith.constant 0 : i32
    %c0_i32_0 = arith.constant 0 : i32
    %c0_i32_1 = arith.constant 0 : i32
    %c0_i32_2 = arith.constant 0 : i32
    return %c0_i32, %c0_i32_0, %c0_i32_1 : i32, i32, i32
  }
  func.func @transform_7(%arg0: i32) -> (i32, i32, i32) {
    %c0_i32 = arith.constant 0 : i32
    %c0_i32_0 = arith.constant 0 : i32
    %c0_i32_1 = arith.constant 0 : i32
    %c0_i32_2 = arith.constant 0 : i32
    return %c0_i32, %c0_i32_0, %c0_i32_1 : i32, i32, i32
  }
  func.func @transform_8(%arg0: i32) -> (i32, i32) {
    %c0_i32 = arith.constant 0 : i32
    %c0_i32_0 = arith.constant 0 : i32
    %c0_i32_1 = arith.constant 0 : i32
    return %c0_i32, %c0_i32_0 : i32, i32
  }
  func.func @transform_9(%arg0: i32) -> (i32, i32) {
    %c0_i32 = arith.constant 0 : i32
    %c0_i32_0 = arith.constant 0 : i32
    %c0_i32_1 = arith.constant 0 : i32
    return %c0_i32, %c0_i32_0 : i32, i32
  }
  func.func @transform_10(%arg0: i32) -> (i32, i32) {
    %c0_i32 = arith.constant 0 : i32
    %c0_i32_0 = arith.constant 0 : i32
    %c0_i32_1 = arith.constant 0 : i32
    return %c0_i32, %c0_i32_0 : i32, i32
  }
  func.func @transform_11(%arg0: i32) -> (i32, i32) {
    %c0_i32 = arith.constant 0 : i32
    %c0_i32_0 = arith.constant 0 : i32
    %c0_i32_1 = arith.constant 0 : i32
    return %c0_i32, %c0_i32_0 : i32, i32
  }
  func.func @transform_12(%arg0: i32) -> (i32, i32, i32) {
    %c0_i32 = arith.constant 0 : i32
    %c0_i32_0 = arith.constant 0 : i32
    %c0_i32_1 = arith.constant 0 : i32
    return %arg0, %c0_i32, %c0_i32_0 : i32, i32, i32
  }
}

</mosaic_0001>

<bundles_post_ra>
// kernel: gnn_forward.1
= control target key start
LH: loop header
LB: loop body
LE: loop exit
PB: predicated region body
PF: predicated region fallthrough
CT: control target
= control target key end

     0   :  { %s9124_s0 = inlined_call_operand.vmem [shape: f32[4], index: 0, kind: input, shape index: {}]   ;;  %s9125_s1 = inlined_call_operand.hbm [shape: f32[2,256,128], index: 1, kind: input, shape index: {}]   ;;  %s9126_s2 = inlined_call_operand.hbm [shape: bf16[2,256,256], index: 2, kind: input, shape index: {}]   ;;  %s9127_s3 = inlined_call_operand.hbm [shape: bf16[2,16,256], index: 3, kind: input, shape index: {}]   ;;  %s9128_s4 = inlined_call_operand.hbm [shape: bf16[4,256,128], index: 4, kind: input, shape index: {}]   ;;  %s9129_s5 = inlined_call_operand.vmem [shape: f32[4,1,128], index: 5, kind: input, shape index: {}]   ;;  %s9130_s6 = inlined_call_operand.vmem [shape: f32[4,1,128], index: 6, kind: input, shape index: {}]   ;;  %s9131_s7 = inlined_call_operand.vmem [shape: f32[4,1,128], index: 7, kind: input, shape index: {}]   ;;  %s9132_s8 = inlined_call_operand.hbm [shape: bf16[128,128], index: 8, kind: input, shape index: {}]   ;;  %s9133_s9 = inlined_call_operand.vmem [shape: f32[1,128], index: 9, kind: input, shape index: {}]   ;;  %s9134_s10 = inlined_call_operand.hbm [shape: bf16[128,128], index: 10, kind: input, shape index: {}]   ;;  %s9135_s11 = inlined_call_operand.vmem [shape: f32[1,128], index: 11, kind: input, shape index: {}]   ;;  %s9136_s12 = inlined_call_operand.hbm [shape: f32[2,16,128], index: 12, kind: output, shape index: {}]  }
   0x1   :  { %9167 = sst [smem:[#allocation28_spill]] %s9124_s0 }
   0x2   :  { %9168 = sst [smem:[#allocation29_spill]] %s9126_s2 }
   0x3   :  { %9169 = sst [smem:[#allocation30_spill]] %s9128_s4 }
   0x4   :  { %9170 = sst [smem:[#allocation31_spill]] %s9133_s9 }
   0x5   :  { %9171 = sst [smem:[#allocation32_spill]] %s9135_s11 }
   0x6   :  { %9172 = sst [smem:[#allocation33_spill]] %s9136_s12 }
   0x7   :  { %17 = vsyncpa [#allocation5], 0 }
   0x8   :  { %18 = vsyncpa [#allocation3], 0 }
   0x9   :  { %20 = vsyncpa [#allocation3 + $0x1], 0 }
   0xa   :  { %21 = vsyncpa [#allocation8], 0 }
   0xb   :  { %23 = vsyncpa [#allocation8 + $0x1], 0 }
   0xc   :  { %24 = vsyncpa [#allocation11], 0 }
   0xd   :  { %25 = vsyncpa [#allocation14], 0 }
   0xe   :  { %26 = vsyncpa [#allocation4], 0 }
   0xf   :  { %28 = vsyncpa [#allocation4 + $0x1], 0  ;;  %s6474_s21 = smov 0   ;;  %s6476_s22 = smov 0  }
  0x10   :  { %s6478_s23 = smov 0   ;;  %s6480_s24 = smov 0  }
  0x11 LB: > { %9173 = sst [smem:[#allocation22_spill]] %s6379_s21  ;;  %s6495_s25 = sadd.s32 4294967295, %s6391_s24   ;;  %s6391_s24 = sphi %s6480_s24, %s9218_s24   ;;  %s6387_s23 = sphi %s6478_s23, %s9220_s23   ;;  %s6383_s22 = sphi %s6476_s22, %s9222_s22   ;;  %s6379_s21 = sphi %s6474_s21, %s9221_s21  }
  0x12   : > { %9174 = sst [smem:[#allocation23_spill]] %s6387_s23  ;;  %s4631_s26 = sadd.s32 4294967294, %s6391_s24  }
  0x13   : > { %p75_p0 = scmp.ne.s32.totalorder %s6383_s22, %s6379_s21  ;;  %p9140_p1 = scmp.eq.s32.totalorder %s6495_s25, 0 }
  0x14   : > { %p325_p3 = scmp.eq.s32.totalorder %s4631_s26, 1  ;;  %p4632_p5 = scmp.ge.s32.totalorder %s6391_s24, 1 }
  0x15   : > { %p6504_p4 = por %p9140_p1, %p75_p0  ;;  %p332_p7 = scmp.lt.s32.totalorder %s6391_s24, 3 }
  0x16   : > { %p6509_p6 = por %p325_p3, %p75_p0  ;;  %s6393_s30 = smov [#allocation10]  }
  0x17   : > { %s9175_s27 = scalar_select %p6504_p4, 1, 0 }
  0x18   : > { %s9176_s28 = scalar_select %p6509_p6, 1, 0 }
  0x19   : > { %p6514_p8 = pnand %p4632_p5, %p332_p7  ;;  %s355_s13 = sshll.u32 %s6393_s30, 4  ;;  %s6518_s13 = int_to_ptr.vmem [resolvable:$true] %s355_s13 }
  0x1a   : > { %9177 = sst [smem:[#allocation24_spill]] %s9176_s28  ;;  %s6530_s15 = sadd.s32 1, %s6391_s24  }
  0x1b   : > { %s9178_s29 = scalar_select %p6514_p8, 1, 0 }
  0x1c   : > { %p5805_p9 = pneg %p6514_p8  ;;  %9180 = sst [smem:[#allocation25_spill]] %s6530_s15 }
  0x1d   : > { %s62_s16 = sadd.s32 1, %s6387_s23  ;;  %s59_s17 = ssub.s32 %s6391_s24, %s6530_s15 }
  0x1e   : > { %p6525_p11 = pnand %p5805_p9, %p9140_p1  ;;  %s9181_s4 = sld [smem:[#allocation30_spill]] }
  0x20   : > { %s9179_s14 = scalar_select %p6525_p11, 1, 0 }
  0x21   : > { %p6543_p13 = pneg %p6525_p11 }
  0x23   : > { %s9182_s28 = scalar_select %p6543_p13, 1, 0 }
  0x24   : > { %s6120_s20 = scalar_lea.hbm %s9181_s4, 8192 }
  0x25   : > { %p6121_p12 = scmp.ne.s32.totalorder %s9181_s4, %s6120_s20  ;;  %p6127_p5 = scmp.lt.u32.totalorder %s6120_s20, %s9181_s4 }
  0x27   : > { %p6123_p0 = pnand %p6543_p13, %p6121_p12 }
  0x29   : > { %p6124_p3 = pneg %p6123_p0 }
  0x2b   : > { %p6129_p7 = pnand %p6127_p5, %p6124_p3 }
  0x2d   : > { %6132 = shalt.err (!%p6129_p7)
}
  0x2e   : > { %s6133_s18 = scalar_lea.vmem %s6518_s13, 8192  ;;  %p6141_p2 = scmp.lt.s32.totalorder %s6518_s13, %s6518_s13 }
  0x2f   : > { %p6134_p9 = scmp.ne.s32.totalorder %s6518_s13, %s6133_s18  ;;  %p6142_p6 = scmp.lt.s32.totalorder %s6133_s18, %s6133_s18 }
  0x31   : > { %p6136_p10 = pnand %p6134_p9, %p6543_p13  ;;  %p6143_p12 = por %p6142_p6, %p6141_p2 }
  0x33   : > { %p6137_p1 = pneg %p6136_p10 }
  0x35   : > { %p6144_p0 = pnand %p6143_p12, %p6137_p1 }
  0x37   : > { %6147 = shalt.err (!%p6144_p0)
}
  0x38   : > { %s9143_s19 = smov 64   ;;  %s9145_s12 = smov 4  }
  0x39   : > { %5811 = dma.hbm_to_vmem [thread:$0]  (!%p6525_p11), %s9181_s4, 8192, %s6518_s13, [#allocation11], %s9143_s19, %s9143_s19, %s9145_s12  }
  0x3a   : > { %p60_p1 = scmp.eq.s32.totalorder %s59_s17, 0  ;;  %p69_p2 = scmp.ne.s32.totalorder %s6387_s23, %s6383_s22 }
  0x3b   : > { %p70_p6 = scmp.eq.s32.totalorder %s6391_s24, 0  ;;  %p5836_p10 = scmp.lt.s32.totalorder %s6391_s24, 2 }
  0x3c   : > { %s6572_s26 = scalar_select %p60_p1, %s6387_s23, %s62_s16  }
  0x3d   : > { %p71_p3 = por %p70_p6, %p69_p2  ;;  %p9184_p5 = scmp.eq.s32.totalorder %s6495_s25, 1 }
  0x3e   : > { %9183 = sst [smem:[#allocation26_spill]] %s6572_s26  ;;  %s6581_s18 = sand.u32 1, %s6387_s23  }
  0x3f   : > { %p6576_p7 = por %p9184_p5, %p69_p2  ;;  %s9151_s15 = sshll.u32 %s6391_s24, 12 }
  0x40   : > { %s9150_s11 = sshll.u32 %s6581_s18, 8  ;;  %p6585_p9 = pnand %p5836_p10, %p71_p3 }
  0x41   : > { %s9185_s30 = scalar_select %p6576_p7, 1, 0 }
  0x42   : > { %s9187_s13 = scalar_select %p6585_p9, 1, 0 }
  0x43   : > { %9186 = sst [smem:[#allocation27_spill]] %s9185_s30  ;;  %s431_s17 = sand.u32 1, %s6391_s24  }
  0x44   : > { %s9188_s2 = sld [smem:[#allocation29_spill]]  ;;  %s435_s19 = scalar_lea.vmem [#allocation7], %s9150_s11 }
  0x45   : > { %s442_s12 = sshll.u32 %s435_s19, 4  ;;  %s9189_s0 = sld [smem:[#allocation28_spill]]  ;;  %s6599_s12 = int_to_ptr.vmem [resolvable:$true] %s442_s12 }
  0x46   : > { %s6604_s30 = scalar_lea.sflag [#allocation8], %s431_s17  ;;  %p6610_p0 = pneg %p6585_p9 }
  0x48   : > { %s9190_s16 = scalar_select %p6610_p0, 1, 0 }
  0x4a   : > { %s6595_s20 = scalar_lea.hbm %s9188_s2, %s9151_s15  ;;  %s6153_s11 = scalar_lea.hbm %s9188_s2, 8192 }
  0x4b   : > { %s345_s23 = sshll.u32 %s9189_s0, 4  ;;  %s6148_s9 = scalar_lea.hbm %s6595_s20, 4096  ;;  %s346_s23 = int_to_ptr.vmem [resolvable:$true] %s345_s23 }
  0x4c   : > { %p6149_p12 = scmp.ne.s32.totalorder %s6595_s20, %s6148_s9  ;;  %p6154_p6 = scmp.lt.u32.totalorder %s6595_s20, %s9188_s2 }
  0x4d   : > { %p6155_p10 = scmp.lt.u32.totalorder %s6153_s11, %s6148_s9  ;;  %p6157_p5 = scmp.lt.u32.totalorder %s6148_s9, %s6595_s20 }
  0x4e   : > { %p6151_p1 = pnand %p6610_p0, %p6149_p12 }
  0x4f   : > { %p6156_p3 = por %p6155_p10, %p6154_p6 }
  0x50   : > { %p6152_p2 = pneg %p6151_p1 }
  0x51   : > { %p6158_p7 = por %p6157_p5, %p6156_p3 }
  0x53   : > { %p6159_p4 = pnand %p6158_p7, %p6152_p2 }
  0x55   : > { %6162 = shalt.err (!%p6159_p4)
}
  0x56   : > { %s6163_s26 = scalar_lea.vmem %s6599_s12, 4096  ;;  %s6396_s17 = smov [#allocation7]  }
  0x57   : > { %p6164_p12 = scmp.ne.s32.totalorder %s6599_s12, %s6163_s26  ;;  %s6168_s19 = sshll.u32 %s6396_s17, 4  ;;  %s6169_s19 = int_to_ptr.vmem [resolvable:$false] %s6168_s19 }
  0x58   : > { %s6170_s15 = scalar_lea.vmem %s6169_s19, 8192  ;;  %p6171_p11 = scmp.lt.s32.totalorder %s6599_s12, %s6169_s19 }
  0x59   : > { %p6166_p1 = pnand %p6164_p12, %p6610_p0  ;;  %p6172_p13 = scmp.lt.s32.totalorder %s6170_s15, %s6163_s26 }
  0x5b   : > { %p6167_p8 = pneg %p6166_p1  ;;  %p6173_p6 = por %p6172_p13, %p6171_p11 }
  0x5d   : > { %p6174_p10 = pnand %p6173_p6, %p6167_p8 }
  0x5f   : > { %6177 = shalt.err (!%p6174_p10)
}
  0x60   : > { %s9159_s9 = smov 128   ;;  %s9161_s11 = smov 8  }
  0x61   : > { %5824 = dma.hbm_to_vmem [thread:$0]  (!%p6585_p9), %s6595_s20, 4096, %s6599_s12, %s6604_s30, %s9159_s9, %s9159_s9, %s9161_s11  }
  0x62   : > { %s6178_s26 = scalar_lea.vmem %s346_s23, 16  ;;  %p9191_p8 = scmp.ne.s32.totalorder %s9182_s28, 0 }
  0x63   : > { %p6179_p4 = scmp.ne.s32.totalorder %s346_s23, %s6178_s26  ;;  %p6186_p7 = scmp.lt.s32.totalorder %s346_s23, %s346_s23 }
  0x64   : > { %p6187_p2 = scmp.lt.s32.totalorder %s6178_s26, %s6178_s26 }
  0x65   : > { %p6181_p11 = pnand %p6179_p4, %p9191_p8 }
  0x66   : > { %p6188_p3 = por %p6187_p2, %p6186_p7 }
  0x67   : > { %p6182_p13 = pneg %p6181_p11 }
  0x69   : > { %p6189_p5 = pnand %p6188_p3, %p6182_p13 }
  0x6b   : > { %6192 = shalt.err (!%p6189_p5)
}
  0x6c   : > { %s6399_s17 = smov [#allocation2]   ;;  %p9192_p12 = scmp.ne.s32.totalorder %s9179_s14, 0 }
  0x6d   : > { %s6400_s12 = smov [#allocation12]   ;;  %s6401_s19 = smov [#allocation13]  }
  0x6e   : > { %5808 = dma.vmem_to_smem (!%p9192_p12), %s346_s23, 16, %s6399_s17, [#allocation5]  }
  0x6f   : > { %s377_s20 = sshll.u32 %s6400_s12, 4  ;;  %s393_s15 = sshll.u32 %s6401_s19, 4  ;;  %s378_s20 = int_to_ptr.vmem [resolvable:$true] %s377_s20  ;;  %s6645_s15 = int_to_ptr.vmem [resolvable:$true] %s393_s15 }
  0x70   : > { %s6193_s9 = scalar_lea.hbm %s9132_s8, 1024 }
  0x71   : > { %p6194_p1 = scmp.ne.s32.totalorder %s9132_s8, %s6193_s9  ;;  %p6200_p4 = scmp.lt.u32.totalorder %s6193_s9, %s9132_s8 }
  0x73   : > { %p6196_p6 = pnand %p6194_p1, %p9191_p8 }
  0x75   : > { %p6197_p10 = pneg %p6196_p6 }
  0x77   : > { %p6202_p11 = pnand %p6200_p4, %p6197_p10 }
  0x79   : > { %6205 = shalt.err (!%p6202_p11)
}
  0x7a   : > { %s6206_s17 = scalar_lea.vmem %s378_s20, 1024  ;;  %p6214_p3 = scmp.lt.s32.totalorder %s378_s20, %s378_s20 }
  0x7b   : > { %p6207_p13 = scmp.ne.s32.totalorder %s378_s20, %s6206_s17  ;;  %p6215_p5 = scmp.lt.s32.totalorder %s6206_s17, %s6206_s17 }
  0x7d   : > { %p6209_p7 = pnand %p6207_p13, %p9191_p8  ;;  %p6216_p9 = por %p6215_p5, %p6214_p3 }
  0x7f   : > { %p6210_p2 = pneg %p6209_p7 }
  0x81   : > { %p6217_p0 = pnand %p6216_p9, %p6210_p2 }
  0x83   : > { %6220 = shalt.err (!%p6217_p0)
}
  0x84   : > { %s9193_s11 = smov 4   ;;  %s9194_s12 = smov 64  }
  0x85   : > { %5814 = dma.hbm_to_vmem [thread:$0]  (!%p9192_p12), %s9132_s8, 1024, %s378_s20, [#allocation11], %s9194_s12, %s9194_s12, %s9193_s11  }
  0x86   : > { %s6221_s4 = scalar_lea.hbm %s9134_s10, 1024 }
  0x87   : > { %p6222_p1 = scmp.ne.s32.totalorder %s9134_s10, %s6221_s4  ;;  %p6228_p6 = scmp.lt.u32.totalorder %s6221_s4, %s9134_s10 }
  0x89   : > { %p6224_p9 = pnand %p6222_p1, %p9191_p8 }
  0x8b   : > { %p6225_p0 = pneg %p6224_p9 }
  0x8d   : > { %p6230_p10 = pnand %p6228_p6, %p6225_p0 }
  0x8f   : > { %6233 = shalt.err (!%p6230_p10)
}
  0x90   : > { %s6234_s20 = scalar_lea.vmem %s6645_s15, 1024  ;;  %p6242_p7 = scmp.lt.s32.totalorder %s6645_s15, %s6645_s15 }
  0x91   : > { %p6235_p4 = scmp.ne.s32.totalorder %s6645_s15, %s6234_s20  ;;  %p6243_p2 = scmp.lt.s32.totalorder %s6234_s20, %s6234_s20 }
  0x93   : > { %p6237_p11 = pnand %p6235_p4, %p9191_p8  ;;  %p6244_p3 = por %p6243_p2, %p6242_p7 }
  0x95   : > { %p6238_p13 = pneg %p6237_p11 }
  0x97   : > { %p6245_p5 = pnand %p6244_p3, %p6238_p13 }
  0x99   : > { %6248 = shalt.err (!%p6245_p5)
}
  0x9a   : > { %5817 = dma.hbm_to_vmem [thread:$0]  (!%p9192_p12), %s9134_s10, 1024, %s6645_s15, [#allocation14], %s9194_s12, %s9194_s12, %s9193_s11  }
  0x9b   : > { %s9195_s28 = sshll.u32 %s6391_s24, 12  ;;  %s9196_s14 = sshll.u32 %s6581_s18, 8 }
  0x9c   : > { %s6699_s21 = scalar_lea.hbm %s9125_s1, %s9195_s28  ;;  %s414_s4 = scalar_lea.vmem [#allocation6], %s9196_s14 }
  0x9d   : > { %s421_s26 = sshll.u32 %s414_s4, 4  ;;  %s4644_s23 = sshll.u32 %s6581_s18, 4  ;;  %s6703_s26 = int_to_ptr.vmem [resolvable:$true] %s421_s26 }
  0x9e   : > { %s411_s17 = scalar_lea.sflag [#allocation3], %s6581_s18  ;;  %s6249_s20 = scalar_lea.hbm %s6699_s21, 4096 }
  0x9f   : > { %p6250_p8 = scmp.ne.s32.totalorder %s6699_s21, %s6249_s20  ;;  %p9197_p12 = scmp.ne.s32.totalorder %s9190_s16, 0 }
  0xa0   : > { %s6254_s12 = scalar_lea.hbm %s9125_s1, 8192  ;;  %p6255_p0 = scmp.lt.u32.totalorder %s6699_s21, %s9125_s1 }
  0xa1   : > { %p6252_p1 = pnand %p6250_p8, %p9197_p12  ;;  %p6256_p6 = scmp.lt.u32.totalorder %s6254_s12, %s6249_s20 }
  0xa2   : > { %p6258_p4 = scmp.lt.u32.totalorder %s6249_s20, %s6699_s21 }
  0xa3   : > { %p6253_p9 = pneg %p6252_p1  ;;  %p6257_p10 = por %p6256_p6, %p6255_p0 }
  0xa5   : > { %p6259_p11 = por %p6258_p4, %p6257_p10 }
  0xa7   : > { %p6260_p13 = pnand %p6259_p11, %p6253_p9 }
  0xa9   : > { %6263 = shalt.err (!%p6260_p13)
}
  0xaa   : > { %s6264_s28 = scalar_lea.vmem %s6703_s26, 4096  ;;  %s6402_s9 = smov [#allocation6]  }
  0xab   : > { %p6265_p7 = scmp.ne.s32.totalorder %s6703_s26, %s6264_s28  ;;  %s6269_s19 = sshll.u32 %s6402_s9, 4  ;;  %s6270_s19 = int_to_ptr.vmem [resolvable:$false] %s6269_s19 }
  0xac   : > { %s6271_s14 = scalar_lea.vmem %s6270_s19, 8192  ;;  %p6272_p5 = scmp.lt.s32.totalorder %s6703_s26, %s6270_s19 }
  0xad   : > { %p6267_p2 = pnand %p6265_p7, %p9197_p12  ;;  %p6273_p8 = scmp.lt.s32.totalorder %s6271_s14, %s6264_s28 }
  0xaf   : > { %p6268_p3 = pneg %p6267_p2  ;;  %p6274_p1 = por %p6273_p8, %p6272_p5 }
  0xb1   : > { %p6275_p0 = pnand %p6274_p1, %p6268_p3 }
  0xb3   : > { %6278 = shalt.err (!%p6275_p0)
}
  0xb4   : > { %p9198_p9 = scmp.ne.s32.totalorder %s9187_s13, 0  ;;  %s9199_s4 = smov 8  }
  0xb5   : > { %s9200_s20 = smov 128   ;;  %s4803_s15 = sshll.u32 %s6391_s24, 8 }
  0xb6   : > { %5821 = dma.hbm_to_vmem [thread:$0]  (!%p9198_p9), %s6699_s21, 4096, %s6703_s26, %s411_s17, %s9200_s20, %s9200_s20, %s9199_s4  }
  0xb7   : > { %s6737_s2 = scalar_lea.hbm %s9127_s3, %s4803_s15  ;;  %s456_s0 = scalar_lea.vmem [#allocation9], %s4644_s23 }
  0xb8   : > { %s463_s28 = sshll.u32 %s456_s0, 4  ;;  %s6279_s9 = scalar_lea.hbm %s6737_s2, 256  ;;  %s6741_s28 = int_to_ptr.vmem [resolvable:$true] %s463_s28 }
  0xb9   : > { %p6280_p6 = scmp.ne.s32.totalorder %s6737_s2, %s6279_s9  ;;  %s6284_s17 = scalar_lea.hbm %s9127_s3, 512 }
  0xba   : > { %p6285_p11 = scmp.lt.u32.totalorder %s6737_s2, %s9127_s3  ;;  %p6286_p13 = scmp.lt.u32.totalorder %s6284_s17, %s6279_s9 }
  0xbb   : > { %p6282_p10 = pnand %p6280_p6, %p9197_p12  ;;  %p6288_p2 = scmp.lt.u32.totalorder %s6279_s9, %s6737_s2 }
  0xbc   : > { %p6287_p7 = por %p6286_p13, %p6285_p11 }
  0xbd   : > { %p6283_p4 = pneg %p6282_p10 }
  0xbe   : > { %p6289_p3 = por %p6288_p2, %p6287_p7 }
  0xc0   : > { %p6290_p5 = pnand %p6289_p3, %p6283_p4 }
  0xc2   : > { %6293 = shalt.err (!%p6290_p5)
}
  0xc3   : > { %s6294_s18 = scalar_lea.vmem %s6741_s28, 256  ;;  %s6403_s23 = smov [#allocation9]  }
  0xc4   : > { %p6295_p8 = scmp.ne.s32.totalorder %s6741_s28, %s6294_s18  ;;  %s6299_s15 = sshll.u32 %s6403_s23, 4  ;;  %s6300_s15 = int_to_ptr.vmem [resolvable:$false] %s6299_s15 }
  0xc5   : > { %s6301_s11 = scalar_lea.vmem %s6300_s15, 512  ;;  %p6302_p6 = scmp.lt.s32.totalorder %s6741_s28, %s6300_s15 }
  0xc6   : > { %p6297_p1 = pnand %p6295_p8, %p9197_p12  ;;  %p6303_p10 = scmp.lt.s32.totalorder %s6301_s11, %s6294_s18 }
  0xc8   : > { %p6298_p0 = pneg %p6297_p1  ;;  %p6304_p11 = por %p6303_p10, %p6302_p6 }
  0xca   : > { %p6305_p13 = pnand %p6304_p11, %p6298_p0 }
  0xcc   : > { %6308 = shalt.err (!%p6305_p13)
}
  0xcd   : > { %5827 = dma.hbm_to_vmem [thread:$0]  (!%p9198_p9), %s6737_s2, 256, %s6741_s28, %s6604_s30, %s9200_s20, %s9200_s20, %s9199_s4  }
  0xce   : > { %p9201_p12 = scmp.ne.s32.totalorder %s9178_s29, 0 }
  0xcf   : > { %p9202_p4 = scmp.eq.s32.totalorder (!%p9201_p12), %s6495_s25, 0 }
  0xd0   : > { %475 = sbr.rel (%p9201_p12) target bundleno = 3801 (0xed9), region = 68 }
  0xd7   : > { %6354 = dma.done.wait (%p9202_p4), [#allocation5], 16   ;;  %p9203_p7 = pmov %p9202_p4 }
  0xd8   : > { %s6775_s16 = sand.u32 1, %s6383_s22   ;;  %p9204_p9 = scmp.ne.s32.totalorder %s9175_s27, 0 }
  0xd9   : > { %6356 = vsyncadd (%p9203_p7), [#allocation5], 4294967280  ;;  %s4649_s13 = sshll.u32 %s6775_s16, 8  ;;  %s482_s12 = scalar_lea.sflag [#allocation3], %s6775_s16 }
  0xda   : > { %s6779_s0 = scalar_lea.vmem [#allocation6], %s4649_s13 }
  0xdb   : > { %6358 = dma.done.wait (%p9204_p9), %s482_s12, 4096  }
  0xdc   : > { %6360 = vsyncadd (%p9204_p9), %s482_s12, 4294963200  ;;  %s490_s29 = sand.u32 1, %s6495_s25   ;;  %s6786_s4 = scalar_lea.vmem [#allocation7], %s4649_s13 }
  0xdd   : > { %s491_s30 = scalar_lea.sflag [#allocation8], %s490_s29 }
  0xde   : > { %6362 = dma.done.wait (%p9204_p9), %s491_s30, 4352  }
  0xdf   : > { %6364 = vsyncadd (%p9204_p9), %s491_s30, 4294962944  ;;  %s4651_s20 = sshll.u32 %s6775_s16, 4  ;;  %p9205_p2 = pmov %p9202_p4 }
  0xe0   : > { %s6795_s2 = scalar_lea.vmem [#allocation9], %s4651_s20 }
  0xe1   : > { %6366 = dma.done.wait (%p9205_p2), [#allocation11], 9216   ;;  %p9206_p3 = pmov %p9205_p2 }
  0xe2   : > { %p9207_p5 = pmov %p9205_p2 }
  0xe3   : > { %6368 = vsyncadd (%p9206_p3), [#allocation11], 4294958080 }
  0xe4   : > { %6370 = dma.done.wait (%p9207_p5), [#allocation14], 1024   ;;  %p9208_p8 = pmov %p9205_p2 }
  0xe6   : > { %6372 = vsyncadd (%p9208_p8), [#allocation14], 4294966272 }
  0xe7   : > { %520 = sfence }
  0xe8   : > { %v584_v0 = vld [vmem:[%s6779_s0 + $0x80] sm:$0xff]  ;;  %v585_v1 = vld [vmem:[%s6779_s0 + $0x88] sm:$0xff]  ;;  %v586_v5 = vld [vmem:[%s6779_s0 + $0x90] sm:$0xff]  ;;  %s1281_s27 = sld [smem:[#allocation2]]  ;;  %s4725_s14 = sld [smem:[#allocation2 + $0x1]] }
  0xe9   : > { %v568_v2 = vld [vmem:[%s6779_s0] sm:$0xff]  ;;  %v6808_v3 = vpack.c.bf16 %v585_v1, %v584_v0  ;;  %v569_v4 = vld [vmem:[%s6779_s0 + $0x8] sm:$0xff]  ;;  %v587_v6 = vld [vmem:[%s6779_s0 + $0x98] sm:$0xff]  ;;  %s9209_s11 = sld [smem:[#allocation31_spill]]  ;;  %s566_s29 = scalar_lea.vmem [#allocation15], %s4651_s20 }
  0xea   : > { %v6813_v7 = vpack.c.bf16 %v569_v4, %v568_v2  ;;  %v6815_v8 = vpack.c.bf16 %v587_v6, %v586_v5  ;;  %v570_v9 = vld [vmem:[%s6779_s0 + $0x10] sm:$0xff]  ;;  %v571_v10 = vld [vmem:[%s6779_s0 + $0x18] sm:$0xff]  ;;  %v588_v11 = vld [vmem:[%s6779_s0 + $0xa0] sm:$0xff]  ;;  %s9211_s30 = sld [smem:[#allocation27_spill]]  ;;  %s4804_s28 = sshll.u32 %s6495_s25, 8 }
  0xeb   : > { %4805 = vmatprep.subr.bf16.mxu0 %v6808_v3  ;;  %v589_v12 = vld [vmem:[%s6779_s0 + $0xa8] sm:$0xff]  ;;  %v6823_v13 = vpack.c.bf16 %v571_v10, %v570_v9  ;;  %v572_v15 = vld [vmem:[%s6779_s0 + $0x20] sm:$0xff]  ;;  %v590_v17 = vld [vmem:[%s6779_s0 + $0xb0] sm:$0xff]  ;;  %s4461_s20 = scalar_lea.sflag [#allocation4], %s6775_s16  ;;  %s6406_s17 = smov [#allocation15]  }
  0xec   : > { %4806 = vmatpush3.bf16.msra.mxu0 %v6813_v7  ;;  %v6826_v14 = vpack.c.bf16 %v589_v12, %v588_v11  ;;  %v573_v16 = vld [vmem:[%s6779_s0 + $0x28] sm:$0xff]  ;;  %v591_v18 = vld [vmem:[%s6779_s0 + $0xb8] sm:$0xff]  ;;  %v574_v21 = vld [vmem:[%s6779_s0 + $0x30] sm:$0xff]  ;;  %s6313_s19 = sshll.u32 %s6406_s17, 4  ;;  %s6314_s19 = int_to_ptr.vmem [resolvable:$false] %s6313_s19 }
  0xed   : > { %4807 = vmatprep.subr.bf16.mxu0 %v6815_v8  ;;  %v6833_v19 = vpack.c.bf16 %v573_v16, %v572_v15  ;;  %v6836_v20 = vpack.c.bf16 %v591_v18, %v590_v17  ;;  %v575_v22 = vld [vmem:[%s6779_s0 + $0x38] sm:$0xff]  ;;  %v592_v23 = vld [vmem:[%s6779_s0 + $0xc0] sm:$0xff]  ;;  %v593_v24 = vld [vmem:[%s6779_s0 + $0xc8] sm:$0xff] }
  0xee   : > { %v6843_v25 = vld [vmem:[%s6786_s4 + $0x4] ss:$8 sps:$4 sm:$0xff]   ;;  %v6846_v26 = vpack.c.bf16 %v575_v22, %v574_v21  ;;  %v6850_v28 = vpack.c.bf16 %v593_v24, %v592_v23  ;;  %v594_v30 = vld [vmem:[%s6779_s0 + $0xd0] sm:$0xff]  ;;  %v595_v31 = vld [vmem:[%s6779_s0 + $0xd8] sm:$0xff] }
  0xef   : > { %v576_v27 = vld [vmem:[%s6779_s0 + $0x40] sm:$0xff]  ;;  %v577_v29 = vld [vmem:[%s6779_s0 + $0x48] sm:$0xff]  ;;  %840 = vmatprep.mubr.bf16.mxu0 %v6843_v25  ;;  %v578_v33 = vld [vmem:[%s6779_s0 + $0x50] sm:$0xff]  ;;  %v6861_v34 = vpack.c.bf16 %v595_v31, %v594_v30 }
  0xf0   : > { %4808 = vmatpush3.bf16.msra.mxu0 %v6823_v13  ;;  %v6857_v32 = vpack.c.bf16 %v577_v29, %v576_v27  ;;  %v579_v35 = vld [vmem:[%s6779_s0 + $0x58] sm:$0xff]  ;;  %v596_v36 = vld [vmem:[%s6779_s0 + $0xe0] sm:$0xff]  ;;  %v597_v37 = vld [vmem:[%s6779_s0 + $0xe8] sm:$0xff]  ;;  %p9213_p0 = scmp.ne.s32.totalorder %s9211_s30, 0 }
  0xf1   : > { %4809 = vmatprep.subr.bf16.mxu0 %v6826_v14  ;;  %v6867_v38 = vpack.c.bf16 %v579_v35, %v578_v33  ;;  %v580_v39 = vld [vmem:[%s6779_s0 + $0x60] sm:$0xff]  ;;  %v6871_v40 = vpack.c.bf16 %v597_v37, %v596_v36  ;;  %v581_v41 = vld [vmem:[%s6779_s0 + $0x68] sm:$0xff]  ;;  %v598_v42 = vld [vmem:[%s6779_s0 + $0xf0] sm:$0xff] }
  0xf2   : > { %v599_v43 = vld [vmem:[%s6779_s0 + $0xf8] sm:$0xff]  ;;  %v6877_v44 = vpack.c.bf16 %v581_v41, %v580_v39  ;;  %v582_v45 = vld [vmem:[%s6779_s0 + $0x70] sm:$0xff]  ;;  %v5888_v49 = vld [vmem:[%s6786_s4] ss:$8 sps:$4 sm:$0xff]  }
  0xf3   : > { %v6881_v46 = vpack.c.bf16 %v599_v43, %v598_v42  ;;  %v583_v47 = vld [vmem:[%s6779_s0 + $0x78] sm:$0xff]  ;;  %v5934_v51 = vld [vmem:[#allocation10 + $0x40] sm:$0xff]   ;;  %v5936_v53 = vld [vmem:[#allocation10 + $0x48] sm:$0xff]   ;;  %s4748_s0 = sld [smem:[#allocation2 + $0x2]] }
  0xf4   : > { %4810 = vmatpush3.bf16.msra.mxu0 %v6833_v19  ;;  %v6885_v48 = vpack.c.bf16 %v583_v47, %v582_v45  ;;  %v5889_v50 = vld [vmem:[%s6786_s4 + $0x14] ss:$8 sps:$4 sm:$0xff]   ;;  %v5935_v52 = vld [vmem:[#allocation10] sm:$0xff]   ;;  %4917 = vmatprep.subr.bf16.mxu1 %v5934_v51  ;;  %v5937_v54 = vld [vmem:[#allocation10 + $0x8] sm:$0xff]  }
  0xf5   : > { %4811 = vmatprep.subr.bf16.mxu0 %v6836_v20  ;;  %4918 = vmatpush3.bf16.msra.mxu1 %v5935_v52  ;;  %v5938_v55 = vld [vmem:[#allocation10 + $0x50] sm:$0xff]   ;;  %v5892_v57 = vld [vmem:[%s6786_s4 + $0x24] ss:$8 sps:$4 sm:$0xff]   ;;  %v5940_v59 = vld [vmem:[#allocation10 + $0x58] sm:$0xff]  }
  0xf6   : > { %4919 = vmatprep.subr.bf16.mxu1 %v5936_v53  ;;  %v5891_v56 = vld [vmem:[%s6786_s4 + $0x10] ss:$8 sps:$4 sm:$0xff]   ;;  %v5942_v61 = vld [vmem:[#allocation10 + $0x60] sm:$0xff]   ;;  %v5895_v0 = vld [vmem:[%s6786_s4 + $0x34] ss:$8 sps:$4 sm:$0xff]  }
  0xf7   : > { %v5939_v58 = vld [vmem:[#allocation10 + $0x10] sm:$0xff]   ;;  %v5941_v60 = vld [vmem:[#allocation10 + $0x18] sm:$0xff]   ;;  %v5894_v62 = vld [vmem:[%s6786_s4 + $0x20] ss:$8 sps:$4 sm:$0xff]  }
  0xf8   : > { %4812 = vmatpush3.bf16.msra.mxu0 %v6846_v26  ;;  %v5943_v63 = vld [vmem:[#allocation10 + $0x20] sm:$0xff]   ;;  %v5944_v1 = vld [vmem:[#allocation10 + $0x68] sm:$0xff]   ;;  %v5897_v4 = vld [vmem:[%s6786_s4 + $0x30] ss:$8 sps:$4 sm:$0xff]  }
  0xf9   : > { %4813 = vmatprep.subr.bf16.mxu0 %v6850_v28  ;;  %4920 = vmatpush3.bf16.msra.mxu1 %v5937_v54  ;;  %v5945_v2 = vld [vmem:[#allocation10 + $0x28] sm:$0xff]   ;;  %v5901_v9 = vld [vmem:[%s6786_s4 + $0x54] ss:$8 sps:$4 sm:$0xff]   ;;  %v5903_v10 = vld [vmem:[%s6786_s4 + $0x50] ss:$8 sps:$4 sm:$0xff]  }
  0xfa   : > { %4921 = vmatprep.subr.bf16.mxu1 %v5938_v55  ;;  %v5898_v5 = vld [vmem:[%s6786_s4 + $0x44] ss:$8 sps:$4 sm:$0xff]   ;;  %v5900_v6 = vld [vmem:[%s6786_s4 + $0x40] ss:$8 sps:$4 sm:$0xff]   ;;  %v5907_v15 = vld [vmem:[%s6786_s4 + $0x74] ss:$8 sps:$4 sm:$0xff]  }
  0xfb   : > { %v5904_v11 = vld [vmem:[%s6786_s4 + $0x64] ss:$8 sps:$4 sm:$0xff]   ;;  %v5906_v12 = vld [vmem:[%s6786_s4 + $0x60] ss:$8 sps:$4 sm:$0xff]   ;;  %v5909_v16 = vld [vmem:[%s6786_s4 + $0x70] ss:$8 sps:$4 sm:$0xff]  }
  0xfc   : > { %4814 = vmatpush3.bf16.msra.mxu0 %v6857_v32  ;;  %v5910_v17 = vld [vmem:[%s6786_s4 + $0x84] ss:$8 sps:$4 sm:$0xff]   ;;  %v5912_v18 = vld [vmem:[%s6786_s4 + $0x80] ss:$8 sps:$4 sm:$0xff]   ;;  %v5913_v21 = vld [vmem:[%s6786_s4 + $0x94] ss:$8 sps:$4 sm:$0xff]  }
  0xfd   : > { %4815 = vmatprep.subr.bf16.mxu0 %v6861_v34  ;;  %4922 = vmatpush3.bf16.msra.mxu1 %v5939_v58  ;;  %v5915_v22 = vld [vmem:[%s6786_s4 + $0x90] ss:$8 sps:$4 sm:$0xff]   ;;  %v5916_v23 = vld [vmem:[%s6786_s4 + $0xa4] ss:$8 sps:$4 sm:$0xff]   ;;  %v5918_v24 = vld [vmem:[%s6786_s4 + $0xa0] ss:$8 sps:$4 sm:$0xff]  }
  0xfe   : > { %4923 = vmatprep.subr.bf16.mxu1 %v5940_v59  ;;  %v5919_v27 = vld [vmem:[%s6786_s4 + $0xb4] ss:$8 sps:$4 sm:$0xff]   ;;  %v5921_v31 = vld [vmem:[%s6786_s4 + $0xb0] ss:$8 sps:$4 sm:$0xff]   ;;  %v5922_v33 = vld [vmem:[%s6786_s4 + $0xc4] ss:$8 sps:$4 sm:$0xff]  }
  0xff   : > { %v5946_v29 = vld [vmem:[#allocation10 + $0x70] sm:$0xff]   ;;  %v5948_v35 = vld [vmem:[#allocation10 + $0x78] sm:$0xff]   ;;  %v5924_v37 = vld [vmem:[%s6786_s4 + $0xc0] ss:$8 sps:$4 sm:$0xff]  }
 0x100   : > { %4816 = vmatpush3.bf16.msra.mxu0 %v6867_v38  ;;  %v5947_v30 = vld [vmem:[#allocation10 + $0x30] sm:$0xff]   ;;  %v5949_v36 = vld [vmem:[#allocation10 + $0x38] sm:$0xff]   ;;  %v5928_v42 = vld [vmem:[%s6786_s4 + $0xe4] ss:$8 sps:$4 sm:$0xff]  }
 0x101   : > { %4817 = vmatprep.subr.bf16.mxu0 %v6871_v40  ;;  %4924 = vmatpush3.bf16.msra.mxu1 %v5941_v60  ;;  %v5925_v39 = vld [vmem:[%s6786_s4 + $0xd4] ss:$8 sps:$4 sm:$0xff]   ;;  %v5927_v41 = vld [vmem:[%s6786_s4 + $0xd0] ss:$8 sps:$4 sm:$0xff]   ;;  %v5930_v43 = vld [vmem:[%s6786_s4 + $0xe0] ss:$8 sps:$4 sm:$0xff]  }
 0x102   : > { %4925 = vmatprep.subr.bf16.mxu1 %v5942_v61  ;;  %v5931_v45 = vld [vmem:[%s6786_s4 + $0xf4] ss:$8 sps:$4 sm:$0xff]   ;;  %v5933_v47 = vld [vmem:[%s6786_s4 + $0xf0] ss:$8 sps:$4 sm:$0xff]  }
 0x104   : > { %4818 = vmatpush3.bf16.msra.mxu0 %v6877_v44 }
 0x105   : > { %4819 = vmatprep.subr.bf16.mxu0 %v6881_v46  ;;  %4926 = vmatpush3.bf16.msra.mxu1 %v5943_v63 }
 0x106   : > { %4927 = vmatprep.subr.bf16.mxu1 %v5944_v1 }
 0x108   : > { %4820 = vmatpush3.bf16.msra.mxu0 %v6885_v48 }
 0x109   : > { %4928 = vmatpush3.bf16.msra.mxu1 %v5945_v2 }
 0x10a   : > { %4929 = vmatprep.subr.bf16.mxu1 %v5946_v29 }
 0x10b   : > { %841 = vmatmul.mubr.bf16.vlgmr.msra.gmra.mrb[0].mxu0 %v5888_v49 }
 0x10c   : > { %848 = vmatprep.mubr.bf16.mxu0 %v5889_v50 }
 0x10d   : > { %4930 = vmatpush3.bf16.msra.mxu1 %v5947_v30 }
 0x10e   : > { %4931 = vmatprep.subr.bf16.mxu1 %v5948_v35 }
 0x111   : > { %4932 = vmatpush3.bf16.msra.mxu1 %v5949_v36 }
 0x113   : > { %849 = vmatmul.mubr.bf16.gmra.mrb[4].mxu0 %v5891_v56 }
 0x114   : > { %856 = vmatprep.mubr.bf16.mxu0 %v5892_v57 }
 0x11b   : > { %857 = vmatmul.mubr.bf16.gmra.mrb[8].mxu0 %v5894_v62 }
 0x11c   : > { %864 = vmatprep.mubr.bf16.mxu0 %v5895_v0 }
 0x123   : > { %865 = vmatmul.mubr.bf16.gmra.mrb[12].mxu0 %v5897_v4 }
 0x124   : > { %872 = vmatprep.mubr.bf16.mxu0 %v5898_v5 }
 0x12b   : > { %873 = vmatmul.mubr.bf16.gmra.mrb[16].mxu0 %v5900_v6 }
 0x12c   : > { %880 = vmatprep.mubr.bf16.mxu0 %v5901_v9 }
 0x133   : > { %881 = vmatmul.mubr.bf16.gmra.mrb[20].mxu0 %v5903_v10 }
 0x134   : > { %888 = vmatprep.mubr.bf16.mxu0 %v5904_v11 }
 0x13b   : > { %889 = vmatmul.mubr.bf16.gmra.mrb[24].mxu0 %v5906_v12 }
 0x13c   : > { %896 = vmatprep.mubr.bf16.mxu0 %v5907_v15 }
 0x143   : > { %897 = vmatmul.mubr.bf16.gmra.mrb[28].mxu0 %v5909_v16 }
 0x144   : > { %904 = vmatprep.mubr.bf16.mxu0 %v5910_v17 }
 0x14b   : > { %905 = vmatmul.mubr.bf16.gmra.mrb[32].mxu0 %v5912_v18 }
 0x14c   : > { %912 = vmatprep.mubr.bf16.mxu0 %v5913_v21 }
 0x153   : > { %913 = vmatmul.mubr.bf16.gmra.mrb[36].mxu0 %v5915_v22 }
 0x154   : > { %920 = vmatprep.mubr.bf16.mxu0 %v5916_v23 }
 0x15b   : > { %921 = vmatmul.mubr.bf16.gmra.mrb[40].mxu0 %v5918_v24 }
 0x15c   : > { %928 = vmatprep.mubr.bf16.mxu0 %v5919_v27 }
 0x163   : > { %929 = vmatmul.mubr.bf16.gmra.mrb[44].mxu0 %v5921_v31 }
 0x164   : > { %936 = vmatprep.mubr.bf16.mxu0 %v5922_v33 }
 0x16b   : > { %937 = vmatmul.mubr.bf16.gmra.mrb[48].mxu0 %v5924_v37 }
 0x16c   : > { %944 = vmatprep.mubr.bf16.mxu0 %v5925_v39 }
 0x173   : > { %945 = vmatmul.mubr.bf16.gmra.mrb[52].mxu0 %v5927_v41 }
 0x174   : > { %952 = vmatprep.mubr.bf16.mxu0 %v5928_v42 }
 0x17b   : > { %953 = vmatmul.mubr.bf16.gmra.mrb[56].mxu0 %v5930_v43 }
 0x17c   : > { %960 = vmatprep.mubr.bf16.mxu0 %v5931_v45 }
 0x183   : > { %961 = vmatmul.mubr.bf16.gmra.mrb[60].mxu0 %v5933_v47 }
 0x184   : > { %1680 = vmatprep.mubr.bf16.mxu0 %v6843_v25 }
 0x1de   : > { %v4821_v49 = vpop.f32.mrb[0].mxu0 }
 0x1df   : > { %v4822_v50 = vpop.f32.mrb[1].mxu0 }
 0x1e0   : > { %v4824_v51 = vpop.f32.mrb[2].mxu0  ;;  %v4823_v52 = vadd.f32 %v4822_v50, %v4821_v49 }
 0x1e1   : > { %v4825_v53 = vpop.f32.mrb[3].mxu0 }
 0x1e2   : > { %v4826_v54 = vadd.f32 %v4825_v53, %v4824_v51 }
 0x1e4   : > { %v969_v55 = vpack.c.bf16 %v4826_v54, %v4823_v52 }
 0x1e6   : > { %v4827_v56 = vpop.f32.mrb[4].mxu0  ;;  %1152 = vmatprep.mubr.bf16.mxu1 %v969_v55 }
 0x1e7   : > { %v4828_v57 = vpop.f32.mrb[5].mxu0  ;;  %1153 = vmatmul.mubr.bf16.vlgmr.msra.gmra.mrb[0].mxu1 %v6813_v7 }
 0x1e8   : > { %v4829_v58 = vadd.f32 %v4828_v57, %v4827_v56  ;;  %v4830_v59 = vpop.f32.mrb[6].mxu0 }
 0x1e9   : > { %v4831_v60 = vpop.f32.mrb[7].mxu0 }
 0x1ea   : > { %v4832_v61 = vadd.f32 %v4831_v60, %v4830_v59 }
 0x1ec   : > { %v970_v62 = vpack.c.bf16 %v4832_v61, %v4829_v58 }
 0x1ee   : > { %v4833_v63 = vpop.f32.mrb[8].mxu0  ;;  %1160 = vmatprep.mubr.bf16.mxu1 %v970_v62 }
 0x1ef   : > { %v4834_v25 = vpop.f32.mrb[9].mxu0  ;;  %1161 = vmatmul.mubr.bf16.gmra.mrb[4].mxu1 %v6823_v13 }
 0x1f0   : > { %v4835_v0 = vadd.f32 %v4834_v25, %v4833_v63  ;;  %v4836_v1 = vpop.f32.mrb[10].mxu0 }
 0x1f1   : > { %v4837_v2 = vpop.f32.mrb[11].mxu0 }
 0x1f2   : > { %v4838_v4 = vadd.f32 %v4837_v2, %v4836_v1 }
 0x1f4   : > { %v971_v5 = vpack.c.bf16 %v4838_v4, %v4835_v0 }
 0x1f6   : > { %v4839_v6 = vpop.f32.mrb[12].mxu0  ;;  %1168 = vmatprep.mubr.bf16.mxu1 %v971_v5 }
 0x1f7   : > { %v4840_v9 = vpop.f32.mrb[13].mxu0  ;;  %1169 = vmatmul.mubr.bf16.gmra.mrb[8].mxu1 %v6833_v19 }
 0x1f8   : > { %v4841_v7 = vadd.f32 %v4840_v9, %v4839_v6  ;;  %v4842_v10 = vpop.f32.mrb[14].mxu0 }
 0x1f9   : > { %v4843_v11 = vpop.f32.mrb[15].mxu0 }
 0x1fa   : > { %v4844_v12 = vadd.f32 %v4843_v11, %v4842_v10 }
 0x1fc   : > { %v972_v15 = vpack.c.bf16 %v4844_v12, %v4841_v7 }
 0x1fe   : > { %v4845_v16 = vpop.f32.mrb[16].mxu0  ;;  %1176 = vmatprep.mubr.bf16.mxu1 %v972_v15 }
 0x1ff   : > { %v4846_v17 = vpop.f32.mrb[17].mxu0  ;;  %1177 = vmatmul.mubr.bf16.gmra.mrb[12].mxu1 %v6846_v26 }
 0x200   : > { %v4847_v13 = vadd.f32 %v4846_v17, %v4845_v16  ;;  %v4848_v18 = vpop.f32.mrb[18].mxu0 }
 0x201   : > { %v4849_v21 = vpop.f32.mrb[19].mxu0 }
 0x202   : > { %v4850_v22 = vadd.f32 %v4849_v21, %v4848_v18 }
 0x204   : > { %v973_v23 = vpack.c.bf16 %v4850_v22, %v4847_v13 }
 0x206   : > { %v4851_v24 = vpop.f32.mrb[20].mxu0  ;;  %1184 = vmatprep.mubr.bf16.mxu1 %v973_v23 }
 0x207   : > { %v4852_v27 = vpop.f32.mrb[21].mxu0  ;;  %1185 = vmatmul.mubr.bf16.gmra.mrb[16].mxu1 %v6857_v32 }
 0x208   : > { %v4853_v19 = vadd.f32 %v4852_v27, %v4851_v24  ;;  %v4854_v29 = vpop.f32.mrb[22].mxu0 }
 0x209   : > { %v4855_v30 = vpop.f32.mrb[23].mxu0 }
 0x20a   : > { %v4856_v31 = vadd.f32 %v4855_v30, %v4854_v29 }
 0x20c   : > { %v974_v33 = vpack.c.bf16 %v4856_v31, %v4853_v19 }
 0x20e   : > { %v4857_v35 = vpop.f32.mrb[24].mxu0  ;;  %1192 = vmatprep.mubr.bf16.mxu1 %v974_v33 }
 0x20f   : > { %v4858_v36 = vpop.f32.mrb[25].mxu0  ;;  %1193 = vmatmul.mubr.bf16.gmra.mrb[20].mxu1 %v6867_v38 }
 0x210   : > { %v4859_v26 = vadd.f32 %v4858_v36, %v4857_v35  ;;  %v4860_v37 = vpop.f32.mrb[26].mxu0 }
 0x211   : > { %v4861_v39 = vpop.f32.mrb[27].mxu0 }
 0x212   : > { %v4862_v41 = vadd.f32 %v4861_v39, %v4860_v37 }
 0x214   : > { %v975_v42 = vpack.c.bf16 %v4862_v41, %v4859_v26 }
 0x216   : > { %v4863_v43 = vpop.f32.mrb[28].mxu0  ;;  %1200 = vmatprep.mubr.bf16.mxu1 %v975_v42 }
 0x217   : > { %v4864_v45 = vpop.f32.mrb[29].mxu0  ;;  %1201 = vmatmul.mubr.bf16.gmra.mrb[24].mxu1 %v6877_v44 }
 0x218   : > { %v4865_v32 = vadd.f32 %v4864_v45, %v4863_v43  ;;  %v4866_v47 = vpop.f32.mrb[30].mxu0 }
 0x219   : > { %v4867_v49 = vpop.f32.mrb[31].mxu0 }
 0x21a   : > { %v4868_v50 = vadd.f32 %v4867_v49, %v4866_v47 }
 0x21c   : > { %v976_v51 = vpack.c.bf16 %v4868_v50, %v4865_v32 }
 0x21e   : > { %v4869_v52 = vpop.f32.mrb[32].mxu0  ;;  %1208 = vmatprep.mubr.bf16.mxu1 %v976_v51 }
 0x21f   : > { %v4870_v53 = vpop.f32.mrb[33].mxu0  ;;  %1209 = vmatmul.mubr.bf16.gmra.mrb[28].mxu1 %v6885_v48 }
 0x220   : > { %v4871_v38 = vadd.f32 %v4870_v53, %v4869_v52  ;;  %v4872_v54 = vpop.f32.mrb[34].mxu0 }
 0x221   : > { %v4873_v55 = vpop.f32.mrb[35].mxu0 }
 0x222   : > { %v4874_v56 = vadd.f32 %v4873_v55, %v4872_v54 }
 0x224   : > { %v977_v57 = vpack.c.bf16 %v4874_v56, %v4871_v38 }
 0x226   : > { %v4875_v58 = vpop.f32.mrb[36].mxu0  ;;  %1216 = vmatprep.mubr.bf16.mxu1 %v977_v57 }
 0x227   : > { %v4876_v59 = vpop.f32.mrb[37].mxu0  ;;  %1217 = vmatmul.mubr.bf16.gmra.mrb[32].mxu1 %v6808_v3 }
 0x228   : > { %v4877_v44 = vadd.f32 %v4876_v59, %v4875_v58  ;;  %v4878_v60 = vpop.f32.mrb[38].mxu0 }
 0x229   : > { %v4879_v61 = vpop.f32.mrb[39].mxu0 }
 0x22a   : > { %v4880_v62 = vadd.f32 %v4879_v61, %v4878_v60 }
 0x22c   : > { %v978_v63 = vpack.c.bf16 %v4880_v62, %v4877_v44 }
 0x22e   : > { %v4881_v25 = vpop.f32.mrb[40].mxu0  ;;  %1224 = vmatprep.mubr.bf16.mxu1 %v978_v63 }
 0x22f   : > { %v4882_v0 = vpop.f32.mrb[41].mxu0  ;;  %1225 = vmatmul.mubr.bf16.gmra.mrb[36].mxu1 %v6815_v8 }
 0x230   : > { %v4883_v48 = vadd.f32 %v4882_v0, %v4881_v25  ;;  %v4884_v1 = vpop.f32.mrb[42].mxu0  ;;  %v6945_v0 = vstv %s1281_s27  ;;  %s4474_s27 = sshll.u32 %s566_s29, 4  ;;  %s9075_s27 = int_to_ptr.vmem [resolvable:$true] %s4474_s27 }
 0x231   : > { %v4885_v2 = vpop.f32.mrb[43].mxu0  ;;  %s6309_s25 = scalar_lea.vmem %s9075_s27, 256  ;;  %p6316_p11 = scmp.lt.s32.totalorder %s9075_s27, %s6314_s19 }
 0x232   : > { %v4886_v4 = vadd.f32 %v4885_v2, %v4884_v1  ;;  %p6310_p1 = scmp.ne.s32.totalorder %s9075_s27, %s6309_s25 }
 0x234   : > { %v979_v5 = vpack.c.bf16 %v4886_v4, %v4883_v48  ;;  %p6311_p6 = pnand %p6310_p1, %p9213_p0 }
 0x236   : > { %v4887_v6 = vpop.f32.mrb[44].mxu0  ;;  %1232 = vmatprep.mubr.bf16.mxu1 %v979_v5  ;;  %p6312_p10 = pneg %p6311_p6 }
 0x237   : > { %v4888_v9 = vpop.f32.mrb[45].mxu0  ;;  %1233 = vmatmul.mubr.bf16.gmra.mrb[40].mxu1 %v6826_v14 }
 0x238   : > { %v4889_v3 = vadd.f32 %v4888_v9, %v4887_v6  ;;  %v4890_v7 = vpop.f32.mrb[46].mxu0 }
 0x239   : > { %v4891_v10 = vpop.f32.mrb[47].mxu0 }
 0x23a   : > { %v4892_v11 = vadd.f32 %v4891_v10, %v4890_v7 }
 0x23c   : > { %v980_v12 = vpack.c.bf16 %v4892_v11, %v4889_v3 }
 0x23e   : > { %v4893_v15 = vpop.f32.mrb[48].mxu0  ;;  %1240 = vmatprep.mubr.bf16.mxu1 %v980_v12 }
 0x23f   : > { %v4894_v16 = vpop.f32.mrb[49].mxu0  ;;  %1241 = vmatmul.mubr.bf16.gmra.mrb[44].mxu1 %v6836_v20 }
 0x240   : > { %v4895_v8 = vadd.f32 %v4894_v16, %v4893_v15  ;;  %v4896_v17 = vpop.f32.mrb[50].mxu0 }
 0x241   : > { %v4897_v13 = vpop.f32.mrb[51].mxu0 }
 0x242   : > { %v4898_v18 = vadd.f32 %v4897_v13, %v4896_v17 }
 0x244   : > { %v981_v21 = vpack.c.bf16 %v4898_v18, %v4895_v8 }
 0x246   : > { %v4899_v22 = vpop.f32.mrb[52].mxu0  ;;  %1248 = vmatprep.mubr.bf16.mxu1 %v981_v21 }
 0x247   : > { %v4900_v23 = vpop.f32.mrb[53].mxu0  ;;  %1249 = vmatmul.mubr.bf16.gmra.mrb[48].mxu1 %v6850_v28 }
 0x248   : > { %v4901_v14 = vadd.f32 %v4900_v23, %v4899_v22  ;;  %v4902_v24 = vpop.f32.mrb[54].mxu0 }
 0x249   : > { %v4903_v27 = vpop.f32.mrb[55].mxu0 }
 0x24a   : > { %v4904_v19 = vadd.f32 %v4903_v27, %v4902_v24 }
 0x24c   : > { %v982_v29 = vpack.c.bf16 %v4904_v19, %v4901_v14 }
 0x24e   : > { %v4905_v30 = vpop.f32.mrb[56].mxu0  ;;  %1256 = vmatprep.mubr.bf16.mxu1 %v982_v29 }
 0x24f   : > { %v4906_v31 = vpop.f32.mrb[57].mxu0  ;;  %1257 = vmatmul.mubr.bf16.gmra.mrb[52].mxu1 %v6861_v34 }
 0x250   : > { %v4907_v20 = vadd.f32 %v4906_v31, %v4905_v30  ;;  %v4908_v33 = vpop.f32.mrb[58].mxu0 }
 0x251   : > { %v4909_v35 = vpop.f32.mrb[59].mxu0 }
 0x252   : > { %v4910_v36 = vadd.f32 %v4909_v35, %v4908_v33 }
 0x254   : > { %v983_v26 = vpack.c.bf16 %v4910_v36, %v4907_v20 }
 0x256   : > { %v4911_v37 = vpop.f32.mrb[60].mxu0  ;;  %1264 = vmatprep.mubr.bf16.mxu1 %v983_v26 }
 0x257   : > { %v4912_v39 = vpop.f32.mrb[61].mxu0  ;;  %1265 = vmatmul.mubr.bf16.gmra.mrb[56].mxu1 %v6871_v40 }
 0x258   : > { %v4913_v28 = vadd.f32 %v4912_v39, %v4911_v37  ;;  %v4914_v41 = vpop.f32.mrb[62].mxu0 }
 0x259   : > { %v4915_v42 = vpop.f32.mrb[63].mxu0 }
 0x25a   : > { %v4916_v43 = vadd.f32 %v4915_v42, %v4914_v41 }
 0x25c   : > { %v984_v45 = vpack.c.bf16 %v4916_v43, %v4913_v28 }
 0x25e   : > { %1272 = vmatprep.mubr.bf16.mxu1 %v984_v45 }
 0x25f   : > { %1273 = vmatmul.mubr.bf16.gmra.mrb[60].mxu1 %v6881_v46  ;;  %v6940_v46 = vld [vmem:[%s9129_s5] ss:$0 sm:$0xff] }
 0x2ba   : > { %v4933_v32 = vpop.f32.mrb[0].mxu1 }
 0x2bb   : > { %v4934_v34 = vpop.f32.mrb[1].mxu1 }
 0x2bc   : > { %v4935_v47 = vadd.f32 %v4934_v34, %v4933_v32  ;;  %v4936_v49 = vpop.f32.mrb[2].mxu1 }
 0x2bd   : > { %v4937_v50 = vpop.f32.mrb[3].mxu1 }
 0x2be   : > { %v4938_v51 = vadd.f32 %v4937_v50, %v4936_v49  ;;  %v1155_v62 = vadd.f32 %v4935_v47, %v6940_v46 }
 0x2c0   : > { %v1158_v61 = vadd.f32 %v4938_v51, %v6940_v46  ;;  %v1315_v6 = vmul.f32 %v6945_v0, %v1155_v62  ;;  %vm1282_vm1 = vcmp.ge.f32.partialorder %v1155_v62, 0.0 }
 0x2c2   : > { %v4939_v52 = vpop.f32.mrb[4].mxu1  ;;  %v1316_v1 = vmul.f32 %v6945_v0, %v1158_v61  ;;  %vm1283_vm0 = vcmp.ge.f32.partialorder %v1158_v61, 0.0  ;;  %v6954_v12 = vsel %vm1282_vm1, %v1155_v62, %v1315_v6 }
 0x2c3   : > { %v4940_v53 = vpop.f32.mrb[5].mxu1 }
 0x2c4   : > { %v4941_v38 = vadd.f32 %v4940_v53, %v4939_v52  ;;  %v4942_v54 = vpop.f32.mrb[6].mxu1  ;;  %v6951_v10 = vsel %vm1283_vm0, %v1158_v61, %v1316_v1 }
 0x2c5   : > { %v4943_v55 = vpop.f32.mrb[7].mxu1  ;;  %v1379_v17 = vadd.f32 %v6951_v10, %v6954_v12 }
 0x2c6   : > { %v4944_v40 = vadd.f32 %v4943_v55, %v4942_v54  ;;  %v1163_v63 = vadd.f32 %v4941_v38, %v6940_v46 }
 0x2c8   : > { %v1317_v9 = vmul.f32 %v6945_v0, %v1163_v63  ;;  %v1166_v3 = vadd.f32 %v4944_v40, %v6940_v46  ;;  %vm1284_vm2 = vcmp.ge.f32.partialorder %v1163_v63, 0.0 }
 0x2ca   : > { %v4945_v56 = vpop.f32.mrb[8].mxu1  ;;  %v6956_v15 = vsel %vm1284_vm2, %v1163_v63, %v1317_v9  ;;  %v1318_v16 = vmul.f32 %v6945_v0, %v1166_v3  ;;  %vm1285_vm3 = vcmp.ge.f32.partialorder %v1166_v3, 0.0 }
 0x2cb   : > { %v4946_v57 = vpop.f32.mrb[9].mxu1  ;;  %v1380_v14 = vadd.f32 %v1379_v17, %v6956_v15 }
 0x2cc   : > { %v4947_v58 = vadd.f32 %v4946_v57, %v4945_v56  ;;  %v4948_v59 = vpop.f32.mrb[10].mxu1  ;;  %v6964_v27 = vsel %vm1285_vm3, %v1166_v3, %v1318_v16 }
 0x2cd   : > { %v4949_v44 = vpop.f32.mrb[11].mxu1  ;;  %v1381_v20 = vadd.f32 %v1380_v14, %v6964_v27 }
 0x2ce   : > { %v4950_v60 = vadd.f32 %v4949_v44, %v4948_v59  ;;  %v1171_v11 = vadd.f32 %v4947_v58, %v6940_v46 }
 0x2d0   : > { %v1319_v18 = vmul.f32 %v6945_v0, %v1171_v11  ;;  %v1174_v21 = vadd.f32 %v4950_v60, %v6940_v46  ;;  %vm1286_vm4 = vcmp.ge.f32.partialorder %v1171_v11, 0.0 }
 0x2d2   : > { %v4951_v25 = vpop.f32.mrb[12].mxu1  ;;  %v6967_v30 = vsel %vm1286_vm4, %v1171_v11, %v1319_v18  ;;  %v1320_v31 = vmul.f32 %v6945_v0, %v1174_v21  ;;  %vm1287_vm5 = vcmp.ge.f32.partialorder %v1174_v21, 0.0 }
 0x2d3   : > { %v4952_v48 = vpop.f32.mrb[13].mxu1  ;;  %v1382_v26 = vadd.f32 %v1381_v20, %v6967_v30 }
 0x2d4   : > { %v4953_v2 = vadd.f32 %v4952_v48, %v4951_v25  ;;  %v4954_v4 = vpop.f32.mrb[14].mxu1  ;;  %v6974_v39 = vsel %vm1287_vm5, %v1174_v21, %v1320_v31 }
 0x2d5   : > { %v4955_v5 = vpop.f32.mrb[15].mxu1  ;;  %v1383_v47 = vadd.f32 %v1382_v26, %v6974_v39 }
 0x2d6   : > { %v4956_v7 = vadd.f32 %v4955_v5, %v4954_v4  ;;  %v1179_v19 = vadd.f32 %v4953_v2, %v6940_v46 }
 0x2d8   : > { %v1321_v33 = vmul.f32 %v6945_v0, %v1179_v19  ;;  %v1182_v35 = vadd.f32 %v4956_v7, %v6940_v46  ;;  %vm1288_vm6 = vcmp.ge.f32.partialorder %v1179_v19, 0.0 }
 0x2da   : > { %v4957_v8 = vpop.f32.mrb[16].mxu1  ;;  %v6977_v45 = vsel %vm1288_vm6, %v1179_v19, %v1321_v33  ;;  %v1322_v32 = vmul.f32 %v6945_v0, %v1182_v35  ;;  %vm1289_vm7 = vcmp.ge.f32.partialorder %v1182_v35, 0.0 }
 0x2db   : > { %v4958_v13 = vpop.f32.mrb[17].mxu1  ;;  %v1384_v51 = vadd.f32 %v1383_v47, %v6977_v45 }
 0x2dc   : > { %v4959_v22 = vadd.f32 %v4958_v13, %v4957_v8  ;;  %v4960_v23 = vpop.f32.mrb[18].mxu1  ;;  %v6984_v52 = vsel %vm1289_vm7, %v1182_v35, %v1322_v32 }
 0x2dd   : > { %v4961_v24 = vpop.f32.mrb[19].mxu1  ;;  %v1385_v58 = vadd.f32 %v1384_v51, %v6984_v52 }
 0x2de   : > { %v4962_v29 = vadd.f32 %v4961_v24, %v4960_v23  ;;  %v1187_v28 = vadd.f32 %v4959_v22, %v6940_v46 }
 0x2e0   : > { %v1323_v49 = vmul.f32 %v6945_v0, %v1187_v28  ;;  %v1190_v50 = vadd.f32 %v4962_v29, %v6940_v46  ;;  %vm1290_vm8 = vcmp.ge.f32.partialorder %v1187_v28, 0.0 }
 0x2e2   : > { %v4963_v36 = vpop.f32.mrb[20].mxu1  ;;  %v6987_v55 = vsel %vm1290_vm8, %v1187_v28, %v1323_v49  ;;  %v1324_v40 = vmul.f32 %v6945_v0, %v1190_v50  ;;  %vm1291_vm9 = vcmp.ge.f32.partialorder %v1190_v50, 0.0 }
 0x2e3   : > { %v4964_v37 = vpop.f32.mrb[21].mxu1  ;;  %v1386_v62 = vadd.f32 %v1385_v58, %v6987_v55 }
 0x2e4   : > { %v4965_v41 = vadd.f32 %v4964_v37, %v4963_v36  ;;  %v4966_v42 = vpop.f32.mrb[22].mxu1  ;;  %v6994_v63 = vsel %vm1291_vm9, %v1190_v50, %v1324_v40 }
 0x2e5   : > { %v4967_v43 = vpop.f32.mrb[23].mxu1  ;;  %v1387_v4 = vadd.f32 %v1386_v62, %v6994_v63 }
 0x2e6   : > { %v4968_v34 = vadd.f32 %v4967_v43, %v4966_v42  ;;  %v1195_v53 = vadd.f32 %v4965_v41, %v6940_v46 }
 0x2e8   : > { %v1325_v44 = vmul.f32 %v6945_v0, %v1195_v53  ;;  %v1198_v60 = vadd.f32 %v4968_v34, %v6940_v46  ;;  %vm1292_vm10 = vcmp.ge.f32.partialorder %v1195_v53, 0.0 }
 0x2ea   : > { %v4969_v38 = vpop.f32.mrb[24].mxu1  ;;  %v6997_v48 = vsel %vm1292_vm10, %v1195_v53, %v1325_v44  ;;  %v1326_v1 = vmul.f32 %v6945_v0, %v1198_v60  ;;  %vm1293_vm11 = vcmp.ge.f32.partialorder %v1198_v60, 0.0 }
 0x2eb   : > { %v4970_v54 = vpop.f32.mrb[25].mxu1  ;;  %v1388_v11 = vadd.f32 %v1387_v4, %v6997_v48 }
 0x2ec   : > { %v4971_v56 = vadd.f32 %v4970_v54, %v4969_v38  ;;  %v4972_v57 = vpop.f32.mrb[26].mxu1  ;;  %v7004_v8 = vsel %vm1293_vm11, %v1198_v60, %v1326_v1 }
 0x2ed   : > { %v4973_v59 = vpop.f32.mrb[27].mxu1  ;;  %v1389_v22 = vadd.f32 %v1388_v11, %v7004_v8 }
 0x2ee   : > { %v4974_v61 = vadd.f32 %v4973_v59, %v4972_v57  ;;  %v1203_v25 = vadd.f32 %v4971_v56, %v6940_v46 }
 0x2f0   : > { %v1327_v6 = vmul.f32 %v6945_v0, %v1203_v25  ;;  %v1206_v9 = vadd.f32 %v4974_v61, %v6940_v46  ;;  %vm1294_vm12 = vcmp.ge.f32.partialorder %v1203_v25, 0.0 }
 0x2f2   : > { %v4975_v2 = vpop.f32.mrb[28].mxu1  ;;  %v7007_v18 = vsel %vm1294_vm12, %v1203_v25, %v1327_v6  ;;  %v1328_v21 = vmul.f32 %v6945_v0, %v1206_v9  ;;  %vm1295_vm13 = vcmp.ge.f32.partialorder %v1206_v9, 0.0 }
 0x2f3   : > { %v4976_v5 = vpop.f32.mrb[29].mxu1  ;;  %v1390_v19 = vadd.f32 %v1389_v22, %v7007_v18 }
 0x2f4   : > { %v4977_v3 = vadd.f32 %v4976_v5, %v4975_v2  ;;  %v4978_v7 = vpop.f32.mrb[30].mxu1  ;;  %v7014_v31 = vsel %vm1295_vm13, %v1206_v9, %v1328_v21 }
 0x2f5   : > { %v4979_v16 = vpop.f32.mrb[31].mxu1  ;;  %v1391_v41 = vadd.f32 %v1390_v19, %v7014_v31 }
 0x2f6   : > { %v1211_v17 = vadd.f32 %v4977_v3, %v6940_v46  ;;  %v4980_v13 = vadd.f32 %v4979_v16, %v4978_v7 }
 0x2f8   : > { %v1329_v23 = vmul.f32 %v6945_v0, %v1211_v17  ;;  %v1214_v14 = vadd.f32 %v4980_v13, %v6940_v46  ;;  %vm1296_vm14 = vcmp.ge.f32.partialorder %v1211_v17, 0.0 }
 0x2fa   : > { %v4981_v24 = vpop.f32.mrb[32].mxu1  ;;  %v7016_v36 = vsel %vm1296_vm14, %v1211_v17, %v1329_v23  ;;  %v1330_v26 = vmul.f32 %v6945_v0, %v1214_v14  ;;  %vm1297_vm15 = vcmp.ge.f32.partialorder %v1214_v14, 0.0 }
 0x2fb   : > { %v4982_v29 = vpop.f32.mrb[33].mxu1  ;;  %v1392_v32 = vadd.f32 %v1391_v41, %v7016_v36 }
 0x2fc   : > { %v4983_v20 = vadd.f32 %v4982_v29, %v4981_v24  ;;  %v4984_v33 = vpop.f32.mrb[34].mxu1  ;;  %v7024_v34 = vsel %vm1297_vm15, %v1214_v14, %v1330_v26 }
 0x2fd   : > { %v4985_v35 = vpop.f32.mrb[35].mxu1  ;;  %v1393_v54 = vadd.f32 %v1392_v32, %v7024_v34 }
 0x2fe   : > { %v1219_v37 = vadd.f32 %v4983_v20, %v6940_v46  ;;  %v4986_v28 = vadd.f32 %v4985_v35, %v4984_v33 }
 0x300   : > { %v1331_v42 = vmul.f32 %v6945_v0, %v1219_v37  ;;  %v1222_v43 = vadd.f32 %v4986_v28, %v6940_v46  ;;  %vm1298_vm0 = vcmp.ge.f32.partialorder %v1219_v37, 0.0 }
 0x302   : > { %v4987_v47 = vpop.f32.mrb[36].mxu1  ;;  %v7026_v50 = vsel %vm1298_vm0, %v1219_v37, %v1331_v42  ;;  %v1332_v51 = vmul.f32 %v6945_v0, %v1222_v43  ;;  %vm1299_vm1 = vcmp.ge.f32.partialorder %v1222_v43, 0.0 }
 0x303   : > { %v4988_v49 = vpop.f32.mrb[37].mxu1  ;;  %v1394_v58 = vadd.f32 %v1393_v54, %v7026_v50 }
 0x304   : > { %v4989_v53 = vadd.f32 %v4988_v49, %v4987_v47  ;;  %v4990_v38 = vpop.f32.mrb[38].mxu1  ;;  %v7032_v59 = vsel %vm1299_vm1, %v1222_v43, %v1332_v51 }
 0x305   : > { %v4991_v40 = vpop.f32.mrb[39].mxu1  ;;  %v1395_v1 = vadd.f32 %v1394_v58, %v7032_v59 }
 0x306   : > { %v1227_v56 = vadd.f32 %v4989_v53, %v6940_v46  ;;  %v4992_v57 = vadd.f32 %v4991_v40, %v4990_v38 }
 0x308   : > { %vm1300_vm2 = vcmp.ge.f32.partialorder %v1227_v56, 0.0  ;;  %v1333_v44 = vmul.f32 %v6945_v0, %v1227_v56  ;;  %v1230_v60 = vadd.f32 %v4992_v57, %v6940_v46 }
 0x30a   : > { %v7036_v61 = vsel %vm1300_vm2, %v1227_v56, %v1333_v44  ;;  %v1334_v62 = vmul.f32 %v6945_v0, %v1230_v60  ;;  %v4993_v25 = vpop.f32.mrb[40].mxu1  ;;  %vm1301_vm3 = vcmp.ge.f32.partialorder %v1230_v60, 0.0 }
 0x30b   : > { %v4994_v2 = vpop.f32.mrb[41].mxu1  ;;  %v1396_v6 = vadd.f32 %v1395_v1, %v7036_v61 }
 0x30c   : > { %v4995_v4 = vadd.f32 %v4994_v2, %v4993_v25  ;;  %v4996_v5 = vpop.f32.mrb[42].mxu1  ;;  %v7041_v3 = vsel %vm1301_vm3, %v1230_v60, %v1334_v62 }
 0x30d   : > { %v4997_v9 = vpop.f32.mrb[43].mxu1  ;;  %v1397_v13 = vadd.f32 %v1396_v6, %v7041_v3 }
 0x30e   : > { %v1235_v7 = vadd.f32 %v4995_v4, %v6940_v46  ;;  %v4998_v11 = vadd.f32 %v4997_v9, %v4996_v5 }
 0x310   : > { %vm1302_vm4 = vcmp.ge.f32.partialorder %v1235_v7, 0.0  ;;  %v1335_v16 = vmul.f32 %v6945_v0, %v1235_v7  ;;  %v1238_v17 = vadd.f32 %v4998_v11, %v6940_v46 }
 0x312   : > { %v7047_v21 = vsel %vm1302_vm4, %v1235_v7, %v1335_v16  ;;  %vm1303_vm5 = vcmp.ge.f32.partialorder %v1238_v17, 0.0  ;;  %v1336_v22 = vmul.f32 %v6945_v0, %v1238_v17  ;;  %v4999_v23 = vpop.f32.mrb[44].mxu1 }
 0x313   : > { %v1398_v14 = vadd.f32 %v1397_v13, %v7047_v21  ;;  %v5000_v24 = vpop.f32.mrb[45].mxu1 }
 0x314   : > { %v7051_v19 = vsel %vm1303_vm5, %v1238_v17, %v1336_v22  ;;  %v5001_v29 = vadd.f32 %v5000_v24, %v4999_v23  ;;  %v5002_v20 = vpop.f32.mrb[46].mxu1 }
 0x315   : > { %v1399_v33 = vadd.f32 %v1398_v14, %v7051_v19  ;;  %v5003_v35 = vpop.f32.mrb[47].mxu1 }
 0x316   : > { %v1243_v26 = vadd.f32 %v5001_v29, %v6940_v46  ;;  %v5004_v37 = vadd.f32 %v5003_v35, %v5002_v20 }
 0x318   : > { %vm1304_vm6 = vcmp.ge.f32.partialorder %v1243_v26, 0.0  ;;  %v1337_v28 = vmul.f32 %v6945_v0, %v1243_v26  ;;  %v1246_v41 = vadd.f32 %v5004_v37, %v6940_v46 }
 0x31a   : > { %v7057_v42 = vsel %vm1304_vm6, %v1243_v26, %v1337_v28  ;;  %vm1305_vm7 = vcmp.ge.f32.partialorder %v1246_v41, 0.0  ;;  %v1338_v43 = vmul.f32 %v6945_v0, %v1246_v41  ;;  %v5005_v32 = vpop.f32.mrb[48].mxu1 }
 0x31b   : > { %v1400_v47 = vadd.f32 %v1399_v33, %v7057_v42  ;;  %v5006_v49 = vpop.f32.mrb[49].mxu1 }
 0x31c   : > { %v7061_v51 = vsel %vm1305_vm7, %v1246_v41, %v1338_v43  ;;  %v5007_v53 = vadd.f32 %v5006_v49, %v5005_v32  ;;  %v5008_v38 = vpop.f32.mrb[50].mxu1 }
 0x31d   : > { %v1401_v54 = vadd.f32 %v1400_v47, %v7061_v51  ;;  %v5009_v40 = vpop.f32.mrb[51].mxu1 }
 0x31e   : > { %v1251_v56 = vadd.f32 %v5007_v53, %v6940_v46  ;;  %v5010_v57 = vadd.f32 %v5009_v40, %v5008_v38 }
 0x320   : > { %vm1306_vm8 = vcmp.ge.f32.partialorder %v1251_v56, 0.0  ;;  %v1339_v58 = vmul.f32 %v6945_v0, %v1251_v56  ;;  %v1254_v44 = vadd.f32 %v5010_v57, %v6940_v46 }
 0x322   : > { %v7067_v60 = vsel %vm1306_vm8, %v1251_v56, %v1339_v58  ;;  %vm1307_vm9 = vcmp.ge.f32.partialorder %v1254_v44, 0.0  ;;  %v1340_v62 = vmul.f32 %v6945_v0, %v1254_v44  ;;  %v5011_v25 = vpop.f32.mrb[52].mxu1 }
 0x323   : > { %v1402_v1 = vadd.f32 %v1401_v54, %v7067_v60  ;;  %v5012_v2 = vpop.f32.mrb[53].mxu1 }
 0x324   : > { %v1372_v4 = vsel %vm1307_vm9, %v1254_v44, %v1340_v62  ;;  %v5013_v5 = vadd.f32 %v5012_v2, %v5011_v25  ;;  %v5014_v6 = vpop.f32.mrb[54].mxu1 }
 0x325   : > { %v1403_v9 = vadd.f32 %v1402_v1, %v1372_v4  ;;  %v5015_v7 = vpop.f32.mrb[55].mxu1 }
 0x326   : > { %v1259_v11 = vadd.f32 %v5013_v5, %v6940_v46  ;;  %v5016_v16 = vadd.f32 %v5015_v7, %v5014_v6 }
 0x328   : > { %vm1308_vm10 = vcmp.ge.f32.partialorder %v1259_v11, 0.0  ;;  %v1341_v17 = vmul.f32 %v6945_v0, %v1259_v11  ;;  %v1262_v13 = vadd.f32 %v5016_v16, %v6940_v46 }
 0x32a   : > { %v1373_v22 = vsel %vm1308_vm10, %v1259_v11, %v1341_v17  ;;  %vm1309_vm11 = vcmp.ge.f32.partialorder %v1262_v13, 0.0  ;;  %v1342_v23 = vmul.f32 %v6945_v0, %v1262_v13  ;;  %v5017_v14 = vpop.f32.mrb[56].mxu1 }
 0x32b   : > { %v1404_v24 = vadd.f32 %v1403_v9, %v1373_v22  ;;  %v5018_v29 = vpop.f32.mrb[57].mxu1 }
 0x32c   : > { %v1374_v20 = vsel %vm1309_vm11, %v1262_v13, %v1342_v23  ;;  %v5019_v33 = vadd.f32 %v5018_v29, %v5017_v14  ;;  %v5020_v35 = vpop.f32.mrb[58].mxu1 }
 0x32d   : > { %v1405_v26 = vadd.f32 %v1404_v24, %v1374_v20  ;;  %v5021_v37 = vpop.f32.mrb[59].mxu1 }
 0x32e   : > { %v1267_v28 = vadd.f32 %v5019_v33, %v6940_v46  ;;  %v5022_v41 = vadd.f32 %v5021_v37, %v5020_v35 }
 0x330   : > { %vm1310_vm12 = vcmp.ge.f32.partialorder %v1267_v28, 0.0  ;;  %v1343_v43 = vmul.f32 %v6945_v0, %v1267_v28  ;;  %v1270_v32 = vadd.f32 %v5022_v41, %v6940_v46 }
 0x332   : > { %v1375_v47 = vsel %vm1310_vm12, %v1267_v28, %v1343_v43  ;;  %vm1311_vm13 = vcmp.ge.f32.partialorder %v1270_v32, 0.0  ;;  %v1344_v49 = vmul.f32 %v6945_v0, %v1270_v32  ;;  %v5023_v53 = vpop.f32.mrb[60].mxu1 }
 0x333   : > { %v1406_v38 = vadd.f32 %v1405_v26, %v1375_v47  ;;  %v5024_v54 = vpop.f32.mrb[61].mxu1 }
 0x334   : > { %v1376_v40 = vsel %vm1311_vm13, %v1270_v32, %v1344_v49  ;;  %v5025_v56 = vadd.f32 %v5024_v54, %v5023_v53  ;;  %v5026_v57 = vpop.f32.mrb[62].mxu1 }
 0x335   : > { %v1407_v58 = vadd.f32 %v1406_v38, %v1376_v40  ;;  %v5027_v44 = vpop.f32.mrb[63].mxu1 }
 0x336   : > { %v1275_v62 = vadd.f32 %v5025_v56, %v6940_v46  ;;  %v5028_v25 = vadd.f32 %v5027_v44, %v5026_v57 }
 0x338   : > { %vm1312_vm14 = vcmp.ge.f32.partialorder %v1275_v62, 0.0  ;;  %v1345_v1 = vmul.f32 %v6945_v0, %v1275_v62  ;;  %v1278_v2 = vadd.f32 %v5028_v25, %v6940_v46 }
 0x33a   : > { %v1377_v5 = vsel %vm1312_vm14, %v1275_v62, %v1345_v1  ;;  %vm1313_vm15 = vcmp.ge.f32.partialorder %v1278_v2, 0.0  ;;  %v1346_v6 = vmul.f32 %v6945_v0, %v1278_v2 }
 0x33b   : > { %v1408_v9 = vadd.f32 %v1407_v58, %v1377_v5 }
 0x33c   : > { %v1378_v7 = vsel %vm1313_vm15, %v1278_v2, %v1346_v6 }
 0x33d   : > { %v1409_v11 = vadd.f32 %v1408_v9, %v1378_v7 }
 0x33f   : > { %v1410_v16 = vrot.slane %v1409_v11, 4 }
 0x341   : > { %v1411_v17 = vadd.f32 %v1410_v16, %v1409_v11 }
 0x343   : > { %v1412_v13 = vrot.slane %v1411_v17, 2 }
 0x345   : > { %v1413_v23 = vadd.f32 %v1412_v13, %v1411_v17 }
 0x347   : > { %v1414_v14 = vrot.slane %v1413_v23, 1 }
 0x349   : > { %v1415_v24 = vadd.f32 %v1414_v14, %v1413_v23 }
 0x34b   : > { %v7083_v29 = vmul.f32 0.00390625, %v1415_v24 }
 0x34d   : > { %v7087_v33 = vsub.f32 %v7047_v21, %v7083_v29  ;;  %v7091_v46 = vsub.f32 %v7051_v19, %v7083_v29  ;;  %v7095_v0 = vsub.f32 %v7057_v42, %v7083_v29  ;;  %v7099_v35 = vsub.f32 %v7061_v51, %v7083_v29 }
 0x34e   : > { %v7103_v26 = vsub.f32 %v7067_v60, %v7083_v29  ;;  %v7106_v37 = vsub.f32 %v1372_v4, %v7083_v29  ;;  %v7109_v21 = vsub.f32 %v1373_v22, %v7083_v29  ;;  %v7112_v19 = vsub.f32 %v1374_v20, %v7083_v29 }
 0x34f   : > { %v7115_v42 = vsub.f32 %v1375_v47, %v7083_v29  ;;  %v7118_v28 = vsub.f32 %v1376_v40, %v7083_v29  ;;  %v7121_v51 = vsub.f32 %v1377_v5, %v7083_v29  ;;  %v7124_v60 = vsub.f32 %v1378_v7, %v7083_v29 }
 0x350   : > { %v7128_v4 = vsub.f32 %v6954_v12, %v7083_v29  ;;  %v7132_v22 = vsub.f32 %v6951_v10, %v7083_v29  ;;  %v7136_v20 = vsub.f32 %v6956_v15, %v7083_v29  ;;  %v7144_v32 = vsub.f32 %v6964_v27, %v7083_v29 }
 0x351   : > { %v7148_v12 = vsub.f32 %v6967_v30, %v7083_v29  ;;  %v7154_v15 = vsub.f32 %v6974_v39, %v7083_v29  ;;  %v7160_v27 = vsub.f32 %v6977_v45, %v7083_v29  ;;  %v7166_v54 = vsub.f32 %v6984_v52, %v7083_v29 }
 0x352   : > { %v1450_v41 = vmul.f32 %v7128_v4, %v7128_v4  ;;  %v1451_v43 = vmul.f32 %v7132_v22, %v7132_v22  ;;  %v1452_v10 = vmul.f32 %v7136_v20, %v7136_v20  ;;  %v1453_v49 = vmul.f32 %v7144_v32, %v7144_v32 }
 0x353   : > { %v1454_v30 = vmul.f32 %v7148_v12, %v7148_v12  ;;  %v1455_v39 = vmul.f32 %v7154_v15, %v7154_v15  ;;  %v7172_v56 = vsub.f32 %v6987_v55, %v7083_v29  ;;  %v1456_v45 = vmul.f32 %v7160_v27, %v7160_v27 }
 0x354   : > { %v1482_v47 = vadd.f32 %v1451_v43, %v1450_v41  ;;  %v7178_v58 = vsub.f32 %v6994_v63, %v7083_v29  ;;  %v1457_v52 = vmul.f32 %v7166_v54, %v7166_v54  ;;  %v7184_v62 = vsub.f32 %v6997_v48, %v7083_v29 }
 0x355   : > { %v1458_v55 = vmul.f32 %v7172_v56, %v7172_v56  ;;  %v7190_v1 = vsub.f32 %v7004_v8, %v7083_v29  ;;  %v7196_v5 = vsub.f32 %v7007_v18, %v7083_v29  ;;  %v7202_v9 = vsub.f32 %v7014_v31, %v7083_v29 }
 0x356   : > { %v1483_v53 = vadd.f32 %v1482_v47, %v1452_v10  ;;  %v1459_v63 = vmul.f32 %v7178_v58, %v7178_v58  ;;  %v1460_v48 = vmul.f32 %v7184_v62, %v7184_v62  ;;  %v7208_v11 = vsub.f32 %v7016_v36, %v7083_v29 }
 0x357   : > { %v1461_v8 = vmul.f32 %v7190_v1, %v7190_v1  ;;  %v1462_v18 = vmul.f32 %v7196_v5, %v7196_v5  ;;  %v7214_v17 = vsub.f32 %v7024_v34, %v7083_v29  ;;  %v1463_v31 = vmul.f32 %v7202_v9, %v7202_v9 }
 0x358   : > { %v1484_v38 = vadd.f32 %v1483_v53, %v1453_v49  ;;  %v1434_v23 = vsub.f32 %v7026_v50, %v7083_v29  ;;  %v1464_v14 = vmul.f32 %v7208_v11, %v7208_v11  ;;  %v1435_v24 = vsub.f32 %v7032_v59, %v7083_v29 }
 0x359   : > { %v1465_v41 = vmul.f32 %v7214_v17, %v7214_v17  ;;  %v1436_v34 = vsub.f32 %v7036_v61, %v7083_v29  ;;  %v1437_v49 = vsub.f32 %v7041_v3, %v7083_v29  ;;  %v1470_v59 = vmul.f32 %v7087_v33, %v7087_v33 }
 0x35a   : > { %v1485_v40 = vadd.f32 %v1484_v38, %v1454_v30  ;;  %v1466_v10 = vmul.f32 %v1434_v23, %v1434_v23  ;;  %v1467_v50 = vmul.f32 %v1435_v24, %v1435_v24  ;;  %v1472_v61 = vmul.f32 %v7095_v0, %v7095_v0 }
 0x35b   : > { %v1468_v30 = vmul.f32 %v1436_v34, %v1436_v34  ;;  %v1473_v3 = vmul.f32 %v7099_v35, %v7099_v35 }
 0x35c   : > { %v1486_v57 = vadd.f32 %v1485_v40, %v1455_v39  ;;  %v1469_v39 = vmul.f32 %v1437_v49, %v1437_v49 }
 0x35e   : > { %v1487_v44 = vadd.f32 %v1486_v57, %v1456_v45  ;;  %v1471_v57 = vmul.f32 %v7091_v46, %v7091_v46 }
 0x360   : > { %v1488_v25 = vadd.f32 %v1487_v44, %v1457_v52 }
 0x362   : > { %v1489_v2 = vadd.f32 %v1488_v25, %v1458_v55  ;;  %v1474_v55 = vmul.f32 %v7103_v26, %v7103_v26 }
 0x364   : > { %v1490_v6 = vadd.f32 %v1489_v2, %v1459_v63  ;;  %v1475_v63 = vmul.f32 %v7106_v37, %v7106_v37 }
 0x366   : > { %v1491_v7 = vadd.f32 %v1490_v6, %v1460_v48  ;;  %v1476_v48 = vmul.f32 %v7109_v21, %v7109_v21 }
 0x368   : > { %v1492_v16 = vadd.f32 %v1491_v7, %v1461_v8  ;;  %v1477_v8 = vmul.f32 %v7112_v19, %v7112_v19 }
 0x36a   : > { %v1493_v13 = vadd.f32 %v1492_v16, %v1462_v18  ;;  %v1478_v18 = vmul.f32 %v7115_v42, %v7115_v42 }
 0x36c   : > { %v1494_v36 = vadd.f32 %v1493_v13, %v1463_v31  ;;  %v1479_v31 = vmul.f32 %v7118_v28, %v7118_v28 }
 0x36e   : > { %v1495_v43 = vadd.f32 %v1494_v36, %v1464_v14  ;;  %v1480_v14 = vmul.f32 %v7121_v51, %v7121_v51 }
 0x370   : > { %v1496_v47 = vadd.f32 %v1495_v43, %v1465_v41  ;;  %v1481_v41 = vmul.f32 %v7124_v60, %v7124_v60 }
 0x372   : > { %v1497_v53 = vadd.f32 %v1496_v47, %v1466_v10 }
 0x374   : > { %v1498_v38 = vadd.f32 %v1497_v53, %v1467_v50 }
 0x376   : > { %v1499_v40 = vadd.f32 %v1498_v38, %v1468_v30 }
 0x378   : > { %v1500_v45 = vadd.f32 %v1499_v40, %v1469_v39 }
 0x37a   : > { %v1501_v52 = vadd.f32 %v1500_v45, %v1470_v59 }
 0x37c   : > { %v1502_v44 = vadd.f32 %v1501_v52, %v1471_v57 }
 0x37e   : > { %v1503_v29 = vadd.f32 %v1502_v44, %v1472_v61 }
 0x380   : > { %v1504_v25 = vadd.f32 %v1503_v29, %v1473_v3  ;;  %v7267_v3 = vld [vmem:[%s9130_s6] ss:$0 sm:$0xff] }
 0x382   : > { %v1505_v2 = vadd.f32 %v1504_v25, %v1474_v55 }
 0x384   : > { %v1506_v6 = vadd.f32 %v1505_v2, %v1475_v63 }
 0x386   : > { %v1507_v7 = vadd.f32 %v1506_v6, %v1476_v48 }
 0x388   : > { %v1508_v16 = vadd.f32 %v1507_v7, %v1477_v8 }
 0x38a   : > { %v1509_v13 = vadd.f32 %v1508_v16, %v1478_v18 }
 0x38c   : > { %v1510_v36 = vadd.f32 %v1509_v13, %v1479_v31 }
 0x38e   : > { %v1511_v43 = vadd.f32 %v1510_v36, %v1480_v14 }
 0x390   : > { %v1512_v10 = vadd.f32 %v1511_v43, %v1481_v41 }
 0x392   : > { %v1513_v47 = vrot.slane %v1512_v10, 4 }
 0x394   : > { %v1514_v50 = vadd.f32 %v1513_v47, %v1512_v10 }
 0x396   : > { %v1515_v53 = vrot.slane %v1514_v50, 2 }
 0x398   : > { %v1516_v30 = vadd.f32 %v1515_v53, %v1514_v50 }
 0x39a   : > { %v1517_v38 = vrot.slane %v1516_v30, 1 }
 0x39c   : > { %v1518_v39 = vadd.f32 %v1517_v38, %v1516_v30 }
 0x39e   : > { %v1519_v40 = vmul.f32 0.00390625, %v1518_v39 }
 0x3a0   : > { %v1520_v59 = vadd.f32 1e-05, %v1519_v40 }
 0x3a2   : > { %6017 = vrsqrt.f32 %v1520_v59 }
 0x3ac   : > { %v7254_v45 = vpop.eup %6017 }
 0x3ad   : > { %v1522_v57 = vmul.f32 %v7254_v45, %v7128_v4  ;;  %v1523_v52 = vmul.f32 %v7254_v45, %v7132_v22  ;;  %v1524_v61 = vmul.f32 %v7254_v45, %v7136_v20  ;;  %v1525_v44 = vmul.f32 %v7254_v45, %v7144_v32  ;;  %v7280_v32 = vld [vmem:[%s9131_s7] ss:$0 sm:$0xff] }
 0x3ae   : > { %v1526_v29 = vmul.f32 %v7254_v45, %v7148_v12  ;;  %v1527_v4 = vmul.f32 %v7254_v45, %v7154_v15  ;;  %v1528_v22 = vmul.f32 %v7254_v45, %v7160_v27  ;;  %v1529_v20 = vmul.f32 %v7254_v45, %v7166_v54 }
 0x3af   : > { %v1538_v55 = vmul.f32 %v7254_v45, %v1434_v23  ;;  %v1539_v25 = vmul.f32 %v7254_v45, %v1435_v24  ;;  %v1561_v12 = vmul.f32 %v7267_v3, %v1522_v57  ;;  %v1562_v63 = vmul.f32 %v7267_v3, %v1523_v52 }
 0x3b0   : > { %v1540_v15 = vmul.f32 %v7254_v45, %v1436_v34  ;;  %v1541_v27 = vmul.f32 %v7254_v45, %v1437_v49  ;;  %v1563_v2 = vmul.f32 %v7267_v3, %v1524_v61  ;;  %v1564_v54 = vmul.f32 %v7267_v3, %v1525_v44 }
 0x3b1   : > { %v1577_v48 = vmul.f32 %v7267_v3, %v1538_v55  ;;  %v1578_v6 = vmul.f32 %v7267_v3, %v1539_v25  ;;  %v1600_v23 = vadd.f32 %v7280_v32, %v1561_v12  ;;  %v1601_v24 = vadd.f32 %v7280_v32, %v1562_v63 }
 0x3b2   : > { %v1530_v8 = vmul.f32 %v7254_v45, %v7172_v56  ;;  %v1579_v7 = vmul.f32 %v7267_v3, %v1540_v15  ;;  %v1580_v34 = vmul.f32 %v7267_v3, %v1541_v27  ;;  %v1602_v49 = vadd.f32 %v7280_v32, %v1563_v2 }
 0x3b3   : > { %v1616_v18 = vadd.f32 %v7280_v32, %v1577_v48  ;;  %v1617_v16 = vadd.f32 %v7280_v32, %v1578_v6  ;;  %v1603_v31 = vadd.f32 %v7280_v32, %v1564_v54  ;;  %v1542_v13 = vmul.f32 %v7254_v45, %v7087_v33 }
 0x3b4   : > { %v7304_v14 = vpack.c.bf16 %v1601_v24, %v1600_v23  ;;  %v1618_v36 = vadd.f32 %v7280_v32, %v1579_v7  ;;  %v1619_v56 = vadd.f32 %v7280_v32, %v1580_v34  ;;  %v1543_v41 = vmul.f32 %v7254_v45, %v7091_v46 }
 0x3b5   : > { %v7310_v43 = vpack.c.bf16 %v1617_v16, %v1616_v18  ;;  %v1581_v10 = vmul.f32 %v7267_v3, %v1542_v13  ;;  %v1565_v47 = vmul.f32 %v7267_v3, %v1526_v29  ;;  %v1566_v50 = vmul.f32 %v7267_v3, %v1527_v4 }
 0x3b6   : > { %v7315_v53 = vpack.c.bf16 %v1619_v56, %v1618_v36  ;;  %v1582_v33 = vmul.f32 %v7267_v3, %v1543_v41  ;;  %v1544_v30 = vmul.f32 %v7254_v45, %v7095_v0  ;;  %v1545_v38 = vmul.f32 %v7254_v45, %v7099_v35 }
 0x3b7   : > { %v1531_v46 = vmul.f32 %v7254_v45, %v7178_v58  ;;  %v1532_v39 = vmul.f32 %v7254_v45, %v7184_v62  ;;  %5029 = vmatprep.subr.bf16.mxu0 %v7310_v43  ;;  %v7327_v40 = vpack.c.bf16 %v1603_v31, %v1602_v49  ;;  %v1620_v59 = vadd.f32 %v7280_v32, %v1581_v10 }
 0x3b8   : > { %5030 = vmatpush3.bf16.msra.mxu0 %v7304_v14  ;;  %v1621_v57 = vadd.f32 %v7280_v32, %v1582_v33  ;;  %v1604_v0 = vadd.f32 %v7280_v32, %v1565_v47  ;;  %v1583_v35 = vmul.f32 %v7267_v3, %v1544_v30  ;;  %v1584_v52 = vmul.f32 %v7267_v3, %v1545_v38 }
 0x3b9   : > { %5031 = vmatprep.subr.bf16.mxu0 %v7315_v53  ;;  %v1605_v58 = vadd.f32 %v7280_v32, %v1566_v50  ;;  %v1567_v62 = vmul.f32 %v7267_v3, %v1528_v22  ;;  %v1546_v61 = vmul.f32 %v7254_v45, %v7103_v26  ;;  %v1547_v44 = vmul.f32 %v7254_v45, %v7106_v37 }
 0x3ba   : > { %v7342_v29 = vpack.c.bf16 %v1621_v57, %v1620_v59  ;;  %v1622_v4 = vadd.f32 %v7280_v32, %v1583_v35  ;;  %v1623_v55 = vadd.f32 %v7280_v32, %v1584_v52  ;;  %v1568_v25 = vmul.f32 %v7267_v3, %v1529_v20 }
 0x3bb   : > { %v1533_v12 = vmul.f32 %v7254_v45, %v7190_v1  ;;  %v1585_v63 = vmul.f32 %v7267_v3, %v1546_v61  ;;  %v1586_v22 = vmul.f32 %v7267_v3, %v1547_v44  ;;  %v1569_v26 = vmul.f32 %v7267_v3, %v1530_v8 }
 0x3bc   : > { %5032 = vmatpush3.bf16.msra.mxu0 %v7327_v40  ;;  %v7353_v37 = vpack.c.bf16 %v1623_v55, %v1622_v4  ;;  %v1570_v15 = vmul.f32 %v7267_v3, %v1531_v46  ;;  %v1548_v27 = vmul.f32 %v7254_v45, %v7109_v21  ;;  %v1549_v20 = vmul.f32 %v7254_v45, %v7112_v19  ;;  %v5950_v55 = vld [vmem:[#allocation10 + $0xc0] sm:$0xff]  }
 0x3bd   : > { %v1534_v1 = vmul.f32 %v7254_v45, %v7196_v5  ;;  %5033 = vmatprep.subr.bf16.mxu0 %v7342_v29  ;;  %v7363_v2 = vpack.c.bf16 %v1605_v58, %v1604_v0  ;;  %v1624_v54 = vadd.f32 %v7280_v32, %v1585_v63  ;;  %v1625_v48 = vadd.f32 %v7280_v32, %v1586_v22  ;;  %v5953_v63 = vld [vmem:[#allocation10 + $0x88] sm:$0xff]   ;;  %v5954_v22 = vld [vmem:[#allocation10 + $0xd0] sm:$0xff]  }
 0x3be   : > { %v1606_v6 = vadd.f32 %v7280_v32, %v1567_v62  ;;  %v1607_v23 = vadd.f32 %v7280_v32, %v1568_v25  ;;  %v1587_v21 = vmul.f32 %v7267_v3, %v1548_v27  ;;  %v1588_v24 = vmul.f32 %v7267_v3, %v1549_v20  ;;  %v5951_v25 = vld [vmem:[#allocation10 + $0x80] sm:$0xff]   ;;  %5141 = vmatprep.subr.bf16.mxu1 %v5950_v55  ;;  %v6026_v27 = vld [vmem:[%s6786_s4 + $0x14] ss:$8 sps:$4 sm:$0xff]  }
 0x3bf   : > { %v1535_v19 = vmul.f32 %v7254_v45, %v7202_v9  ;;  %v7373_v5 = vpack.c.bf16 %v1625_v48, %v1624_v54  ;;  %v1550_v8 = vmul.f32 %v7254_v45, %v7115_v42  ;;  %v1551_v7 = vmul.f32 %v7254_v45, %v7118_v28  ;;  %5142 = vmatpush3.bf16.msra.mxu1 %v5951_v25  ;;  %v5957_v20 = vld [vmem:[#allocation10 + $0x98] sm:$0xff]   ;;  %v5959_v54 = vld [vmem:[#allocation10 + $0xa0] sm:$0xff]  }
 0x3c0   : > { %5034 = vmatpush3.bf16.msra.mxu0 %v7363_v2  ;;  %v1608_v34 = vadd.f32 %v7280_v32, %v1569_v26  ;;  %v1609_v49 = vadd.f32 %v7280_v32, %v1570_v15  ;;  %v1626_v18 = vadd.f32 %v7280_v32, %v1587_v21  ;;  %v1627_v16 = vadd.f32 %v7280_v32, %v1588_v24  ;;  %v6025_v26 = vld [vmem:[%s6786_s4] ss:$8 sps:$4 sm:$0xff]   ;;  %v5956_v15 = vld [vmem:[#allocation10 + $0xd8] sm:$0xff]  }
 0x3c1   : > { %5035 = vmatprep.subr.bf16.mxu0 %v7353_v37  ;;  %v1571_v9 = vmul.f32 %v7267_v3, %v1532_v39  ;;  %v1572_v31 = vmul.f32 %v7267_v3, %v1533_v12  ;;  %v1589_v42 = vmul.f32 %v7267_v3, %v1550_v8  ;;  %v1590_v28 = vmul.f32 %v7267_v3, %v1551_v7  ;;  %v5952_v12 = vld [vmem:[#allocation10 + $0xc8] sm:$0xff]   ;;  %v6027_v48 = vld [vmem:[%s6786_s4 + $0x10] ss:$8 sps:$4 sm:$0xff]  }
 0x3c2   : > { %v7389_v13 = vpack.c.bf16 %v1607_v23, %v1606_v6  ;;  %v7391_v36 = vpack.c.bf16 %v1627_v16, %v1626_v18  ;;  %v1552_v56 = vmul.f32 %v7254_v45, %v7121_v51  ;;  %v1553_v41 = vmul.f32 %v7254_v45, %v7124_v60  ;;  %5143 = vmatprep.subr.bf16.mxu1 %v5952_v12  ;;  %v5960_v6 = vld [vmem:[#allocation10 + $0xe8] sm:$0xff]   ;;  %v6031_v8 = vld [vmem:[%s6786_s4 + $0x30] ss:$8 sps:$4 sm:$0xff]  }
 0x3c3   : > { %v1628_v10 = vadd.f32 %v7280_v32, %v1589_v42  ;;  %v1629_v47 = vadd.f32 %v7280_v32, %v1590_v28  ;;  %v1536_v50 = vmul.f32 %v7254_v45, %v7208_v11  ;;  %v1537_v33 = vmul.f32 %v7254_v45, %v7214_v17  ;;  %5144 = vmatpush3.bf16.msra.mxu1 %v5953_v63  ;;  %v6028_v23 = vld [vmem:[%s6786_s4 + $0x24] ss:$8 sps:$4 sm:$0xff]   ;;  %v6029_v24 = vld [vmem:[%s6786_s4 + $0x20] ss:$8 sps:$4 sm:$0xff]   ;;  %v6035_v18 = vld [vmem:[%s6786_s4 + $0x50] ss:$8 sps:$4 sm:$0xff]  }
 0x3c4   : > { %5036 = vmatpush3.bf16.msra.mxu0 %v7389_v13  ;;  %v1591_v30 = vmul.f32 %v7267_v3, %v1552_v56  ;;  %v1592_v38 = vmul.f32 %v7267_v3, %v1553_v41  ;;  %v7407_v51 = vpack.c.bf16 %v1609_v49, %v1608_v34  ;;  %v1610_v60 = vadd.f32 %v7280_v32, %v1571_v9  ;;  %v5961_v21 = vld [vmem:[#allocation10 + $0xa8] sm:$0xff]   ;;  %v6034_v49 = vld [vmem:[%s6786_s4 + $0x54] ss:$8 sps:$4 sm:$0xff]   ;;  %v6039_v42 = vld [vmem:[%s6786_s4 + $0x70] ss:$8 sps:$4 sm:$0xff]  }
 0x3c5   : > { %5037 = vmatprep.subr.bf16.mxu0 %v7373_v5  ;;  %v1611_v46 = vadd.f32 %v7280_v32, %v1572_v31  ;;  %v7411_v39 = vpack.c.bf16 %v1629_v47, %v1628_v10  ;;  %v1573_v11 = vmul.f32 %v7267_v3, %v1534_v1  ;;  %v1574_v17 = vmul.f32 %v7267_v3, %v1535_v19  ;;  %v5958_v1 = vld [vmem:[#allocation10 + $0xe0] sm:$0xff]   ;;  %v6030_v19 = vld [vmem:[%s6786_s4 + $0x34] ss:$8 sps:$4 sm:$0xff]   ;;  %v6043_v10 = vld [vmem:[%s6786_s4 + $0x90] ss:$8 sps:$4 sm:$0xff]  }
 0x3c6   : > { %v1630_v45 = vadd.f32 %v7280_v32, %v1591_v30  ;;  %v1631_v59 = vadd.f32 %v7280_v32, %v1592_v38  ;;  %v1575_v58 = vmul.f32 %v7267_v3, %v1536_v50  ;;  %v1576_v62 = vmul.f32 %v7267_v3, %v1537_v33  ;;  %5145 = vmatprep.subr.bf16.mxu1 %v5954_v22  ;;  %v6032_v7 = vld [vmem:[%s6786_s4 + $0x44] ss:$8 sps:$4 sm:$0xff]   ;;  %v6033_v34 = vld [vmem:[%s6786_s4 + $0x40] ss:$8 sps:$4 sm:$0xff]   ;;  %v6038_v31 = vld [vmem:[%s6786_s4 + $0x74] ss:$8 sps:$4 sm:$0xff]  }
 0x3c7   : > { %v7421_v0 = vpack.c.bf16 %v1611_v46, %v1610_v60  ;;  %v1612_v35 = vadd.f32 %v7280_v32, %v1573_v11  ;;  %v1613_v52 = vadd.f32 %v7280_v32, %v1574_v17  ;;  %v6036_v16 = vld [vmem:[%s6786_s4 + $0x64] ss:$8 sps:$4 sm:$0xff]   ;;  %v6037_v9 = vld [vmem:[%s6786_s4 + $0x60] ss:$8 sps:$4 sm:$0xff]   ;;  %v6042_v41 = vld [vmem:[%s6786_s4 + $0x94] ss:$8 sps:$4 sm:$0xff]  }
 0x3c8   : > { %5038 = vmatpush3.bf16.msra.mxu0 %v7407_v51  ;;  %v7418_v57 = vpack.c.bf16 %v1631_v59, %v1630_v45  ;;  %v1614_v44 = vadd.f32 %v7280_v32, %v1575_v58  ;;  %v1615_v4 = vadd.f32 %v7280_v32, %v1576_v62  ;;  %v5955_v32 = vld [vmem:[#allocation10 + $0x90] sm:$0xff]   ;;  %v6040_v28 = vld [vmem:[%s6786_s4 + $0x84] ss:$8 sps:$4 sm:$0xff]   ;;  %v6041_v56 = vld [vmem:[%s6786_s4 + $0x80] ss:$8 sps:$4 sm:$0xff]  }
 0x3c9   : > { %5039 = vmatprep.subr.bf16.mxu0 %v7391_v36  ;;  %v7429_v61 = vpack.c.bf16 %v1613_v52, %v1612_v35  ;;  %5146 = vmatpush3.bf16.msra.mxu1 %v5955_v32  ;;  %v6044_v47 = vld [vmem:[%s6786_s4 + $0xa4] ss:$8 sps:$4 sm:$0xff]   ;;  %v6045_v50 = vld [vmem:[%s6786_s4 + $0xa0] ss:$8 sps:$4 sm:$0xff]   ;;  %v6046_v33 = vld [vmem:[%s6786_s4 + $0xb4] ss:$8 sps:$4 sm:$0xff]  }
 0x3ca   : > { %v7435_v3 = vpack.c.bf16 %v1615_v4, %v1614_v44  ;;  %5147 = vmatprep.subr.bf16.mxu1 %v5956_v15  ;;  %v5962_v30 = vld [vmem:[#allocation10 + $0xf0] sm:$0xff]   ;;  %v6048_v46 = vld [vmem:[%s6786_s4 + $0xc4] ss:$8 sps:$4 sm:$0xff]   ;;  %v5964_v11 = vld [vmem:[#allocation10 + $0xf8] sm:$0xff]  }
 0x3cb   : > { %v5963_v38 = vld [vmem:[#allocation10 + $0xb0] sm:$0xff]   ;;  %v5965_v17 = vld [vmem:[#allocation10 + $0xb8] sm:$0xff]   ;;  %v6049_v45 = vld [vmem:[%s6786_s4 + $0xc0] ss:$8 sps:$4 sm:$0xff]  }
 0x3cc   : > { %5040 = vmatpush3.bf16.msra.mxu0 %v7421_v0  ;;  %v6047_v60 = vld [vmem:[%s6786_s4 + $0xb0] ss:$8 sps:$4 sm:$0xff]   ;;  %v6050_v59 = vld [vmem:[%s6786_s4 + $0xd4] ss:$8 sps:$4 sm:$0xff]   ;;  %v6052_v52 = vld [vmem:[%s6786_s4 + $0xe4] ss:$8 sps:$4 sm:$0xff]  }
 0x3cd   : > { %5041 = vmatprep.subr.bf16.mxu0 %v7411_v39  ;;  %5148 = vmatpush3.bf16.msra.mxu1 %v5957_v20  ;;  %v6051_v35 = vld [vmem:[%s6786_s4 + $0xd0] ss:$8 sps:$4 sm:$0xff]   ;;  %v6053_v58 = vld [vmem:[%s6786_s4 + $0xe0] ss:$8 sps:$4 sm:$0xff]   ;;  %v6054_v62 = vld [vmem:[%s6786_s4 + $0xf4] ss:$8 sps:$4 sm:$0xff]  }
 0x3ce   : > { %5149 = vmatprep.subr.bf16.mxu1 %v5958_v1  ;;  %v6055_v44 = vld [vmem:[%s6786_s4 + $0xf0] ss:$8 sps:$4 sm:$0xff]   ;;  %v6056_v4 = vld [vmem:[%s6786_s4 + $0x4] ss:$8 sps:$4 sm:$0xff]  }
 0x3d0   : > { %5042 = vmatpush3.bf16.msra.mxu0 %v7429_v61 }
 0x3d1   : > { %5043 = vmatprep.subr.bf16.mxu0 %v7418_v57  ;;  %5150 = vmatpush3.bf16.msra.mxu1 %v5959_v54 }
 0x3d2   : > { %5151 = vmatprep.subr.bf16.mxu1 %v5960_v6 }
 0x3d4   : > { %5044 = vmatpush3.bf16.msra.mxu0 %v7435_v3 }
 0x3d5   : > { %5152 = vmatpush3.bf16.msra.mxu1 %v5961_v21 }
 0x3d6   : > { %5153 = vmatprep.subr.bf16.mxu1 %v5962_v30 }
 0x3d7   : > { %1681 = vmatmul.mubr.bf16.vlgmr.msra.gmra.mrb[64].mxu0 %v6025_v26 }
 0x3d8   : > { %1688 = vmatprep.mubr.bf16.mxu0 %v6026_v27 }
 0x3d9   : > { %5154 = vmatpush3.bf16.msra.mxu1 %v5963_v38 }
 0x3da   : > { %5155 = vmatprep.subr.bf16.mxu1 %v5964_v11 }
 0x3dd   : > { %5156 = vmatpush3.bf16.msra.mxu1 %v5965_v17 }
 0x3df   : > { %1689 = vmatmul.mubr.bf16.gmra.mrb[68].mxu0 %v6027_v48 }
 0x3e0   : > { %1696 = vmatprep.mubr.bf16.mxu0 %v6028_v23 }
 0x3e7   : > { %1697 = vmatmul.mubr.bf16.gmra.mrb[72].mxu0 %v6029_v24 }
 0x3e8   : > { %1704 = vmatprep.mubr.bf16.mxu0 %v6030_v19 }
 0x3ef   : > { %1705 = vmatmul.mubr.bf16.gmra.mrb[76].mxu0 %v6031_v8 }
 0x3f0   : > { %1712 = vmatprep.mubr.bf16.mxu0 %v6032_v7 }
 0x3f7   : > { %1713 = vmatmul.mubr.bf16.gmra.mrb[80].mxu0 %v6033_v34 }
 0x3f8   : > { %1720 = vmatprep.mubr.bf16.mxu0 %v6034_v49 }
 0x3ff   : > { %1721 = vmatmul.mubr.bf16.gmra.mrb[84].mxu0 %v6035_v18 }
 0x400   : > { %1728 = vmatprep.mubr.bf16.mxu0 %v6036_v16 }
 0x407   : > { %1729 = vmatmul.mubr.bf16.gmra.mrb[88].mxu0 %v6037_v9 }
 0x408   : > { %1736 = vmatprep.mubr.bf16.mxu0 %v6038_v31 }
 0x40f   : > { %1737 = vmatmul.mubr.bf16.gmra.mrb[92].mxu0 %v6039_v42 }
 0x410   : > { %1744 = vmatprep.mubr.bf16.mxu0 %v6040_v28 }
 0x417   : > { %1745 = vmatmul.mubr.bf16.gmra.mrb[96].mxu0 %v6041_v56 }
 0x418   : > { %1752 = vmatprep.mubr.bf16.mxu0 %v6042_v41 }
 0x41f   : > { %1753 = vmatmul.mubr.bf16.gmra.mrb[100].mxu0 %v6043_v10 }
 0x420   : > { %1760 = vmatprep.mubr.bf16.mxu0 %v6044_v47 }
 0x427   : > { %1761 = vmatmul.mubr.bf16.gmra.mrb[104].mxu0 %v6045_v50 }
 0x428   : > { %1768 = vmatprep.mubr.bf16.mxu0 %v6046_v33 }
 0x42f   : > { %1769 = vmatmul.mubr.bf16.gmra.mrb[108].mxu0 %v6047_v60 }
 0x430   : > { %1776 = vmatprep.mubr.bf16.mxu0 %v6048_v46 }
 0x437   : > { %1777 = vmatmul.mubr.bf16.gmra.mrb[112].mxu0 %v6049_v45 }
 0x438   : > { %1784 = vmatprep.mubr.bf16.mxu0 %v6050_v59 }
 0x43f   : > { %1785 = vmatmul.mubr.bf16.gmra.mrb[116].mxu0 %v6051_v35 }
 0x440   : > { %1792 = vmatprep.mubr.bf16.mxu0 %v6052_v52 }
 0x447   : > { %1793 = vmatmul.mubr.bf16.gmra.mrb[120].mxu0 %v6053_v58 }
 0x448   : > { %1800 = vmatprep.mubr.bf16.mxu0 %v6054_v62 }
 0x44f   : > { %1801 = vmatmul.mubr.bf16.gmra.mrb[124].mxu0 %v6055_v44 }
 0x450   : > { %2523 = vmatprep.mubr.bf16.mxu0 %v6056_v4 }
 0x4aa   : > { %v5045_v55 = vpop.f32.mrb[64].mxu0 }
 0x4ab   : > { %v5046_v25 = vpop.f32.mrb[65].mxu0 }
 0x4ac   : > { %v5047_v12 = vadd.f32 %v5046_v25, %v5045_v55  ;;  %v5048_v63 = vpop.f32.mrb[66].mxu0 }
 0x4ad   : > { %v5049_v22 = vpop.f32.mrb[67].mxu0 }
 0x4ae   : > { %v5050_v32 = vadd.f32 %v5049_v22, %v5048_v63 }
 0x4b0   : > { %v1809_v26 = vpack.c.bf16 %v5050_v32, %v5047_v12 }
 0x4b2   : > { %v5051_v15 = vpop.f32.mrb[68].mxu0  ;;  %1994 = vmatprep.mubr.bf16.mxu1 %v1809_v26 }
 0x4b3   : > { %v5052_v27 = vpop.f32.mrb[69].mxu0  ;;  %1995 = vmatmul.mubr.bf16.vlgmr.msra.gmra.mrb[64].mxu1 %v7304_v14 }
 0x4b4   : > { %v5053_v20 = vadd.f32 %v5052_v27, %v5051_v15  ;;  %v5054_v1 = vpop.f32.mrb[70].mxu0 }
 0x4b5   : > { %v5055_v54 = vpop.f32.mrb[71].mxu0 }
 0x4b6   : > { %v5056_v48 = vadd.f32 %v5055_v54, %v5054_v1 }
 0x4b8   : > { %v1810_v6 = vpack.c.bf16 %v5056_v48, %v5053_v20 }
 0x4ba   : > { %v5057_v23 = vpop.f32.mrb[72].mxu0  ;;  %2002 = vmatprep.mubr.bf16.mxu1 %v1810_v6 }
 0x4bb   : > { %v5058_v21 = vpop.f32.mrb[73].mxu0  ;;  %2003 = vmatmul.mubr.bf16.gmra.mrb[68].mxu1 %v7327_v40 }
 0x4bc   : > { %v5059_v24 = vadd.f32 %v5058_v21, %v5057_v23  ;;  %v5060_v19 = vpop.f32.mrb[74].mxu0 }
 0x4bd   : > { %v5061_v8 = vpop.f32.mrb[75].mxu0 }
 0x4be   : > { %v5062_v7 = vadd.f32 %v5061_v8, %v5060_v19 }
 0x4c0   : > { %v1811_v34 = vpack.c.bf16 %v5062_v7, %v5059_v24 }
 0x4c2   : > { %v5063_v49 = vpop.f32.mrb[76].mxu0  ;;  %2010 = vmatprep.mubr.bf16.mxu1 %v1811_v34 }
 0x4c3   : > { %v5064_v18 = vpop.f32.mrb[77].mxu0  ;;  %2011 = vmatmul.mubr.bf16.gmra.mrb[72].mxu1 %v7363_v2 }
 0x4c4   : > { %v5065_v14 = vadd.f32 %v5064_v18, %v5063_v49  ;;  %v5066_v16 = vpop.f32.mrb[78].mxu0 }
 0x4c5   : > { %v5067_v9 = vpop.f32.mrb[79].mxu0 }
 0x4c6   : > { %v5068_v31 = vadd.f32 %v5067_v9, %v5066_v16 }
 0x4c8   : > { %v1812_v42 = vpack.c.bf16 %v5068_v31, %v5065_v14 }
 0x4ca   : > { %v5069_v28 = vpop.f32.mrb[80].mxu0  ;;  %2018 = vmatprep.mubr.bf16.mxu1 %v1812_v42 }
 0x4cb   : > { %v5070_v56 = vpop.f32.mrb[81].mxu0  ;;  %2019 = vmatmul.mubr.bf16.gmra.mrb[76].mxu1 %v7389_v13 }
 0x4cc   : > { %v5071_v40 = vadd.f32 %v5070_v56, %v5069_v28  ;;  %v5072_v41 = vpop.f32.mrb[82].mxu0 }
 0x4cd   : > { %v5073_v10 = vpop.f32.mrb[83].mxu0 }
 0x4ce   : > { %v5074_v47 = vadd.f32 %v5073_v10, %v5072_v41 }
 0x4d0   : > { %v1813_v50 = vpack.c.bf16 %v5074_v47, %v5071_v40 }
 0x4d2   : > { %v5075_v33 = vpop.f32.mrb[84].mxu0  ;;  %2026 = vmatprep.mubr.bf16.mxu1 %v1813_v50 }
 0x4d3   : > { %v5076_v30 = vpop.f32.mrb[85].mxu0  ;;  %2027 = vmatmul.mubr.bf16.gmra.mrb[80].mxu1 %v7407_v51 }
 0x4d4   : > { %v5077_v2 = vadd.f32 %v5076_v30, %v5075_v33  ;;  %v5078_v38 = vpop.f32.mrb[86].mxu0 }
 0x4d5   : > { %v5079_v60 = vpop.f32.mrb[87].mxu0 }
 0x4d6   : > { %v5080_v46 = vadd.f32 %v5079_v60, %v5078_v38 }
 0x4d8   : > { %v1814_v11 = vpack.c.bf16 %v5080_v46, %v5077_v2 }
 0x4da   : > { %v5081_v17 = vpop.f32.mrb[88].mxu0  ;;  %2034 = vmatprep.mubr.bf16.mxu1 %v1814_v11 }
 0x4db   : > { %v5082_v45 = vpop.f32.mrb[89].mxu0  ;;  %2035 = vmatmul.mubr.bf16.gmra.mrb[84].mxu1 %v7421_v0 }
 0x4dc   : > { %v5083_v13 = vadd.f32 %v5082_v45, %v5081_v17  ;;  %v5084_v59 = vpop.f32.mrb[90].mxu0 }
 0x4dd   : > { %v5085_v35 = vpop.f32.mrb[91].mxu0 }
 0x4de   : > { %v5086_v52 = vadd.f32 %v5085_v35, %v5084_v59 }
 0x4e0   : > { %v1815_v58 = vpack.c.bf16 %v5086_v52, %v5083_v13 }
 0x4e2   : > { %v5087_v62 = vpop.f32.mrb[92].mxu0  ;;  %2042 = vmatprep.mubr.bf16.mxu1 %v1815_v58 }
 0x4e3   : > { %v5088_v44 = vpop.f32.mrb[93].mxu0  ;;  %2043 = vmatmul.mubr.bf16.gmra.mrb[88].mxu1 %v7429_v61 }
 0x4e4   : > { %v5089_v51 = vadd.f32 %v5088_v44, %v5087_v62  ;;  %v5090_v4 = vpop.f32.mrb[94].mxu0 }
 0x4e5   : > { %v5091_v55 = vpop.f32.mrb[95].mxu0 }
 0x4e6   : > { %v5092_v25 = vadd.f32 %v5091_v55, %v5090_v4 }
 0x4e8   : > { %v1816_v12 = vpack.c.bf16 %v5092_v25, %v5089_v51 }
 0x4ea   : > { %v5093_v63 = vpop.f32.mrb[96].mxu0  ;;  %2050 = vmatprep.mubr.bf16.mxu1 %v1816_v12 }
 0x4eb   : > { %v5094_v22 = vpop.f32.mrb[97].mxu0  ;;  %2051 = vmatmul.mubr.bf16.gmra.mrb[92].mxu1 %v7435_v3 }
 0x4ec   : > { %v5095_v0 = vadd.f32 %v5094_v22, %v5093_v63  ;;  %v5096_v32 = vpop.f32.mrb[98].mxu0 }
 0x4ed   : > { %v5097_v26 = vpop.f32.mrb[99].mxu0 }
 0x4ee   : > { %v5098_v15 = vadd.f32 %v5097_v26, %v5096_v32 }
 0x4f0   : > { %v1817_v27 = vpack.c.bf16 %v5098_v15, %v5095_v0 }
 0x4f2   : > { %v5099_v20 = vpop.f32.mrb[100].mxu0  ;;  %2058 = vmatprep.mubr.bf16.mxu1 %v1817_v27 }
 0x4f3   : > { %v5100_v1 = vpop.f32.mrb[101].mxu0  ;;  %2059 = vmatmul.mubr.bf16.gmra.mrb[96].mxu1 %v7310_v43 }
 0x4f4   : > { %v5101_v61 = vadd.f32 %v5100_v1, %v5099_v20  ;;  %v5102_v54 = vpop.f32.mrb[102].mxu0 }
 0x4f5   : > { %v5103_v48 = vpop.f32.mrb[103].mxu0 }
 0x4f6   : > { %v5104_v6 = vadd.f32 %v5103_v48, %v5102_v54 }
 0x4f8   : > { %v1818_v23 = vpack.c.bf16 %v5104_v6, %v5101_v61 }
 0x4fa   : > { %v5105_v21 = vpop.f32.mrb[104].mxu0  ;;  %2066 = vmatprep.mubr.bf16.mxu1 %v1818_v23 }
 0x4fb   : > { %v5106_v24 = vpop.f32.mrb[105].mxu0  ;;  %2067 = vmatmul.mubr.bf16.gmra.mrb[100].mxu1 %v7315_v53 }
 0x4fc   : > { %v5107_v3 = vadd.f32 %v5106_v24, %v5105_v21  ;;  %v5108_v19 = vpop.f32.mrb[106].mxu0  ;;  %v7494_v24 = vstv %s4725_s14  ;;  %s6315_s14 = scalar_lea.vmem %s6314_s19, 512 }
 0x4fd   : > { %v5109_v8 = vpop.f32.mrb[107].mxu0  ;;  %p6317_p13 = scmp.lt.s32.totalorder %s6315_s14, %s6309_s25 }
 0x4fe   : > { %v5110_v7 = vadd.f32 %v5109_v8, %v5108_v19 }
 0x4ff   : > { %p6318_p12 = por %p6317_p13, %p6316_p11 }
 0x500   : > { %v1819_v34 = vpack.c.bf16 %v5110_v7, %v5107_v3 }
 0x501   : > { %p6319_p4 = pnand %p6318_p12, %p6312_p10 }
 0x502   : > { %v5111_v49 = vpop.f32.mrb[108].mxu0  ;;  %2074 = vmatprep.mubr.bf16.mxu1 %v1819_v34 }
 0x503   : > { %v5112_v18 = vpop.f32.mrb[109].mxu0  ;;  %2075 = vmatmul.mubr.bf16.gmra.mrb[104].mxu1 %v7342_v29 }
 0x504   : > { %v5113_v43 = vadd.f32 %v5112_v18, %v5111_v49  ;;  %v5114_v14 = vpop.f32.mrb[110].mxu0 }
 0x505   : > { %v5115_v16 = vpop.f32.mrb[111].mxu0 }
 0x506   : > { %v5116_v9 = vadd.f32 %v5115_v16, %v5114_v14 }
 0x508   : > { %v1820_v31 = vpack.c.bf16 %v5116_v9, %v5113_v43 }
 0x50a   : > { %v5117_v42 = vpop.f32.mrb[112].mxu0  ;;  %2082 = vmatprep.mubr.bf16.mxu1 %v1820_v31 }
 0x50b   : > { %v5118_v28 = vpop.f32.mrb[113].mxu0  ;;  %2083 = vmatmul.mubr.bf16.gmra.mrb[108].mxu1 %v7353_v37 }
 0x50c   : > { %v5119_v53 = vadd.f32 %v5118_v28, %v5117_v42  ;;  %v5120_v56 = vpop.f32.mrb[114].mxu0 }
 0x50d   : > { %v5121_v40 = vpop.f32.mrb[115].mxu0 }
 0x50e   : > { %v5122_v41 = vadd.f32 %v5121_v40, %v5120_v56 }
 0x510   : > { %v1821_v10 = vpack.c.bf16 %v5122_v41, %v5119_v53 }
 0x512   : > { %v5123_v47 = vpop.f32.mrb[116].mxu0  ;;  %2090 = vmatprep.mubr.bf16.mxu1 %v1821_v10 }
 0x513   : > { %v5124_v50 = vpop.f32.mrb[117].mxu0  ;;  %2091 = vmatmul.mubr.bf16.gmra.mrb[112].mxu1 %v7373_v5 }
 0x514   : > { %v5125_v29 = vadd.f32 %v5124_v50, %v5123_v47  ;;  %v5126_v33 = vpop.f32.mrb[118].mxu0 }
 0x515   : > { %v5127_v30 = vpop.f32.mrb[119].mxu0 }
 0x516   : > { %v5128_v2 = vadd.f32 %v5127_v30, %v5126_v33 }
 0x518   : > { %v1822_v38 = vpack.c.bf16 %v5128_v2, %v5125_v29 }
 0x51a   : > { %v5129_v60 = vpop.f32.mrb[120].mxu0  ;;  %2098 = vmatprep.mubr.bf16.mxu1 %v1822_v38 }
 0x51b   : > { %v5130_v46 = vpop.f32.mrb[121].mxu0  ;;  %2099 = vmatmul.mubr.bf16.gmra.mrb[116].mxu1 %v7391_v36 }
 0x51c   : > { %v5131_v37 = vadd.f32 %v5130_v46, %v5129_v60  ;;  %v5132_v11 = vpop.f32.mrb[122].mxu0 }
 0x51d   : > { %v5133_v17 = vpop.f32.mrb[123].mxu0 }
 0x51e   : > { %v5134_v45 = vadd.f32 %v5133_v17, %v5132_v11 }
 0x520   : > { %v1823_v13 = vpack.c.bf16 %v5134_v45, %v5131_v37 }
 0x522   : > { %v5135_v59 = vpop.f32.mrb[124].mxu0  ;;  %2106 = vmatprep.mubr.bf16.mxu1 %v1823_v13 }
 0x523   : > { %v5136_v35 = vpop.f32.mrb[125].mxu0  ;;  %2107 = vmatmul.mubr.bf16.gmra.mrb[120].mxu1 %v7411_v39 }
 0x524   : > { %v5137_v5 = vadd.f32 %v5136_v35, %v5135_v59  ;;  %v5138_v52 = vpop.f32.mrb[126].mxu0 }
 0x525   : > { %v5139_v58 = vpop.f32.mrb[127].mxu0 }
 0x526   : > { %v5140_v62 = vadd.f32 %v5139_v58, %v5138_v52 }
 0x528   : > { %v1824_v44 = vpack.c.bf16 %v5140_v62, %v5137_v5 }
 0x52a   : > { %2114 = vmatprep.mubr.bf16.mxu1 %v1824_v44 }
 0x52b   : > { %2115 = vmatmul.mubr.bf16.gmra.mrb[124].mxu1 %v7418_v57  ;;  %v7489_v57 = vld [vmem:[%s9129_s5 + $0x1] ss:$0 sm:$0xff] }
 0x586   : > { %v5157_v51 = vpop.f32.mrb[64].mxu1 }
 0x587   : > { %v5158_v36 = vpop.f32.mrb[65].mxu1 }
 0x588   : > { %v5159_v4 = vadd.f32 %v5158_v36, %v5157_v51  ;;  %v5160_v55 = vpop.f32.mrb[66].mxu1 }
 0x589   : > { %v5161_v25 = vpop.f32.mrb[67].mxu1 }
 0x58a   : > { %v5162_v12 = vadd.f32 %v5161_v25, %v5160_v55  ;;  %v1997_v6 = vadd.f32 %v5159_v4, %v7489_v57 }
 0x58c   : > { %v2000_v48 = vadd.f32 %v5162_v12, %v7489_v57  ;;  %v2157_v49 = vmul.f32 %v7494_v24, %v1997_v6  ;;  %vm2124_vm1 = vcmp.ge.f32.partialorder %v1997_v6, 0.0 }
 0x58e   : > { %v5163_v63 = vpop.f32.mrb[68].mxu1  ;;  %v2158_v19 = vmul.f32 %v7494_v24, %v2000_v48  ;;  %vm2125_vm0 = vcmp.ge.f32.partialorder %v2000_v48, 0.0  ;;  %v7503_v31 = vsel %vm2124_vm1, %v1997_v6, %v2157_v49 }
 0x58f   : > { %v5164_v22 = vpop.f32.mrb[69].mxu1 }
 0x590   : > { %v5165_v0 = vadd.f32 %v5164_v22, %v5163_v63  ;;  %v5166_v32 = vpop.f32.mrb[70].mxu1  ;;  %v7500_v16 = vsel %vm2125_vm0, %v2000_v48, %v2158_v19 }
 0x591   : > { %v5167_v26 = vpop.f32.mrb[71].mxu1  ;;  %v2221_v56 = vadd.f32 %v7500_v16, %v7503_v31 }
 0x592   : > { %v5168_v39 = vadd.f32 %v5167_v26, %v5166_v32  ;;  %v2005_v23 = vadd.f32 %v5165_v0, %v7489_v57 }
 0x594   : > { %v2159_v18 = vmul.f32 %v7494_v24, %v2005_v23  ;;  %v2008_v43 = vadd.f32 %v5168_v39, %v7489_v57  ;;  %vm2126_vm2 = vcmp.ge.f32.partialorder %v2005_v23, 0.0 }
 0x596   : > { %v5169_v15 = vpop.f32.mrb[72].mxu1  ;;  %v7505_v42 = vsel %vm2126_vm2, %v2005_v23, %v2159_v18  ;;  %v2160_v28 = vmul.f32 %v7494_v24, %v2008_v43  ;;  %vm2127_vm3 = vcmp.ge.f32.partialorder %v2008_v43, 0.0 }
 0x597   : > { %v5170_v27 = vpop.f32.mrb[73].mxu1  ;;  %v2222_v29 = vadd.f32 %v2221_v56, %v7505_v42 }
 0x598   : > { %v5171_v20 = vadd.f32 %v5170_v27, %v5169_v15  ;;  %v5172_v1 = vpop.f32.mrb[74].mxu1  ;;  %v7513_v30 = vsel %vm2127_vm3, %v2008_v43, %v2160_v28 }
 0x599   : > { %v5173_v61 = vpop.f32.mrb[75].mxu1  ;;  %v2223_v37 = vadd.f32 %v2222_v29, %v7513_v30 }
 0x59a   : > { %v5174_v54 = vadd.f32 %v5173_v61, %v5172_v1  ;;  %v2013_v9 = vadd.f32 %v5171_v20, %v7489_v57 }
 0x59c   : > { %v2161_v41 = vmul.f32 %v7494_v24, %v2013_v9  ;;  %v2016_v10 = vadd.f32 %v5174_v54, %v7489_v57  ;;  %vm2128_vm4 = vcmp.ge.f32.partialorder %v2013_v9, 0.0 }
 0x59e   : > { %v5175_v21 = vpop.f32.mrb[76].mxu1  ;;  %v7516_v60 = vsel %vm2128_vm4, %v2013_v9, %v2161_v41  ;;  %v2162_v46 = vmul.f32 %v7494_v24, %v2016_v10  ;;  %vm2129_vm5 = vcmp.ge.f32.partialorder %v2016_v10, 0.0 }
 0x59f   : > { %v5176_v3 = vpop.f32.mrb[77].mxu1  ;;  %v2224_v13 = vadd.f32 %v2223_v37, %v7516_v60 }
 0x5a0   : > { %v5177_v8 = vadd.f32 %v5176_v3, %v5175_v21  ;;  %v5178_v7 = vpop.f32.mrb[78].mxu1  ;;  %v7523_v35 = vsel %vm2129_vm5, %v2016_v10, %v2162_v46 }
 0x5a1   : > { %v5179_v34 = vpop.f32.mrb[79].mxu1  ;;  %v2225_v4 = vadd.f32 %v2224_v13, %v7523_v35 }
 0x5a2   : > { %v5180_v14 = vadd.f32 %v5179_v34, %v5178_v7  ;;  %v2021_v2 = vadd.f32 %v5177_v8, %v7489_v57 }
 0x5a4   : > { %v2163_v11 = vmul.f32 %v7494_v24, %v2021_v2  ;;  %v2024_v17 = vadd.f32 %v5180_v14, %v7489_v57  ;;  %vm2130_vm6 = vcmp.ge.f32.partialorder %v2021_v2, 0.0 }
 0x5a6   : > { %v5181_v53 = vpop.f32.mrb[80].mxu1  ;;  %v7526_v44 = vsel %vm2130_vm6, %v2021_v2, %v2163_v11  ;;  %v2164_v51 = vmul.f32 %v7494_v24, %v2024_v17  ;;  %vm2131_vm7 = vcmp.ge.f32.partialorder %v2024_v17, 0.0 }
 0x5a7   : > { %v5182_v40 = vpop.f32.mrb[81].mxu1  ;;  %v2226_v12 = vadd.f32 %v2225_v4, %v7526_v44 }
 0x5a8   : > { %v5183_v47 = vadd.f32 %v5182_v40, %v5181_v53  ;;  %v5184_v50 = vpop.f32.mrb[82].mxu1  ;;  %v7533_v63 = vsel %vm2131_vm7, %v2024_v17, %v2164_v51 }
 0x5a9   : > { %v5185_v33 = vpop.f32.mrb[83].mxu1  ;;  %v2227_v20 = vadd.f32 %v2226_v12, %v7533_v63 }
 0x5aa   : > { %v5186_v38 = vadd.f32 %v5185_v33, %v5184_v50  ;;  %v2029_v5 = vadd.f32 %v5183_v47, %v7489_v57 }
 0x5ac   : > { %v2165_v55 = vmul.f32 %v7494_v24, %v2029_v5  ;;  %v2032_v25 = vadd.f32 %v5186_v38, %v7489_v57  ;;  %vm2132_vm8 = vcmp.ge.f32.partialorder %v2029_v5, 0.0 }
 0x5ae   : > { %v5187_v45 = vpop.f32.mrb[84].mxu1  ;;  %v7536_v26 = vsel %vm2132_vm8, %v2029_v5, %v2165_v55  ;;  %v2166_v39 = vmul.f32 %v7494_v24, %v2032_v25  ;;  %vm2133_vm9 = vcmp.ge.f32.partialorder %v2032_v25, 0.0 }
 0x5af   : > { %v5188_v59 = vpop.f32.mrb[85].mxu1  ;;  %v2228_v6 = vadd.f32 %v2227_v20, %v7536_v26 }
 0x5b0   : > { %v5189_v52 = vadd.f32 %v5188_v59, %v5187_v45  ;;  %v5190_v58 = vpop.f32.mrb[86].mxu1  ;;  %v7543_v23 = vsel %vm2133_vm9, %v2032_v25, %v2166_v39 }
 0x5b1   : > { %v5191_v62 = vpop.f32.mrb[87].mxu1  ;;  %v2229_v7 = vadd.f32 %v2228_v6, %v7543_v23 }
 0x5b2   : > { %v5192_v36 = vadd.f32 %v5191_v62, %v5190_v58  ;;  %v2037_v22 = vadd.f32 %v5189_v52, %v7489_v57 }
 0x5b4   : > { %v2167_v61 = vmul.f32 %v7494_v24, %v2037_v22  ;;  %v2040_v54 = vadd.f32 %v5192_v36, %v7489_v57  ;;  %vm2134_vm10 = vcmp.ge.f32.partialorder %v2037_v22, 0.0 }
 0x5b6   : > { %v5193_v0 = vpop.f32.mrb[88].mxu1  ;;  %v7546_v3 = vsel %vm2134_vm10, %v2037_v22, %v2167_v61  ;;  %v2168_v19 = vmul.f32 %v7494_v24, %v2040_v54  ;;  %vm2135_vm11 = vcmp.ge.f32.partialorder %v2040_v54, 0.0 }
 0x5b7   : > { %v5194_v32 = vpop.f32.mrb[89].mxu1  ;;  %v2230_v9 = vadd.f32 %v2229_v7, %v7546_v3 }
 0x5b8   : > { %v5195_v15 = vadd.f32 %v5194_v32, %v5193_v0  ;;  %v5196_v27 = vpop.f32.mrb[90].mxu1  ;;  %v7553_v53 = vsel %vm2135_vm11, %v2040_v54, %v2168_v19 }
 0x5b9   : > { %v5197_v1 = vpop.f32.mrb[91].mxu1  ;;  %v2231_v47 = vadd.f32 %v2230_v9, %v7553_v53 }
 0x5ba   : > { %v5198_v48 = vadd.f32 %v5197_v1, %v5196_v27  ;;  %v2045_v21 = vadd.f32 %v5195_v15, %v7489_v57 }
 0x5bc   : > { %v2169_v49 = vmul.f32 %v7494_v24, %v2045_v21  ;;  %v2048_v18 = vadd.f32 %v5198_v48, %v7489_v57  ;;  %vm2136_vm12 = vcmp.ge.f32.partialorder %v2045_v21, 0.0 }
 0x5be   : > { %v5199_v8 = vpop.f32.mrb[92].mxu1  ;;  %v7556_v41 = vsel %vm2136_vm12, %v2045_v21, %v2169_v49  ;;  %v2170_v10 = vmul.f32 %v7494_v24, %v2048_v18  ;;  %vm2137_vm13 = vcmp.ge.f32.partialorder %v2048_v18, 0.0 }
 0x5bf   : > { %v5200_v34 = vpop.f32.mrb[93].mxu1  ;;  %v2232_v2 = vadd.f32 %v2231_v47, %v7556_v41 }
 0x5c0   : > { %v5201_v43 = vadd.f32 %v5200_v34, %v5199_v8  ;;  %v5202_v14 = vpop.f32.mrb[94].mxu1  ;;  %v7563_v46 = vsel %vm2137_vm13, %v2048_v18, %v2170_v10 }
 0x5c1   : > { %v5203_v28 = vpop.f32.mrb[95].mxu1  ;;  %v2233_v52 = vadd.f32 %v2232_v2, %v7563_v46 }
 0x5c2   : > { %v2053_v56 = vadd.f32 %v5201_v43, %v7489_v57  ;;  %v5204_v40 = vadd.f32 %v5203_v28, %v5202_v14 }
 0x5c4   : > { %v2171_v50 = vmul.f32 %v7494_v24, %v2053_v56  ;;  %v2056_v29 = vadd.f32 %v5204_v40, %v7489_v57  ;;  %vm2138_vm14 = vcmp.ge.f32.partialorder %v2053_v56, 0.0 }
 0x5c6   : > { %v5205_v33 = vpop.f32.mrb[96].mxu1  ;;  %v7565_v45 = vsel %vm2138_vm14, %v2053_v56, %v2171_v50  ;;  %v2172_v13 = vmul.f32 %v7494_v24, %v2056_v29  ;;  %vm2139_vm15 = vcmp.ge.f32.partialorder %v2056_v29, 0.0 }
 0x5c7   : > { %v5206_v38 = vpop.f32.mrb[97].mxu1  ;;  %v2234_v51 = vadd.f32 %v2233_v52, %v7565_v45 }
 0x5c8   : > { %v5207_v37 = vadd.f32 %v5206_v38, %v5205_v33  ;;  %v5208_v11 = vpop.f32.mrb[98].mxu1  ;;  %v7573_v36 = vsel %vm2139_vm15, %v2056_v29, %v2172_v13 }
 0x5c9   : > { %v5209_v17 = vpop.f32.mrb[99].mxu1  ;;  %v2235_v32 = vadd.f32 %v2234_v51, %v7573_v36 }
 0x5ca   : > { %v2061_v59 = vadd.f32 %v5207_v37, %v7489_v57  ;;  %v5210_v5 = vadd.f32 %v5209_v17, %v5208_v11 }
 0x5cc   : > { %v2173_v58 = vmul.f32 %v7494_v24, %v2061_v59  ;;  %v2064_v62 = vadd.f32 %v5210_v5, %v7489_v57  ;;  %vm2140_vm0 = vcmp.ge.f32.partialorder %v2061_v59, 0.0 }
 0x5ce   : > { %v5211_v4 = vpop.f32.mrb[100].mxu1  ;;  %v7575_v25 = vsel %vm2140_vm0, %v2061_v59, %v2173_v58  ;;  %v2174_v12 = vmul.f32 %v7494_v24, %v2064_v62  ;;  %vm2141_vm1 = vcmp.ge.f32.partialorder %v2064_v62, 0.0 }
 0x5cf   : > { %v5212_v55 = vpop.f32.mrb[101].mxu1  ;;  %v2236_v20 = vadd.f32 %v2235_v32, %v7575_v25 }
 0x5d0   : > { %v5213_v22 = vadd.f32 %v5212_v55, %v5211_v4  ;;  %v5214_v0 = vpop.f32.mrb[102].mxu1  ;;  %v7581_v1 = vsel %vm2141_vm1, %v2064_v62, %v2174_v12 }
 0x5d1   : > { %v5215_v39 = vpop.f32.mrb[103].mxu1  ;;  %v2237_v19 = vadd.f32 %v2236_v20, %v7581_v1 }
 0x5d2   : > { %v2069_v15 = vadd.f32 %v5213_v22, %v7489_v57  ;;  %v5216_v27 = vadd.f32 %v5215_v39, %v5214_v0 }
 0x5d4   : > { %vm2142_vm2 = vcmp.ge.f32.partialorder %v2069_v15, 0.0  ;;  %v2175_v61 = vmul.f32 %v7494_v24, %v2069_v15  ;;  %v2072_v54 = vadd.f32 %v5216_v27, %v7489_v57 }
 0x5d6   : > { %v7585_v48 = vsel %vm2142_vm2, %v2069_v15, %v2175_v61  ;;  %v2176_v6 = vmul.f32 %v7494_v24, %v2072_v54  ;;  %v5217_v21 = vpop.f32.mrb[104].mxu1  ;;  %vm2143_vm3 = vcmp.ge.f32.partialorder %v2072_v54, 0.0 }
 0x5d7   : > { %v5218_v8 = vpop.f32.mrb[105].mxu1  ;;  %v2238_v49 = vadd.f32 %v2237_v19, %v7585_v48 }
 0x5d8   : > { %v5219_v7 = vadd.f32 %v5218_v8, %v5217_v21  ;;  %v5220_v34 = vpop.f32.mrb[106].mxu1  ;;  %v7590_v43 = vsel %vm2143_vm3, %v2072_v54, %v2176_v6 }
 0x5d9   : > { %v5221_v18 = vpop.f32.mrb[107].mxu1  ;;  %v2239_v40 = vadd.f32 %v2238_v49, %v7590_v43 }
 0x5da   : > { %v2077_v14 = vadd.f32 %v5219_v7, %v7489_v57  ;;  %v5222_v9 = vadd.f32 %v5221_v18, %v5220_v34 }
 0x5dc   : > { %vm2144_vm4 = vcmp.ge.f32.partialorder %v2077_v14, 0.0  ;;  %v2177_v28 = vmul.f32 %v7494_v24, %v2077_v14  ;;  %v2080_v56 = vadd.f32 %v5222_v9, %v7489_v57 }
 0x5de   : > { %v7596_v10 = vsel %vm2144_vm4, %v2077_v14, %v2177_v28  ;;  %vm2145_vm5 = vcmp.ge.f32.partialorder %v2080_v56, 0.0  ;;  %v2178_v47 = vmul.f32 %v7494_v24, %v2080_v56  ;;  %v5223_v50 = vpop.f32.mrb[108].mxu1 }
 0x5df   : > { %v2240_v29 = vadd.f32 %v2239_v40, %v7596_v10  ;;  %v5224_v33 = vpop.f32.mrb[109].mxu1 }
 0x5e0   : > { %v7600_v2 = vsel %vm2145_vm5, %v2080_v56, %v2178_v47  ;;  %v5225_v38 = vadd.f32 %v5224_v33, %v5223_v50  ;;  %v5226_v37 = vpop.f32.mrb[110].mxu1 }
 0x5e1   : > { %v2241_v11 = vadd.f32 %v2240_v29, %v7600_v2  ;;  %v5227_v17 = vpop.f32.mrb[111].mxu1 }
 0x5e2   : > { %v2085_v13 = vadd.f32 %v5225_v38, %v7489_v57  ;;  %v5228_v59 = vadd.f32 %v5227_v17, %v5226_v37 }
 0x5e4   : > { %vm2146_vm6 = vcmp.ge.f32.partialorder %v2085_v13, 0.0  ;;  %v2179_v5 = vmul.f32 %v7494_v24, %v2085_v13  ;;  %v2088_v52 = vadd.f32 %v5228_v59, %v7489_v57 }
 0x5e6   : > { %v7606_v58 = vsel %vm2146_vm6, %v2085_v13, %v2179_v5  ;;  %vm2147_vm7 = vcmp.ge.f32.partialorder %v2088_v52, 0.0  ;;  %v2180_v62 = vmul.f32 %v7494_v24, %v2088_v52  ;;  %v5229_v51 = vpop.f32.mrb[112].mxu1 }
 0x5e7   : > { %v2242_v4 = vadd.f32 %v2241_v11, %v7606_v58  ;;  %v5230_v55 = vpop.f32.mrb[113].mxu1 }
 0x5e8   : > { %v7610_v12 = vsel %vm2147_vm7, %v2088_v52, %v2180_v62  ;;  %v5231_v22 = vadd.f32 %v5230_v55, %v5229_v51  ;;  %v5232_v0 = vpop.f32.mrb[114].mxu1 }
 0x5e9   : > { %v2243_v32 = vadd.f32 %v2242_v4, %v7610_v12  ;;  %v5233_v39 = vpop.f32.mrb[115].mxu1 }
 0x5ea   : > { %v2093_v15 = vadd.f32 %v5231_v22, %v7489_v57  ;;  %v5234_v27 = vadd.f32 %v5233_v39, %v5232_v0 }
 0x5ec   : > { %vm2148_vm8 = vcmp.ge.f32.partialorder %v2093_v15, 0.0  ;;  %v2181_v20 = vmul.f32 %v7494_v24, %v2093_v15  ;;  %v2096_v61 = vadd.f32 %v5234_v27, %v7489_v57 }
 0x5ee   : > { %v7616_v54 = vsel %vm2148_vm8, %v2093_v15, %v2181_v20  ;;  %vm2149_vm9 = vcmp.ge.f32.partialorder %v2096_v61, 0.0  ;;  %v2182_v6 = vmul.f32 %v7494_v24, %v2096_v61  ;;  %v5235_v21 = vpop.f32.mrb[116].mxu1 }
 0x5ef   : > { %v2244_v19 = vadd.f32 %v2243_v32, %v7616_v54  ;;  %v5236_v8 = vpop.f32.mrb[117].mxu1 }
 0x5f0   : > { %v2214_v7 = vsel %vm2149_vm9, %v2096_v61, %v2182_v6  ;;  %v5237_v34 = vadd.f32 %v5236_v8, %v5235_v21  ;;  %v5238_v49 = vpop.f32.mrb[118].mxu1 }
 0x5f1   : > { %v2245_v18 = vadd.f32 %v2244_v19, %v2214_v7  ;;  %v5239_v14 = vpop.f32.mrb[119].mxu1 }
 0x5f2   : > { %v2101_v9 = vadd.f32 %v5237_v34, %v7489_v57  ;;  %v5240_v28 = vadd.f32 %v5239_v14, %v5238_v49 }
 0x5f4   : > { %vm2150_vm10 = vcmp.ge.f32.partialorder %v2101_v9, 0.0  ;;  %v2183_v56 = vmul.f32 %v7494_v24, %v2101_v9  ;;  %v2104_v40 = vadd.f32 %v5240_v28, %v7489_v57 }
 0x5f6   : > { %v2215_v47 = vsel %vm2150_vm10, %v2101_v9, %v2183_v56  ;;  %vm2151_vm11 = vcmp.ge.f32.partialorder %v2104_v40, 0.0  ;;  %v2184_v50 = vmul.f32 %v7494_v24, %v2104_v40  ;;  %v5241_v29 = vpop.f32.mrb[120].mxu1 }
 0x5f7   : > { %v2246_v33 = vadd.f32 %v2245_v18, %v2215_v47  ;;  %v5242_v38 = vpop.f32.mrb[121].mxu1 }
 0x5f8   : > { %v2216_v37 = vsel %vm2151_vm11, %v2104_v40, %v2184_v50  ;;  %v5243_v11 = vadd.f32 %v5242_v38, %v5241_v29  ;;  %v5244_v17 = vpop.f32.mrb[122].mxu1 }
 0x5f9   : > { %v2247_v13 = vadd.f32 %v2246_v33, %v2216_v37  ;;  %v5245_v59 = vpop.f32.mrb[123].mxu1 }
 0x5fa   : > { %v2109_v5 = vadd.f32 %v5243_v11, %v7489_v57  ;;  %v5246_v52 = vadd.f32 %v5245_v59, %v5244_v17 }
 0x5fc   : > { %vm2152_vm12 = vcmp.ge.f32.partialorder %v2109_v5, 0.0  ;;  %v2185_v62 = vmul.f32 %v7494_v24, %v2109_v5  ;;  %v2112_v51 = vadd.f32 %v5246_v52, %v7489_v57 }
 0x5fe   : > { %v2217_v4 = vsel %vm2152_vm12, %v2109_v5, %v2185_v62  ;;  %vm2153_vm13 = vcmp.ge.f32.partialorder %v2112_v51, 0.0  ;;  %v2186_v55 = vmul.f32 %v7494_v24, %v2112_v51  ;;  %v5247_v22 = vpop.f32.mrb[124].mxu1 }
 0x5ff   : > { %v2248_v0 = vadd.f32 %v2247_v13, %v2217_v4  ;;  %v5248_v32 = vpop.f32.mrb[125].mxu1 }
 0x600   : > { %v2218_v39 = vsel %vm2153_vm13, %v2112_v51, %v2186_v55  ;;  %v5249_v15 = vadd.f32 %v5248_v32, %v5247_v22  ;;  %v5250_v27 = vpop.f32.mrb[126].mxu1 }
 0x601   : > { %v2249_v20 = vadd.f32 %v2248_v0, %v2218_v39  ;;  %v5251_v61 = vpop.f32.mrb[127].mxu1 }
 0x602   : > { %v2117_v6 = vadd.f32 %v5249_v15, %v7489_v57  ;;  %v5252_v21 = vadd.f32 %v5251_v61, %v5250_v27 }
 0x604   : > { %vm2154_vm14 = vcmp.ge.f32.partialorder %v2117_v6, 0.0  ;;  %v2187_v19 = vmul.f32 %v7494_v24, %v2117_v6  ;;  %v2120_v8 = vadd.f32 %v5252_v21, %v7489_v57 }
 0x606   : > { %v2219_v34 = vsel %vm2154_vm14, %v2117_v6, %v2187_v19  ;;  %vm2155_vm15 = vcmp.ge.f32.partialorder %v2120_v8, 0.0  ;;  %v2188_v49 = vmul.f32 %v7494_v24, %v2120_v8 }
 0x607   : > { %v2250_v18 = vadd.f32 %v2249_v20, %v2219_v34 }
 0x608   : > { %v2220_v14 = vsel %vm2155_vm15, %v2120_v8, %v2188_v49 }
 0x609   : > { %v2251_v9 = vadd.f32 %v2250_v18, %v2220_v14 }
 0x60b   : > { %v2252_v28 = vrot.slane %v2251_v9, 4 }
 0x60d   : > { %v2253_v56 = vadd.f32 %v2252_v28, %v2251_v9 }
 0x60f   : > { %v2254_v40 = vrot.slane %v2253_v56, 2 }
 0x611   : > { %v2255_v50 = vadd.f32 %v2254_v40, %v2253_v56 }
 0x613   : > { %v2256_v29 = vrot.slane %v2255_v50, 1 }
 0x615   : > { %v2257_v33 = vadd.f32 %v2256_v29, %v2255_v50 }
 0x617   : > { %v7632_v38 = vmul.f32 0.00390625, %v2257_v33 }
 0x619   : > { %v7636_v11 = vsub.f32 %v7596_v10, %v7632_v38  ;;  %v7640_v57 = vsub.f32 %v7600_v2, %v7632_v38  ;;  %v7644_v24 = vsub.f32 %v7606_v58, %v7632_v38  ;;  %v7648_v17 = vsub.f32 %v7610_v12, %v7632_v38 }
 0x61a   : > { %v7652_v13 = vsub.f32 %v7616_v54, %v7632_v38  ;;  %v7655_v59 = vsub.f32 %v2214_v7, %v7632_v38  ;;  %v7658_v10 = vsub.f32 %v2215_v47, %v7632_v38  ;;  %v7661_v2 = vsub.f32 %v2216_v37, %v7632_v38 }
 0x61b   : > { %v7664_v58 = vsub.f32 %v2217_v4, %v7632_v38  ;;  %v7667_v5 = vsub.f32 %v2218_v39, %v7632_v38  ;;  %v7670_v12 = vsub.f32 %v2219_v34, %v7632_v38  ;;  %v7673_v54 = vsub.f32 %v2220_v14, %v7632_v38 }
 0x61c   : > { %v7677_v7 = vsub.f32 %v7503_v31, %v7632_v38  ;;  %v7681_v47 = vsub.f32 %v7500_v16, %v7632_v38  ;;  %v7685_v37 = vsub.f32 %v7505_v42, %v7632_v38  ;;  %v7693_v51 = vsub.f32 %v7513_v30, %v7632_v38 }
 0x61d   : > { %v7697_v31 = vsub.f32 %v7516_v60, %v7632_v38  ;;  %v7703_v42 = vsub.f32 %v7523_v35, %v7632_v38  ;;  %v7709_v30 = vsub.f32 %v7526_v44, %v7632_v38  ;;  %v7715_v32 = vsub.f32 %v7533_v63, %v7632_v38 }
 0x61e   : > { %v2291_v52 = vmul.f32 %v7677_v7, %v7677_v7  ;;  %v2292_v62 = vmul.f32 %v7681_v47, %v7681_v47  ;;  %v2293_v16 = vmul.f32 %v7685_v37, %v7685_v37  ;;  %v2294_v55 = vmul.f32 %v7693_v51, %v7693_v51 }
 0x61f   : > { %v2295_v60 = vmul.f32 %v7697_v31, %v7697_v31  ;;  %v2296_v35 = vmul.f32 %v7703_v42, %v7703_v42  ;;  %v7721_v15 = vsub.f32 %v7536_v26, %v7632_v38  ;;  %v2297_v44 = vmul.f32 %v7709_v30, %v7709_v30 }
 0x620   : > { %v2323_v4 = vadd.f32 %v2292_v62, %v2291_v52  ;;  %v7727_v20 = vsub.f32 %v7543_v23, %v7632_v38  ;;  %v2298_v63 = vmul.f32 %v7715_v32, %v7715_v32  ;;  %v7733_v6 = vsub.f32 %v7546_v3, %v7632_v38 }
 0x621   : > { %v2299_v26 = vmul.f32 %v7721_v15, %v7721_v15  ;;  %v7739_v19 = vsub.f32 %v7553_v53, %v7632_v38  ;;  %v7745_v34 = vsub.f32 %v7556_v41, %v7632_v38  ;;  %v7751_v18 = vsub.f32 %v7563_v46, %v7632_v38 }
 0x622   : > { %v2324_v22 = vadd.f32 %v2323_v4, %v2293_v16  ;;  %v2300_v23 = vmul.f32 %v7727_v20, %v7727_v20  ;;  %v2301_v3 = vmul.f32 %v7733_v6, %v7733_v6  ;;  %v7757_v9 = vsub.f32 %v7565_v45, %v7632_v38 }
 0x623   : > { %v2302_v53 = vmul.f32 %v7739_v19, %v7739_v19  ;;  %v2303_v41 = vmul.f32 %v7745_v34, %v7745_v34  ;;  %v7763_v56 = vsub.f32 %v7573_v36, %v7632_v38  ;;  %v2304_v46 = vmul.f32 %v7751_v18, %v7751_v18 }
 0x624   : > { %v2325_v0 = vadd.f32 %v2324_v22, %v2294_v55  ;;  %v2275_v50 = vsub.f32 %v7575_v25, %v7632_v38  ;;  %v2305_v29 = vmul.f32 %v7757_v9, %v7757_v9  ;;  %v2276_v33 = vsub.f32 %v7581_v1, %v7632_v38 }
 0x625   : > { %v2306_v52 = vmul.f32 %v7763_v56, %v7763_v56  ;;  %v2277_v36 = vsub.f32 %v7585_v48, %v7632_v38  ;;  %v2278_v55 = vsub.f32 %v7590_v43, %v7632_v38  ;;  %v2311_v1 = vmul.f32 %v7636_v11, %v7636_v11 }
 0x626   : > { %v2326_v39 = vadd.f32 %v2325_v0, %v2295_v60  ;;  %v2307_v16 = vmul.f32 %v2275_v50, %v2275_v50  ;;  %v2308_v25 = vmul.f32 %v2276_v33, %v2276_v33  ;;  %v2313_v48 = vmul.f32 %v7644_v24, %v7644_v24 }
 0x627   : > { %v2309_v60 = vmul.f32 %v2277_v36, %v2277_v36  ;;  %v2314_v43 = vmul.f32 %v7648_v17, %v7648_v17 }
 0x628   : > { %v2327_v27 = vadd.f32 %v2326_v39, %v2296_v35  ;;  %v2310_v35 = vmul.f32 %v2278_v55, %v2278_v55 }
 0x62a   : > { %v2328_v61 = vadd.f32 %v2327_v27, %v2297_v44  ;;  %v2312_v27 = vmul.f32 %v7640_v57, %v7640_v57 }
 0x62c   : > { %v2329_v21 = vadd.f32 %v2328_v61, %v2298_v63 }
 0x62e   : > { %v2330_v8 = vadd.f32 %v2329_v21, %v2299_v26  ;;  %v2315_v26 = vmul.f32 %v7652_v13, %v7652_v13 }
 0x630   : > { %v2331_v49 = vadd.f32 %v2330_v8, %v2300_v23  ;;  %v2316_v23 = vmul.f32 %v7655_v59, %v7655_v59 }
 0x632   : > { %v2332_v14 = vadd.f32 %v2331_v49, %v2301_v3  ;;  %v2317_v3 = vmul.f32 %v7658_v10, %v7658_v10 }
 0x634   : > { %v2333_v28 = vadd.f32 %v2332_v14, %v2302_v53  ;;  %v2318_v53 = vmul.f32 %v7661_v2, %v7661_v2 }
 0x636   : > { %v2334_v40 = vadd.f32 %v2333_v28, %v2303_v41  ;;  %v2319_v41 = vmul.f32 %v7664_v58, %v7664_v58 }
 0x638   : > { %v2335_v45 = vadd.f32 %v2334_v40, %v2304_v46  ;;  %v2320_v46 = vmul.f32 %v7667_v5, %v7667_v5 }
 0x63a   : > { %v2336_v62 = vadd.f32 %v2335_v45, %v2305_v29  ;;  %v2321_v29 = vmul.f32 %v7670_v12, %v7670_v12 }
 0x63c   : > { %v2337_v4 = vadd.f32 %v2336_v62, %v2306_v52  ;;  %v2322_v52 = vmul.f32 %v7673_v54, %v7673_v54 }
 0x63e   : > { %v2338_v22 = vadd.f32 %v2337_v4, %v2307_v16 }
 0x640   : > { %v2339_v0 = vadd.f32 %v2338_v22, %v2308_v25 }
 0x642   : > { %v2340_v39 = vadd.f32 %v2339_v0, %v2309_v60 }
 0x644   : > { %v2341_v44 = vadd.f32 %v2340_v39, %v2310_v35 }
 0x646   : > { %v2342_v63 = vadd.f32 %v2341_v44, %v2311_v1 }
 0x648   : > { %v2343_v61 = vadd.f32 %v2342_v63, %v2312_v27 }
 0x64a   : > { %v2344_v38 = vadd.f32 %v2343_v61, %v2313_v48 }
 0x64c   : > { %v2345_v21 = vadd.f32 %v2344_v38, %v2314_v43  ;;  %v7816_v43 = vld [vmem:[%s9130_s6 + $0x1] ss:$0 sm:$0xff] }
 0x64e   : > { %v2346_v8 = vadd.f32 %v2345_v21, %v2315_v26 }
 0x650   : > { %v2347_v49 = vadd.f32 %v2346_v8, %v2316_v23 }
 0x652   : > { %v2348_v14 = vadd.f32 %v2347_v49, %v2317_v3 }
 0x654   : > { %v2349_v28 = vadd.f32 %v2348_v14, %v2318_v53 }
 0x656   : > { %v2350_v40 = vadd.f32 %v2349_v28, %v2319_v41 }
 0x658   : > { %v2351_v45 = vadd.f32 %v2350_v40, %v2320_v46 }
 0x65a   : > { %v2352_v62 = vadd.f32 %v2351_v45, %v2321_v29 }
 0x65c   : > { %v2353_v16 = vadd.f32 %v2352_v62, %v2322_v52 }
 0x65e   : > { %v2354_v4 = vrot.slane %v2353_v16, 4 }
 0x660   : > { %v2355_v25 = vadd.f32 %v2354_v4, %v2353_v16 }
 0x662   : > { %v2356_v22 = vrot.slane %v2355_v25, 2 }
 0x664   : > { %v2357_v60 = vadd.f32 %v2356_v22, %v2355_v25 }
 0x666   : > { %v2358_v0 = vrot.slane %v2357_v60, 1 }
 0x668   : > { %v2359_v35 = vadd.f32 %v2358_v0, %v2357_v60 }
 0x66a   : > { %v2360_v39 = vmul.f32 0.00390625, %v2359_v35 }
 0x66c   : > { %v2361_v1 = vadd.f32 1e-05, %v2360_v39 }
 0x66e   : > { %6019 = vrsqrt.f32 %v2361_v1 }
 0x678   : > { %v7803_v44 = vpop.eup %6019 }
 0x679   : > { %v2363_v27 = vmul.f32 %v7803_v44, %v7677_v7  ;;  %v2364_v63 = vmul.f32 %v7803_v44, %v7681_v47  ;;  %v2365_v48 = vmul.f32 %v7803_v44, %v7685_v37  ;;  %v2366_v61 = vmul.f32 %v7803_v44, %v7693_v51  ;;  %v7829_v51 = vld [vmem:[%s9131_s7 + $0x1] ss:$0 sm:$0xff] }
 0x67a   : > { %v2367_v38 = vmul.f32 %v7803_v44, %v7697_v31  ;;  %v2368_v7 = vmul.f32 %v7803_v44, %v7703_v42  ;;  %v2369_v47 = vmul.f32 %v7803_v44, %v7709_v30  ;;  %v2370_v37 = vmul.f32 %v7803_v44, %v7715_v32 }
 0x67b   : > { %v2379_v26 = vmul.f32 %v7803_v44, %v2275_v50  ;;  %v2380_v21 = vmul.f32 %v7803_v44, %v2276_v33  ;;  %v2403_v31 = vmul.f32 %v7816_v43, %v2363_v27  ;;  %v2404_v23 = vmul.f32 %v7816_v43, %v2364_v63 }
 0x67c   : > { %v2381_v42 = vmul.f32 %v7803_v44, %v2277_v36  ;;  %v2382_v30 = vmul.f32 %v7803_v44, %v2278_v55  ;;  %v2405_v8 = vmul.f32 %v7816_v43, %v2365_v48  ;;  %v2406_v32 = vmul.f32 %v7816_v43, %v2366_v61 }
 0x67d   : > { %v2419_v3 = vmul.f32 %v7816_v43, %v2379_v26  ;;  %v2420_v49 = vmul.f32 %v7816_v43, %v2380_v21  ;;  %v2443_v50 = vadd.f32 %v7829_v51, %v2403_v31  ;;  %v2444_v33 = vadd.f32 %v7829_v51, %v2404_v23 }
 0x67e   : > { %v2371_v53 = vmul.f32 %v7803_v44, %v7721_v15  ;;  %v2421_v14 = vmul.f32 %v7816_v43, %v2381_v42  ;;  %v2422_v36 = vmul.f32 %v7816_v43, %v2382_v30  ;;  %v2445_v55 = vadd.f32 %v7829_v51, %v2405_v8 }
 0x67f   : > { %v2459_v41 = vadd.f32 %v7829_v51, %v2419_v3  ;;  %v2460_v28 = vadd.f32 %v7829_v51, %v2420_v49  ;;  %v2446_v46 = vadd.f32 %v7829_v51, %v2406_v32  ;;  %v2383_v40 = vmul.f32 %v7803_v44, %v7636_v11 }
 0x680   : > { %v7853_v29 = vpack.c.bf16 %v2444_v33, %v2443_v50  ;;  %v2461_v45 = vadd.f32 %v7829_v51, %v2421_v14  ;;  %v2462_v15 = vadd.f32 %v7829_v51, %v2422_v36  ;;  %v2384_v52 = vmul.f32 %v7803_v44, %v7640_v57 }
 0x681   : > { %v7859_v62 = vpack.c.bf16 %v2460_v28, %v2459_v41  ;;  %v2423_v16 = vmul.f32 %v7816_v43, %v2383_v40  ;;  %v2407_v4 = vmul.f32 %v7816_v43, %v2367_v38  ;;  %v2408_v25 = vmul.f32 %v7816_v43, %v2368_v7 }
 0x682   : > { %v7864_v22 = vpack.c.bf16 %v2462_v15, %v2461_v45  ;;  %v2424_v11 = vmul.f32 %v7816_v43, %v2384_v52  ;;  %v2385_v60 = vmul.f32 %v7803_v44, %v7644_v24  ;;  %v2386_v0 = vmul.f32 %v7803_v44, %v7648_v17 }
 0x683   : > { %v2372_v57 = vmul.f32 %v7803_v44, %v7727_v20  ;;  %v2373_v35 = vmul.f32 %v7803_v44, %v7733_v6  ;;  %5253 = vmatprep.subr.bf16.mxu0 %v7859_v62  ;;  %v7876_v39 = vpack.c.bf16 %v2446_v46, %v2445_v55  ;;  %v2463_v1 = vadd.f32 %v7829_v51, %v2423_v16 }
 0x684   : > { %5254 = vmatpush3.bf16.msra.mxu0 %v7853_v29  ;;  %v2464_v27 = vadd.f32 %v7829_v51, %v2424_v11  ;;  %v2447_v24 = vadd.f32 %v7829_v51, %v2407_v4  ;;  %v2425_v17 = vmul.f32 %v7816_v43, %v2385_v60  ;;  %v2426_v63 = vmul.f32 %v7816_v43, %v2386_v0 }
 0x685   : > { %5255 = vmatprep.subr.bf16.mxu0 %v7864_v22  ;;  %v2448_v20 = vadd.f32 %v7829_v51, %v2408_v25  ;;  %v2409_v6 = vmul.f32 %v7816_v43, %v2369_v47  ;;  %v2387_v48 = vmul.f32 %v7803_v44, %v7652_v13  ;;  %v2388_v61 = vmul.f32 %v7803_v44, %v7655_v59 }
 0x686   : > { %v7891_v38 = vpack.c.bf16 %v2464_v27, %v2463_v1  ;;  %v2465_v7 = vadd.f32 %v7829_v51, %v2425_v17  ;;  %v2466_v26 = vadd.f32 %v7829_v51, %v2426_v63  ;;  %v2410_v21 = vmul.f32 %v7816_v43, %v2370_v37 }
 0x687   : > { %v2374_v31 = vmul.f32 %v7803_v44, %v7739_v19  ;;  %v2427_v23 = vmul.f32 %v7816_v43, %v2387_v48  ;;  %v2428_v47 = vmul.f32 %v7816_v43, %v2388_v61  ;;  %v2411_v13 = vmul.f32 %v7816_v43, %v2371_v53 }
 0x688   : > { %5256 = vmatpush3.bf16.msra.mxu0 %v7876_v39  ;;  %v7902_v59 = vpack.c.bf16 %v2466_v26, %v2465_v7  ;;  %v2412_v42 = vmul.f32 %v7816_v43, %v2372_v57  ;;  %v2389_v30 = vmul.f32 %v7803_v44, %v7658_v10  ;;  %v2390_v37 = vmul.f32 %v7803_v44, %v7661_v2  ;;  %v5966_v26 = vld [vmem:[#allocation10 + $0x140] sm:$0xff]  }
 0x689   : > { %v2375_v19 = vmul.f32 %v7803_v44, %v7745_v34  ;;  %5257 = vmatprep.subr.bf16.mxu0 %v7891_v38  ;;  %v7912_v8 = vpack.c.bf16 %v2448_v20, %v2447_v24  ;;  %v2467_v32 = vadd.f32 %v7829_v51, %v2427_v23  ;;  %v2468_v3 = vadd.f32 %v7829_v51, %v2428_v47  ;;  %v5969_v23 = vld [vmem:[#allocation10 + $0x108] sm:$0xff]   ;;  %v5970_v47 = vld [vmem:[#allocation10 + $0x150] sm:$0xff]  }
 0x68a   : > { %v2449_v49 = vadd.f32 %v7829_v51, %v2409_v6  ;;  %v2450_v50 = vadd.f32 %v7829_v51, %v2410_v21  ;;  %v2429_v10 = vmul.f32 %v7816_v43, %v2389_v30  ;;  %v2430_v33 = vmul.f32 %v7816_v43, %v2390_v37  ;;  %v5967_v21 = vld [vmem:[#allocation10 + $0x100] sm:$0xff]   ;;  %5365 = vmatprep.subr.bf16.mxu1 %v5966_v26  ;;  %v6058_v30 = vld [vmem:[%s6786_s4 + $0x14] ss:$8 sps:$4 sm:$0xff]  }
 0x68b   : > { %v2376_v2 = vmul.f32 %v7803_v44, %v7751_v18  ;;  %v7922_v34 = vpack.c.bf16 %v2468_v3, %v2467_v32  ;;  %v2391_v53 = vmul.f32 %v7803_v44, %v7664_v58  ;;  %v2392_v14 = vmul.f32 %v7803_v44, %v7667_v5  ;;  %5366 = vmatpush3.bf16.msra.mxu1 %v5967_v21  ;;  %v5973_v37 = vld [vmem:[#allocation10 + $0x118] sm:$0xff]   ;;  %v5975_v32 = vld [vmem:[#allocation10 + $0x120] sm:$0xff]  }
 0x68c   : > { %5258 = vmatpush3.bf16.msra.mxu0 %v7912_v8  ;;  %v2451_v36 = vadd.f32 %v7829_v51, %v2411_v13  ;;  %v2452_v55 = vadd.f32 %v7829_v51, %v2412_v42  ;;  %v2469_v41 = vadd.f32 %v7829_v51, %v2429_v10  ;;  %v2470_v28 = vadd.f32 %v7829_v51, %v2430_v33  ;;  %v6057_v13 = vld [vmem:[%s6786_s4] ss:$8 sps:$4 sm:$0xff]   ;;  %v5972_v42 = vld [vmem:[#allocation10 + $0x158] sm:$0xff]  }
 0x68d   : > { %5259 = vmatprep.subr.bf16.mxu0 %v7902_v59  ;;  %v2413_v18 = vmul.f32 %v7816_v43, %v2373_v35  ;;  %v2414_v46 = vmul.f32 %v7816_v43, %v2374_v31  ;;  %v2431_v58 = vmul.f32 %v7816_v43, %v2391_v53  ;;  %v2432_v5 = vmul.f32 %v7816_v43, %v2392_v14  ;;  %v5968_v31 = vld [vmem:[#allocation10 + $0x148] sm:$0xff]   ;;  %v6059_v3 = vld [vmem:[%s6786_s4 + $0x10] ss:$8 sps:$4 sm:$0xff]  }
 0x68e   : > { %v7938_v40 = vpack.c.bf16 %v2450_v50, %v2449_v49  ;;  %v7940_v45 = vpack.c.bf16 %v2470_v28, %v2469_v41  ;;  %v2393_v15 = vmul.f32 %v7803_v44, %v7670_v12  ;;  %v2394_v52 = vmul.f32 %v7803_v44, %v7673_v54  ;;  %5367 = vmatprep.subr.bf16.mxu1 %v5968_v31  ;;  %v5976_v49 = vld [vmem:[#allocation10 + $0x168] sm:$0xff]   ;;  %v6063_v53 = vld [vmem:[%s6786_s4 + $0x30] ss:$8 sps:$4 sm:$0xff]  }
 0x68f   : > { %v2471_v16 = vadd.f32 %v7829_v51, %v2431_v58  ;;  %v2472_v4 = vadd.f32 %v7829_v51, %v2432_v5  ;;  %v2377_v25 = vmul.f32 %v7803_v44, %v7757_v9  ;;  %v2378_v11 = vmul.f32 %v7803_v44, %v7763_v56  ;;  %5368 = vmatpush3.bf16.msra.mxu1 %v5969_v23  ;;  %v6060_v50 = vld [vmem:[%s6786_s4 + $0x24] ss:$8 sps:$4 sm:$0xff]   ;;  %v6061_v33 = vld [vmem:[%s6786_s4 + $0x20] ss:$8 sps:$4 sm:$0xff]   ;;  %v6067_v41 = vld [vmem:[%s6786_s4 + $0x50] ss:$8 sps:$4 sm:$0xff]  }
 0x690   : > { %5260 = vmatpush3.bf16.msra.mxu0 %v7938_v40  ;;  %v2433_v60 = vmul.f32 %v7816_v43, %v2393_v15  ;;  %v2434_v0 = vmul.f32 %v7816_v43, %v2394_v52  ;;  %v7956_v12 = vpack.c.bf16 %v2452_v55, %v2451_v36  ;;  %v2453_v54 = vadd.f32 %v7829_v51, %v2413_v18  ;;  %v5977_v10 = vld [vmem:[#allocation10 + $0x128] sm:$0xff]   ;;  %v6066_v55 = vld [vmem:[%s6786_s4 + $0x54] ss:$8 sps:$4 sm:$0xff]   ;;  %v6071_v58 = vld [vmem:[%s6786_s4 + $0x70] ss:$8 sps:$4 sm:$0xff]  }
 0x691   : > { %5261 = vmatprep.subr.bf16.mxu0 %v7922_v34  ;;  %v2454_v57 = vadd.f32 %v7829_v51, %v2414_v46  ;;  %v7960_v35 = vpack.c.bf16 %v2472_v4, %v2471_v16  ;;  %v2415_v9 = vmul.f32 %v7816_v43, %v2375_v19  ;;  %v2416_v56 = vmul.f32 %v7816_v43, %v2376_v2  ;;  %v5974_v19 = vld [vmem:[#allocation10 + $0x160] sm:$0xff]   ;;  %v6062_v2 = vld [vmem:[%s6786_s4 + $0x34] ss:$8 sps:$4 sm:$0xff]   ;;  %v6075_v16 = vld [vmem:[%s6786_s4 + $0x90] ss:$8 sps:$4 sm:$0xff]  }
 0x692   : > { %v2473_v44 = vadd.f32 %v7829_v51, %v2433_v60  ;;  %v2474_v1 = vadd.f32 %v7829_v51, %v2434_v0  ;;  %v2417_v20 = vmul.f32 %v7816_v43, %v2377_v25  ;;  %v2418_v6 = vmul.f32 %v7816_v43, %v2378_v11  ;;  %5369 = vmatprep.subr.bf16.mxu1 %v5970_v47  ;;  %v6064_v14 = vld [vmem:[%s6786_s4 + $0x44] ss:$8 sps:$4 sm:$0xff]   ;;  %v6065_v36 = vld [vmem:[%s6786_s4 + $0x40] ss:$8 sps:$4 sm:$0xff]   ;;  %v6070_v46 = vld [vmem:[%s6786_s4 + $0x74] ss:$8 sps:$4 sm:$0xff]  }
 0x693   : > { %v7970_v24 = vpack.c.bf16 %v2454_v57, %v2453_v54  ;;  %v2455_v17 = vadd.f32 %v7829_v51, %v2415_v9  ;;  %v2456_v63 = vadd.f32 %v7829_v51, %v2416_v56  ;;  %v6068_v28 = vld [vmem:[%s6786_s4 + $0x64] ss:$8 sps:$4 sm:$0xff]   ;;  %v6069_v18 = vld [vmem:[%s6786_s4 + $0x60] ss:$8 sps:$4 sm:$0xff]   ;;  %v6074_v52 = vld [vmem:[%s6786_s4 + $0x94] ss:$8 sps:$4 sm:$0xff]  }
 0x694   : > { %5262 = vmatpush3.bf16.msra.mxu0 %v7956_v12  ;;  %v7967_v27 = vpack.c.bf16 %v2474_v1, %v2473_v44  ;;  %v2457_v61 = vadd.f32 %v7829_v51, %v2417_v20  ;;  %v2458_v7 = vadd.f32 %v7829_v51, %v2418_v6  ;;  %v5971_v51 = vld [vmem:[#allocation10 + $0x110] sm:$0xff]   ;;  %v6072_v5 = vld [vmem:[%s6786_s4 + $0x84] ss:$8 sps:$4 sm:$0xff]   ;;  %v6073_v15 = vld [vmem:[%s6786_s4 + $0x80] ss:$8 sps:$4 sm:$0xff]  }
 0x695   : > { %5263 = vmatprep.subr.bf16.mxu0 %v7940_v45  ;;  %v7978_v48 = vpack.c.bf16 %v2456_v63, %v2455_v17  ;;  %5370 = vmatpush3.bf16.msra.mxu1 %v5971_v51  ;;  %v6076_v4 = vld [vmem:[%s6786_s4 + $0xa4] ss:$8 sps:$4 sm:$0xff]   ;;  %v6077_v25 = vld [vmem:[%s6786_s4 + $0xa0] ss:$8 sps:$4 sm:$0xff]   ;;  %v6078_v11 = vld [vmem:[%s6786_s4 + $0xb4] ss:$8 sps:$4 sm:$0xff]  }
 0x696   : > { %v7984_v43 = vpack.c.bf16 %v2458_v7, %v2457_v61  ;;  %5371 = vmatprep.subr.bf16.mxu1 %v5972_v42  ;;  %v5978_v60 = vld [vmem:[#allocation10 + $0x170] sm:$0xff]   ;;  %v6080_v57 = vld [vmem:[%s6786_s4 + $0xc4] ss:$8 sps:$4 sm:$0xff]   ;;  %v5980_v9 = vld [vmem:[#allocation10 + $0x178] sm:$0xff]  }
 0x697   : > { %v5979_v0 = vld [vmem:[#allocation10 + $0x130] sm:$0xff]   ;;  %v5981_v56 = vld [vmem:[#allocation10 + $0x138] sm:$0xff]   ;;  %v6081_v44 = vld [vmem:[%s6786_s4 + $0xc0] ss:$8 sps:$4 sm:$0xff]  }
 0x698   : > { %5264 = vmatpush3.bf16.msra.mxu0 %v7970_v24  ;;  %v6079_v54 = vld [vmem:[%s6786_s4 + $0xb0] ss:$8 sps:$4 sm:$0xff]   ;;  %v6082_v1 = vld [vmem:[%s6786_s4 + $0xd4] ss:$8 sps:$4 sm:$0xff]   ;;  %v6084_v63 = vld [vmem:[%s6786_s4 + $0xe4] ss:$8 sps:$4 sm:$0xff]  }
 0x699   : > { %5265 = vmatprep.subr.bf16.mxu0 %v7960_v35  ;;  %5372 = vmatpush3.bf16.msra.mxu1 %v5973_v37  ;;  %v6083_v17 = vld [vmem:[%s6786_s4 + $0xd0] ss:$8 sps:$4 sm:$0xff]   ;;  %v6085_v20 = vld [vmem:[%s6786_s4 + $0xe0] ss:$8 sps:$4 sm:$0xff]   ;;  %v6086_v6 = vld [vmem:[%s6786_s4 + $0xf4] ss:$8 sps:$4 sm:$0xff]  }
 0x69a   : > { %5373 = vmatprep.subr.bf16.mxu1 %v5974_v19  ;;  %v6087_v61 = vld [vmem:[%s6786_s4 + $0xf0] ss:$8 sps:$4 sm:$0xff]   ;;  %v6088_v7 = vld [vmem:[%s6786_s4 + $0x4] ss:$8 sps:$4 sm:$0xff]  }
 0x69c   : > { %5266 = vmatpush3.bf16.msra.mxu0 %v7978_v48 }
 0x69d   : > { %5267 = vmatprep.subr.bf16.mxu0 %v7967_v27  ;;  %5374 = vmatpush3.bf16.msra.mxu1 %v5975_v32 }
 0x69e   : > { %5375 = vmatprep.subr.bf16.mxu1 %v5976_v49 }
 0x6a0   : > { %5268 = vmatpush3.bf16.msra.mxu0 %v7984_v43 }
 0x6a1   : > { %5376 = vmatpush3.bf16.msra.mxu1 %v5977_v10 }
 0x6a2   : > { %5377 = vmatprep.subr.bf16.mxu1 %v5978_v60 }
 0x6a3   : > { %2524 = vmatmul.mubr.bf16.vlgmr.msra.gmra.mrb[128].mxu0 %v6057_v13 }
 0x6a4   : > { %2531 = vmatprep.mubr.bf16.mxu0 %v6058_v30 }
 0x6a5   : > { %5378 = vmatpush3.bf16.msra.mxu1 %v5979_v0 }
 0x6a6   : > { %5379 = vmatprep.subr.bf16.mxu1 %v5980_v9 }
 0x6a9   : > { %5380 = vmatpush3.bf16.msra.mxu1 %v5981_v56 }
 0x6ab   : > { %2532 = vmatmul.mubr.bf16.gmra.mrb[132].mxu0 %v6059_v3 }
 0x6ac   : > { %2539 = vmatprep.mubr.bf16.mxu0 %v6060_v50 }
 0x6b3   : > { %2540 = vmatmul.mubr.bf16.gmra.mrb[136].mxu0 %v6061_v33 }
 0x6b4   : > { %2547 = vmatprep.mubr.bf16.mxu0 %v6062_v2 }
 0x6bb   : > { %2548 = vmatmul.mubr.bf16.gmra.mrb[140].mxu0 %v6063_v53 }
 0x6bc   : > { %2555 = vmatprep.mubr.bf16.mxu0 %v6064_v14 }
 0x6c3   : > { %2556 = vmatmul.mubr.bf16.gmra.mrb[144].mxu0 %v6065_v36 }
 0x6c4   : > { %2563 = vmatprep.mubr.bf16.mxu0 %v6066_v55 }
 0x6cb   : > { %2564 = vmatmul.mubr.bf16.gmra.mrb[148].mxu0 %v6067_v41 }
 0x6cc   : > { %2571 = vmatprep.mubr.bf16.mxu0 %v6068_v28 }
 0x6d3   : > { %2572 = vmatmul.mubr.bf16.gmra.mrb[152].mxu0 %v6069_v18 }
 0x6d4   : > { %2579 = vmatprep.mubr.bf16.mxu0 %v6070_v46 }
 0x6db   : > { %2580 = vmatmul.mubr.bf16.gmra.mrb[156].mxu0 %v6071_v58 }
 0x6dc   : > { %2587 = vmatprep.mubr.bf16.mxu0 %v6072_v5 }
 0x6e3   : > { %2588 = vmatmul.mubr.bf16.gmra.mrb[160].mxu0 %v6073_v15 }
 0x6e4   : > { %2595 = vmatprep.mubr.bf16.mxu0 %v6074_v52 }
 0x6eb   : > { %2596 = vmatmul.mubr.bf16.gmra.mrb[164].mxu0 %v6075_v16 }
 0x6ec   : > { %2603 = vmatprep.mubr.bf16.mxu0 %v6076_v4 }
 0x6f3   : > { %2604 = vmatmul.mubr.bf16.gmra.mrb[168].mxu0 %v6077_v25 }
 0x6f4   : > { %2611 = vmatprep.mubr.bf16.mxu0 %v6078_v11 }
 0x6fb   : > { %2612 = vmatmul.mubr.bf16.gmra.mrb[172].mxu0 %v6079_v54 }
 0x6fc   : > { %2619 = vmatprep.mubr.bf16.mxu0 %v6080_v57 }
 0x703   : > { %2620 = vmatmul.mubr.bf16.gmra.mrb[176].mxu0 %v6081_v44 }
 0x704   : > { %2627 = vmatprep.mubr.bf16.mxu0 %v6082_v1 }
 0x70b   : > { %2628 = vmatmul.mubr.bf16.gmra.mrb[180].mxu0 %v6083_v17 }
 0x70c   : > { %2635 = vmatprep.mubr.bf16.mxu0 %v6084_v63 }
 0x713   : > { %2636 = vmatmul.mubr.bf16.gmra.mrb[184].mxu0 %v6085_v20 }
 0x714   : > { %2643 = vmatprep.mubr.bf16.mxu0 %v6086_v6 }
 0x71b   : > { %2644 = vmatmul.mubr.bf16.gmra.mrb[188].mxu0 %v6087_v61 }
 0x71c   : > { %3366 = vmatprep.mubr.bf16.mxu0 %v6088_v7 }
 0x776   : > { %v5269_v26 = vpop.f32.mrb[128].mxu0 }
 0x777   : > { %v5270_v21 = vpop.f32.mrb[129].mxu0 }
 0x778   : > { %v5271_v31 = vadd.f32 %v5270_v21, %v5269_v26  ;;  %v5272_v23 = vpop.f32.mrb[130].mxu0 }
 0x779   : > { %v5273_v47 = vpop.f32.mrb[131].mxu0 }
 0x77a   : > { %v5274_v51 = vadd.f32 %v5273_v47, %v5272_v23 }
 0x77c   : > { %v2652_v13 = vpack.c.bf16 %v5274_v51, %v5271_v31 }
 0x77e   : > { %v5275_v42 = vpop.f32.mrb[132].mxu0  ;;  %2837 = vmatprep.mubr.bf16.mxu1 %v2652_v13 }
 0x77f   : > { %v5276_v30 = vpop.f32.mrb[133].mxu0  ;;  %2838 = vmatmul.mubr.bf16.vlgmr.msra.gmra.mrb[128].mxu1 %v7853_v29 }
 0x780   : > { %v5277_v37 = vadd.f32 %v5276_v30, %v5275_v42  ;;  %v5278_v19 = vpop.f32.mrb[134].mxu0 }
 0x781   : > { %v5279_v32 = vpop.f32.mrb[135].mxu0 }
 0x782   : > { %v5280_v3 = vadd.f32 %v5279_v32, %v5278_v19 }
 0x784   : > { %v2653_v49 = vpack.c.bf16 %v5280_v3, %v5277_v37 }
 0x786   : > { %v5281_v50 = vpop.f32.mrb[136].mxu0  ;;  %2845 = vmatprep.mubr.bf16.mxu1 %v2653_v49 }
 0x787   : > { %v5282_v10 = vpop.f32.mrb[137].mxu0  ;;  %2846 = vmatmul.mubr.bf16.gmra.mrb[132].mxu1 %v7876_v39 }
 0x788   : > { %v5283_v33 = vadd.f32 %v5282_v10, %v5281_v50  ;;  %v5284_v2 = vpop.f32.mrb[138].mxu0 }
 0x789   : > { %v5285_v53 = vpop.f32.mrb[139].mxu0 }
 0x78a   : > { %v5286_v14 = vadd.f32 %v5285_v53, %v5284_v2 }
 0x78c   : > { %v2654_v36 = vpack.c.bf16 %v5286_v14, %v5283_v33 }
 0x78e   : > { %v5287_v55 = vpop.f32.mrb[140].mxu0  ;;  %2853 = vmatprep.mubr.bf16.mxu1 %v2654_v36 }
 0x78f   : > { %v5288_v41 = vpop.f32.mrb[141].mxu0  ;;  %2854 = vmatmul.mubr.bf16.gmra.mrb[136].mxu1 %v7912_v8 }
 0x790   : > { %v5289_v29 = vadd.f32 %v5288_v41, %v5287_v55  ;;  %v5290_v28 = vpop.f32.mrb[142].mxu0 }
 0x791   : > { %v5291_v18 = vpop.f32.mrb[143].mxu0 }
 0x792   : > { %v5292_v46 = vadd.f32 %v5291_v18, %v5290_v28 }
 0x794   : > { %v2655_v58 = vpack.c.bf16 %v5292_v46, %v5289_v29 }
 0x796   : > { %v5293_v5 = vpop.f32.mrb[144].mxu0  ;;  %2861 = vmatprep.mubr.bf16.mxu1 %v2655_v58 }
 0x797   : > { %v5294_v15 = vpop.f32.mrb[145].mxu0  ;;  %2862 = vmatmul.mubr.bf16.gmra.mrb[140].mxu1 %v7938_v40 }
 0x798   : > { %v5295_v39 = vadd.f32 %v5294_v15, %v5293_v5  ;;  %v5296_v52 = vpop.f32.mrb[146].mxu0 }
 0x799   : > { %v5297_v16 = vpop.f32.mrb[147].mxu0 }
 0x79a   : > { %v5298_v4 = vadd.f32 %v5297_v16, %v5296_v52 }
 0x79c   : > { %v2656_v25 = vpack.c.bf16 %v5298_v4, %v5295_v39 }
 0x79e   : > { %v5299_v11 = vpop.f32.mrb[148].mxu0  ;;  %2869 = vmatprep.mubr.bf16.mxu1 %v2656_v25 }
 0x79f   : > { %v5300_v60 = vpop.f32.mrb[149].mxu0  ;;  %2870 = vmatmul.mubr.bf16.gmra.mrb[144].mxu1 %v7956_v12 }
 0x7a0   : > { %v5301_v8 = vadd.f32 %v5300_v60, %v5299_v11  ;;  %v5302_v0 = vpop.f32.mrb[150].mxu0 }
 0x7a1   : > { %v5303_v54 = vpop.f32.mrb[151].mxu0 }
 0x7a2   : > { %v5304_v57 = vadd.f32 %v5303_v54, %v5302_v0 }
 0x7a4   : > { %v2657_v9 = vpack.c.bf16 %v5304_v57, %v5301_v8 }
 0x7a6   : > { %v5305_v56 = vpop.f32.mrb[152].mxu0  ;;  %2877 = vmatprep.mubr.bf16.mxu1 %v2657_v9 }
 0x7a7   : > { %v5306_v44 = vpop.f32.mrb[153].mxu0  ;;  %2878 = vmatmul.mubr.bf16.gmra.mrb[148].mxu1 %v7970_v24 }
 0x7a8   : > { %v5307_v40 = vadd.f32 %v5306_v44, %v5305_v56  ;;  %v5308_v1 = vpop.f32.mrb[154].mxu0 }
 0x7a9   : > { %v5309_v17 = vpop.f32.mrb[155].mxu0 }
 0x7aa   : > { %v5310_v63 = vadd.f32 %v5309_v17, %v5308_v1 }
 0x7ac   : > { %v2658_v20 = vpack.c.bf16 %v5310_v63, %v5307_v40 }
 0x7ae   : > { %v5311_v6 = vpop.f32.mrb[156].mxu0  ;;  %2885 = vmatprep.mubr.bf16.mxu1 %v2658_v20 }
 0x7af   : > { %v5312_v61 = vpop.f32.mrb[157].mxu0  ;;  %2886 = vmatmul.mubr.bf16.gmra.mrb[152].mxu1 %v7978_v48 }
 0x7b0   : > { %v5313_v12 = vadd.f32 %v5312_v61, %v5311_v6  ;;  %v5314_v7 = vpop.f32.mrb[158].mxu0 }
 0x7b1   : > { %v5315_v26 = vpop.f32.mrb[159].mxu0 }
 0x7b2   : > { %v5316_v21 = vadd.f32 %v5315_v26, %v5314_v7 }
 0x7b4   : > { %v2659_v31 = vpack.c.bf16 %v5316_v21, %v5313_v12 }
 0x7b6   : > { %v5317_v23 = vpop.f32.mrb[160].mxu0  ;;  %2893 = vmatprep.mubr.bf16.mxu1 %v2659_v31 }
 0x7b7   : > { %v5318_v47 = vpop.f32.mrb[161].mxu0  ;;  %2894 = vmatmul.mubr.bf16.gmra.mrb[156].mxu1 %v7984_v43 }
 0x7b8   : > { %v5319_v24 = vadd.f32 %v5318_v47, %v5317_v23  ;;  %v5320_v51 = vpop.f32.mrb[162].mxu0 }
 0x7b9   : > { %v5321_v13 = vpop.f32.mrb[163].mxu0 }
 0x7ba   : > { %v5322_v42 = vadd.f32 %v5321_v13, %v5320_v51 }
 0x7bc   : > { %v2660_v30 = vpack.c.bf16 %v5322_v42, %v5319_v24 }
 0x7be   : > { %v5323_v37 = vpop.f32.mrb[164].mxu0  ;;  %2901 = vmatprep.mubr.bf16.mxu1 %v2660_v30 }
 0x7bf   : > { %v5324_v19 = vpop.f32.mrb[165].mxu0  ;;  %2902 = vmatmul.mubr.bf16.gmra.mrb[160].mxu1 %v7859_v62 }
 0x7c0   : > { %v5325_v48 = vadd.f32 %v5324_v19, %v5323_v37  ;;  %v5326_v32 = vpop.f32.mrb[166].mxu0 }
 0x7c1   : > { %v5327_v3 = vpop.f32.mrb[167].mxu0 }
 0x7c2   : > { %v5328_v49 = vadd.f32 %v5327_v3, %v5326_v32 }
 0x7c4   : > { %v2661_v50 = vpack.c.bf16 %v5328_v49, %v5325_v48 }
 0x7c6   : > { %v5329_v10 = vpop.f32.mrb[168].mxu0  ;;  %2909 = vmatprep.mubr.bf16.mxu1 %v2661_v50 }
 0x7c7   : > { %v5330_v33 = vpop.f32.mrb[169].mxu0  ;;  %2910 = vmatmul.mubr.bf16.gmra.mrb[164].mxu1 %v7864_v22 }
 0x7c8   : > { %v5331_v43 = vadd.f32 %v5330_v33, %v5329_v10  ;;  %v5332_v2 = vpop.f32.mrb[170].mxu0  ;;  %v8043_v33 = vstv %s4748_s0  ;;  %s9210_s0 = sld [smem:[#allocation32_spill]] }
 0x7c9   : > { %v5333_v53 = vpop.f32.mrb[171].mxu0 }
 0x7ca   : > { %v5334_v14 = vadd.f32 %v5333_v53, %v5332_v2 }
 0x7cc   : > { %v2662_v36 = vpack.c.bf16 %v5334_v14, %v5331_v43 }
 0x7ce   : > { %v5335_v55 = vpop.f32.mrb[172].mxu0  ;;  %2917 = vmatprep.mubr.bf16.mxu1 %v2662_v36 }
 0x7cf   : > { %v5336_v41 = vpop.f32.mrb[173].mxu0  ;;  %2918 = vmatmul.mubr.bf16.gmra.mrb[168].mxu1 %v7891_v38 }
 0x7d0   : > { %v5337_v62 = vadd.f32 %v5336_v41, %v5335_v55  ;;  %v5338_v29 = vpop.f32.mrb[174].mxu0 }
 0x7d1   : > { %v5339_v28 = vpop.f32.mrb[175].mxu0 }
 0x7d2   : > { %v5340_v18 = vadd.f32 %v5339_v28, %v5338_v29 }
 0x7d4   : > { %v2663_v46 = vpack.c.bf16 %v5340_v18, %v5337_v62 }
 0x7d6   : > { %v5341_v58 = vpop.f32.mrb[176].mxu0  ;;  %2925 = vmatprep.mubr.bf16.mxu1 %v2663_v46 }
 0x7d7   : > { %v5342_v5 = vpop.f32.mrb[177].mxu0  ;;  %2926 = vmatmul.mubr.bf16.gmra.mrb[172].mxu1 %v7902_v59 }
 0x7d8   : > { %v5343_v22 = vadd.f32 %v5342_v5, %v5341_v58  ;;  %v5344_v15 = vpop.f32.mrb[178].mxu0 }
 0x7d9   : > { %v5345_v39 = vpop.f32.mrb[179].mxu0 }
 0x7da   : > { %v5346_v52 = vadd.f32 %v5345_v39, %v5344_v15 }
 0x7dc   : > { %v2664_v16 = vpack.c.bf16 %v5346_v52, %v5343_v22 }
 0x7de   : > { %v5347_v4 = vpop.f32.mrb[180].mxu0  ;;  %2933 = vmatprep.mubr.bf16.mxu1 %v2664_v16 }
 0x7df   : > { %v5348_v25 = vpop.f32.mrb[181].mxu0  ;;  %2934 = vmatmul.mubr.bf16.gmra.mrb[176].mxu1 %v7922_v34 }
 0x7e0   : > { %v5349_v38 = vadd.f32 %v5348_v25, %v5347_v4  ;;  %v5350_v11 = vpop.f32.mrb[182].mxu0 }
 0x7e1   : > { %v5351_v60 = vpop.f32.mrb[183].mxu0 }
 0x7e2   : > { %v5352_v8 = vadd.f32 %v5351_v60, %v5350_v11 }
 0x7e4   : > { %v2665_v0 = vpack.c.bf16 %v5352_v8, %v5349_v38 }
 0x7e6   : > { %v5353_v54 = vpop.f32.mrb[184].mxu0  ;;  %2941 = vmatprep.mubr.bf16.mxu1 %v2665_v0 }
 0x7e7   : > { %v5354_v57 = vpop.f32.mrb[185].mxu0  ;;  %2942 = vmatmul.mubr.bf16.gmra.mrb[180].mxu1 %v7940_v45 }
 0x7e8   : > { %v5355_v59 = vadd.f32 %v5354_v57, %v5353_v54  ;;  %v5356_v9 = vpop.f32.mrb[186].mxu0 }
 0x7e9   : > { %v5357_v56 = vpop.f32.mrb[187].mxu0 }
 0x7ea   : > { %v5358_v44 = vadd.f32 %v5357_v56, %v5356_v9 }
 0x7ec   : > { %v2666_v40 = vpack.c.bf16 %v5358_v44, %v5355_v59 }
 0x7ee   : > { %v5359_v1 = vpop.f32.mrb[188].mxu0  ;;  %2949 = vmatprep.mubr.bf16.mxu1 %v2666_v40 }
 0x7ef   : > { %v5360_v17 = vpop.f32.mrb[189].mxu0  ;;  %2950 = vmatmul.mubr.bf16.gmra.mrb[184].mxu1 %v7960_v35 }
 0x7f0   : > { %v5361_v34 = vadd.f32 %v5360_v17, %v5359_v1  ;;  %v5362_v63 = vpop.f32.mrb[190].mxu0 }
 0x7f1   : > { %v5363_v20 = vpop.f32.mrb[191].mxu0 }
 0x7f2   : > { %v5364_v6 = vadd.f32 %v5363_v20, %v5362_v63 }
 0x7f4   : > { %v2667_v61 = vpack.c.bf16 %v5364_v6, %v5361_v34 }
 0x7f6   : > { %2957 = vmatprep.mubr.bf16.mxu1 %v2667_v61 }
 0x7f7   : > { %2958 = vmatmul.mubr.bf16.gmra.mrb[188].mxu1 %v7967_v27  ;;  %v8038_v27 = vld [vmem:[%s9129_s5 + $0x2] ss:$0 sm:$0xff] }
 0x852   : > { %v5381_v12 = vpop.f32.mrb[128].mxu1 }
 0x853   : > { %v5382_v45 = vpop.f32.mrb[129].mxu1 }
 0x854   : > { %v5383_v7 = vadd.f32 %v5382_v45, %v5381_v12  ;;  %v5384_v26 = vpop.f32.mrb[130].mxu1 }
 0x855   : > { %v5385_v21 = vpop.f32.mrb[131].mxu1 }
 0x856   : > { %v5386_v31 = vadd.f32 %v5385_v21, %v5384_v26  ;;  %v2840_v49 = vadd.f32 %v5383_v7, %v8038_v27 }
 0x858   : > { %v2843_v3 = vadd.f32 %v5386_v31, %v8038_v27  ;;  %v3000_v55 = vmul.f32 %v8043_v33, %v2840_v49  ;;  %vm2967_vm1 = vcmp.ge.f32.partialorder %v2840_v49, 0.0 }
 0x85a   : > { %v5387_v23 = vpop.f32.mrb[132].mxu1  ;;  %v3001_v2 = vmul.f32 %v8043_v33, %v2843_v3  ;;  %vm2968_vm0 = vcmp.ge.f32.partialorder %v2843_v3, 0.0  ;;  %v8052_v46 = vsel %vm2967_vm1, %v2840_v49, %v3000_v55 }
 0x85b   : > { %v5388_v47 = vpop.f32.mrb[133].mxu1 }
 0x85c   : > { %v5389_v24 = vadd.f32 %v5388_v47, %v5387_v23  ;;  %v5390_v51 = vpop.f32.mrb[134].mxu1  ;;  %v8049_v28 = vsel %vm2968_vm0, %v2843_v3, %v3001_v2 }
 0x85d   : > { %v5391_v13 = vpop.f32.mrb[135].mxu1  ;;  %v3064_v15 = vadd.f32 %v8049_v28, %v8052_v46 }
 0x85e   : > { %v5392_v35 = vadd.f32 %v5391_v13, %v5390_v51  ;;  %v2848_v50 = vadd.f32 %v5389_v24, %v8038_v27 }
 0x860   : > { %v3002_v41 = vmul.f32 %v8043_v33, %v2848_v50  ;;  %v2851_v62 = vadd.f32 %v5392_v35, %v8038_v27  ;;  %vm2969_vm2 = vcmp.ge.f32.partialorder %v2848_v50, 0.0 }
 0x862   : > { %v5393_v42 = vpop.f32.mrb[136].mxu1  ;;  %v8054_v58 = vsel %vm2969_vm2, %v2848_v50, %v3002_v41  ;;  %v3003_v5 = vmul.f32 %v8043_v33, %v2851_v62  ;;  %vm2970_vm3 = vcmp.ge.f32.partialorder %v2851_v62, 0.0 }
 0x863   : > { %v5394_v30 = vpop.f32.mrb[137].mxu1  ;;  %v3065_v38 = vadd.f32 %v3064_v15, %v8054_v58 }
 0x864   : > { %v5395_v37 = vadd.f32 %v5394_v30, %v5393_v42  ;;  %v5396_v19 = vpop.f32.mrb[138].mxu1  ;;  %v8062_v60 = vsel %vm2970_vm3, %v2851_v62, %v3003_v5 }
 0x865   : > { %v5397_v48 = vpop.f32.mrb[139].mxu1  ;;  %v3066_v59 = vadd.f32 %v3065_v38, %v8062_v60 }
 0x866   : > { %v5398_v32 = vadd.f32 %v5397_v48, %v5396_v19  ;;  %v2856_v18 = vadd.f32 %v5395_v37, %v8038_v27 }
 0x868   : > { %v3004_v52 = vmul.f32 %v8043_v33, %v2856_v18  ;;  %v2859_v16 = vadd.f32 %v5398_v32, %v8038_v27  ;;  %vm2971_vm4 = vcmp.ge.f32.partialorder %v2856_v18, 0.0 }
 0x86a   : > { %v5399_v10 = vpop.f32.mrb[140].mxu1  ;;  %v8065_v54 = vsel %vm2971_vm4, %v2856_v18, %v3004_v52  ;;  %v3005_v57 = vmul.f32 %v8043_v33, %v2859_v16  ;;  %vm2972_vm5 = vcmp.ge.f32.partialorder %v2859_v16, 0.0 }
 0x86b   : > { %v5400_v43 = vpop.f32.mrb[141].mxu1  ;;  %v3067_v40 = vadd.f32 %v3066_v59, %v8065_v54 }
 0x86c   : > { %v5401_v53 = vadd.f32 %v5400_v43, %v5399_v10  ;;  %v5402_v14 = vpop.f32.mrb[142].mxu1  ;;  %v8072_v17 = vsel %vm2972_vm5, %v2859_v16, %v3005_v57 }
 0x86d   : > { %v5403_v36 = vpop.f32.mrb[143].mxu1  ;;  %v3068_v7 = vadd.f32 %v3067_v40, %v8072_v17 }
 0x86e   : > { %v5404_v29 = vadd.f32 %v5403_v36, %v5402_v14  ;;  %v2864_v8 = vadd.f32 %v5401_v53, %v8038_v27 }
 0x870   : > { %v3006_v9 = vmul.f32 %v8043_v33, %v2864_v8  ;;  %v2867_v56 = vadd.f32 %v5404_v29, %v8038_v27  ;;  %vm2973_vm6 = vcmp.ge.f32.partialorder %v2864_v8, 0.0 }
 0x872   : > { %v5405_v22 = vpop.f32.mrb[144].mxu1  ;;  %v8075_v61 = vsel %vm2973_vm6, %v2864_v8, %v3006_v9  ;;  %v3007_v12 = vmul.f32 %v8043_v33, %v2867_v56  ;;  %vm2974_vm7 = vcmp.ge.f32.partialorder %v2867_v56, 0.0 }
 0x873   : > { %v5406_v39 = vpop.f32.mrb[145].mxu1  ;;  %v3069_v31 = vadd.f32 %v3068_v7, %v8075_v61 }
 0x874   : > { %v5407_v4 = vadd.f32 %v5406_v39, %v5405_v22  ;;  %v5408_v25 = vpop.f32.mrb[146].mxu1  ;;  %v8082_v23 = vsel %vm2974_vm7, %v2867_v56, %v3007_v12 }
 0x875   : > { %v5409_v11 = vpop.f32.mrb[147].mxu1  ;;  %v3070_v37 = vadd.f32 %v3069_v31, %v8082_v23 }
 0x876   : > { %v5410_v0 = vadd.f32 %v5409_v11, %v5408_v25  ;;  %v2872_v34 = vadd.f32 %v5407_v4, %v8038_v27 }
 0x878   : > { %v3008_v26 = vmul.f32 %v8043_v33, %v2872_v34  ;;  %v2875_v21 = vadd.f32 %v5410_v0, %v8038_v27  ;;  %vm2975_vm8 = vcmp.ge.f32.partialorder %v2872_v34, 0.0 }
 0x87a   : > { %v5411_v44 = vpop.f32.mrb[148].mxu1  ;;  %v8085_v13 = vsel %vm2975_vm8, %v2872_v34, %v3008_v26  ;;  %v3009_v35 = vmul.f32 %v8043_v33, %v2875_v21  ;;  %vm2976_vm9 = vcmp.ge.f32.partialorder %v2875_v21, 0.0 }
 0x87b   : > { %v5412_v1 = vpop.f32.mrb[149].mxu1  ;;  %v3071_v49 = vadd.f32 %v3070_v37, %v8085_v13 }
 0x87c   : > { %v5413_v63 = vadd.f32 %v5412_v1, %v5411_v44  ;;  %v5414_v20 = vpop.f32.mrb[150].mxu1  ;;  %v8092_v50 = vsel %vm2976_vm9, %v2875_v21, %v3009_v35 }
 0x87d   : > { %v5415_v6 = vpop.f32.mrb[151].mxu1  ;;  %v3072_v14 = vadd.f32 %v3071_v49, %v8092_v50 }
 0x87e   : > { %v5416_v45 = vadd.f32 %v5415_v6, %v5414_v20  ;;  %v2880_v47 = vadd.f32 %v5413_v63, %v8038_v27 }
 0x880   : > { %v3010_v48 = vmul.f32 %v8043_v33, %v2880_v47  ;;  %v2883_v32 = vadd.f32 %v5416_v45, %v8038_v27  ;;  %vm2977_vm10 = vcmp.ge.f32.partialorder %v2880_v47, 0.0 }
 0x882   : > { %v5417_v24 = vpop.f32.mrb[152].mxu1  ;;  %v8095_v43 = vsel %vm2977_vm10, %v2880_v47, %v3010_v48  ;;  %v3011_v2 = vmul.f32 %v8043_v33, %v2883_v32  ;;  %vm2978_vm11 = vcmp.ge.f32.partialorder %v2883_v32, 0.0 }
 0x883   : > { %v5418_v51 = vpop.f32.mrb[153].mxu1  ;;  %v3073_v18 = vadd.f32 %v3072_v14, %v8095_v43 }
 0x884   : > { %v5419_v42 = vadd.f32 %v5418_v51, %v5417_v24  ;;  %v5420_v30 = vpop.f32.mrb[154].mxu1  ;;  %v8102_v22 = vsel %vm2978_vm11, %v2883_v32, %v3011_v2 }
 0x885   : > { %v5421_v19 = vpop.f32.mrb[155].mxu1  ;;  %v3074_v4 = vadd.f32 %v3073_v18, %v8102_v22 }
 0x886   : > { %v5422_v3 = vadd.f32 %v5421_v19, %v5420_v30  ;;  %v2888_v10 = vadd.f32 %v5419_v42, %v8038_v27 }
 0x888   : > { %v3012_v55 = vmul.f32 %v8043_v33, %v2888_v10  ;;  %v2891_v41 = vadd.f32 %v5422_v3, %v8038_v27  ;;  %vm2979_vm12 = vcmp.ge.f32.partialorder %v2888_v10, 0.0 }
 0x88a   : > { %v5423_v53 = vpop.f32.mrb[156].mxu1  ;;  %v8105_v52 = vsel %vm2979_vm12, %v2888_v10, %v3012_v55  ;;  %v3013_v16 = vmul.f32 %v8043_v33, %v2891_v41  ;;  %vm2980_vm13 = vcmp.ge.f32.partialorder %v2891_v41, 0.0 }
 0x88b   : > { %v5424_v36 = vpop.f32.mrb[157].mxu1  ;;  %v3075_v8 = vadd.f32 %v3074_v4, %v8105_v52 }
 0x88c   : > { %v5425_v62 = vadd.f32 %v5424_v36, %v5423_v53  ;;  %v5426_v29 = vpop.f32.mrb[158].mxu1  ;;  %v8112_v57 = vsel %vm2980_vm13, %v2891_v41, %v3013_v16 }
 0x88d   : > { %v5427_v5 = vpop.f32.mrb[159].mxu1  ;;  %v3076_v63 = vadd.f32 %v3075_v8, %v8112_v57 }
 0x88e   : > { %v2896_v15 = vadd.f32 %v5425_v62, %v8038_v27  ;;  %v5428_v39 = vadd.f32 %v5427_v5, %v5426_v29 }
 0x890   : > { %v3014_v25 = vmul.f32 %v8043_v33, %v2896_v15  ;;  %v2899_v38 = vadd.f32 %v5428_v39, %v8038_v27  ;;  %vm2981_vm14 = vcmp.ge.f32.partialorder %v2896_v15, 0.0 }
 0x892   : > { %v5429_v11 = vpop.f32.mrb[160].mxu1  ;;  %v8114_v44 = vsel %vm2981_vm14, %v2896_v15, %v3014_v25  ;;  %v3015_v40 = vmul.f32 %v8043_v33, %v2899_v38  ;;  %vm2982_vm15 = vcmp.ge.f32.partialorder %v2899_v38, 0.0 }
 0x893   : > { %v5430_v0 = vpop.f32.mrb[161].mxu1  ;;  %v3077_v12 = vadd.f32 %v3076_v63, %v8114_v44 }
 0x894   : > { %v5431_v59 = vadd.f32 %v5430_v0, %v5429_v11  ;;  %v5432_v9 = vpop.f32.mrb[162].mxu1  ;;  %v8122_v45 = vsel %vm2982_vm15, %v2899_v38, %v3015_v40 }
 0x895   : > { %v5433_v56 = vpop.f32.mrb[163].mxu1  ;;  %v3078_v51 = vadd.f32 %v3077_v12, %v8122_v45 }
 0x896   : > { %v2904_v1 = vadd.f32 %v5431_v59, %v8038_v27  ;;  %v5434_v34 = vadd.f32 %v5433_v56, %v5432_v9 }
 0x898   : > { %v3016_v20 = vmul.f32 %v8043_v33, %v2904_v1  ;;  %v2907_v6 = vadd.f32 %v5434_v34, %v8038_v27  ;;  %vm2983_vm0 = vcmp.ge.f32.partialorder %v2904_v1, 0.0 }
 0x89a   : > { %v5435_v7 = vpop.f32.mrb[164].mxu1  ;;  %v8124_v21 = vsel %vm2983_vm0, %v2904_v1, %v3016_v20  ;;  %v3017_v31 = vmul.f32 %v8043_v33, %v2907_v6  ;;  %vm2984_vm1 = vcmp.ge.f32.partialorder %v2907_v6, 0.0 }
 0x89b   : > { %v5436_v26 = vpop.f32.mrb[165].mxu1  ;;  %v3079_v37 = vadd.f32 %v3078_v51, %v8124_v21 }
 0x89c   : > { %v5437_v47 = vadd.f32 %v5436_v26, %v5435_v7  ;;  %v5438_v24 = vpop.f32.mrb[166].mxu1  ;;  %v8130_v19 = vsel %vm2984_vm1, %v2907_v6, %v3017_v31 }
 0x89d   : > { %v5439_v35 = vpop.f32.mrb[167].mxu1  ;;  %v3080_v2 = vadd.f32 %v3079_v37, %v8130_v19 }
 0x89e   : > { %v2912_v42 = vadd.f32 %v5437_v47, %v8038_v27  ;;  %v5440_v30 = vadd.f32 %v5439_v35, %v5438_v24 }
 0x8a0   : > { %vm2985_vm2 = vcmp.ge.f32.partialorder %v2912_v42, 0.0  ;;  %v3018_v48 = vmul.f32 %v8043_v33, %v2912_v42  ;;  %v2915_v32 = vadd.f32 %v5440_v30, %v8038_v27 }
 0x8a2   : > { %v8134_v3 = vsel %vm2985_vm2, %v2912_v42, %v3018_v48  ;;  %v3019_v49 = vmul.f32 %v8043_v33, %v2915_v32  ;;  %v5441_v10 = vpop.f32.mrb[168].mxu1  ;;  %vm2986_vm3 = vcmp.ge.f32.partialorder %v2915_v32, 0.0 }
 0x8a3   : > { %v5442_v53 = vpop.f32.mrb[169].mxu1  ;;  %v3081_v55 = vadd.f32 %v3080_v2, %v8134_v3 }
 0x8a4   : > { %v5443_v14 = vadd.f32 %v5442_v53, %v5441_v10  ;;  %v5444_v36 = vpop.f32.mrb[170].mxu1  ;;  %v8139_v62 = vsel %vm2986_vm3, %v2915_v32, %v3019_v49 }
 0x8a5   : > { %v5445_v41 = vpop.f32.mrb[171].mxu1  ;;  %v3082_v39 = vadd.f32 %v3081_v55, %v8139_v62 }
 0x8a6   : > { %v2920_v29 = vadd.f32 %v5443_v14, %v8038_v27  ;;  %v5446_v18 = vadd.f32 %v5445_v41, %v5444_v36 }
 0x8a8   : > { %vm2987_vm4 = vcmp.ge.f32.partialorder %v2920_v29, 0.0  ;;  %v3020_v5 = vmul.f32 %v8043_v33, %v2920_v29  ;;  %v2923_v15 = vadd.f32 %v5446_v18, %v8038_v27 }
 0x8aa   : > { %v8145_v16 = vsel %vm2987_vm4, %v2920_v29, %v3020_v5  ;;  %vm2988_vm5 = vcmp.ge.f32.partialorder %v2923_v15, 0.0  ;;  %v3021_v4 = vmul.f32 %v8043_v33, %v2923_v15  ;;  %v5447_v25 = vpop.f32.mrb[172].mxu1 }
 0x8ab   : > { %v3083_v38 = vadd.f32 %v3082_v39, %v8145_v16  ;;  %v5448_v11 = vpop.f32.mrb[173].mxu1 }
 0x8ac   : > { %v8149_v8 = vsel %vm2988_vm5, %v2923_v15, %v3021_v4  ;;  %v5449_v0 = vadd.f32 %v5448_v11, %v5447_v25  ;;  %v5450_v59 = vpop.f32.mrb[174].mxu1 }
 0x8ad   : > { %v3084_v9 = vadd.f32 %v3083_v38, %v8149_v8  ;;  %v5451_v56 = vpop.f32.mrb[175].mxu1 }
 0x8ae   : > { %v2928_v40 = vadd.f32 %v5449_v0, %v8038_v27  ;;  %v5452_v1 = vadd.f32 %v5451_v56, %v5450_v59 }
 0x8b0   : > { %vm2989_vm6 = vcmp.ge.f32.partialorder %v2928_v40, 0.0  ;;  %v3022_v34 = vmul.f32 %v8043_v33, %v2928_v40  ;;  %v2931_v63 = vadd.f32 %v5452_v1, %v8038_v27 }
 0x8b2   : > { %v8155_v20 = vsel %vm2989_vm6, %v2928_v40, %v3022_v34  ;;  %vm2990_vm7 = vcmp.ge.f32.partialorder %v2931_v63, 0.0  ;;  %v3023_v6 = vmul.f32 %v8043_v33, %v2931_v63  ;;  %v5453_v12 = vpop.f32.mrb[176].mxu1 }
 0x8b3   : > { %v3085_v7 = vadd.f32 %v3084_v9, %v8155_v20  ;;  %v5454_v26 = vpop.f32.mrb[177].mxu1 }
 0x8b4   : > { %v8159_v31 = vsel %vm2990_vm7, %v2931_v63, %v3023_v6  ;;  %v5455_v47 = vadd.f32 %v5454_v26, %v5453_v12  ;;  %v5456_v24 = vpop.f32.mrb[178].mxu1 }
 0x8b5   : > { %v3086_v51 = vadd.f32 %v3085_v7, %v8159_v31  ;;  %v5457_v35 = vpop.f32.mrb[179].mxu1 }
 0x8b6   : > { %v2936_v42 = vadd.f32 %v5455_v47, %v8038_v27  ;;  %v5458_v30 = vadd.f32 %v5457_v35, %v5456_v24 }
 0x8b8   : > { %vm2991_vm8 = vcmp.ge.f32.partialorder %v2936_v42, 0.0  ;;  %v3024_v37 = vmul.f32 %v8043_v33, %v2936_v42  ;;  %v2939_v48 = vadd.f32 %v5458_v30, %v8038_v27 }
 0x8ba   : > { %v8165_v32 = vsel %vm2991_vm8, %v2936_v42, %v3024_v37  ;;  %vm2992_vm9 = vcmp.ge.f32.partialorder %v2939_v48, 0.0  ;;  %v3025_v49 = vmul.f32 %v8043_v33, %v2939_v48  ;;  %v5459_v10 = vpop.f32.mrb[180].mxu1 }
 0x8bb   : > { %v3087_v2 = vadd.f32 %v3086_v51, %v8165_v32  ;;  %v5460_v53 = vpop.f32.mrb[181].mxu1 }
 0x8bc   : > { %v3057_v14 = vsel %vm2992_vm9, %v2939_v48, %v3025_v49  ;;  %v5461_v36 = vadd.f32 %v5460_v53, %v5459_v10  ;;  %v5462_v55 = vpop.f32.mrb[182].mxu1 }
 0x8bd   : > { %v3088_v41 = vadd.f32 %v3087_v2, %v3057_v14  ;;  %v5463_v29 = vpop.f32.mrb[183].mxu1 }
 0x8be   : > { %v2944_v18 = vadd.f32 %v5461_v36, %v8038_v27  ;;  %v5464_v5 = vadd.f32 %v5463_v29, %v5462_v55 }
 0x8c0   : > { %vm2993_vm10 = vcmp.ge.f32.partialorder %v2944_v18, 0.0  ;;  %v3026_v15 = vmul.f32 %v8043_v33, %v2944_v18  ;;  %v2947_v39 = vadd.f32 %v5464_v5, %v8038_v27 }
 0x8c2   : > { %v3058_v4 = vsel %vm2993_vm10, %v2944_v18, %v3026_v15  ;;  %vm2994_vm11 = vcmp.ge.f32.partialorder %v2947_v39, 0.0  ;;  %v3027_v25 = vmul.f32 %v8043_v33, %v2947_v39  ;;  %v5465_v38 = vpop.f32.mrb[184].mxu1 }
 0x8c3   : > { %v3089_v11 = vadd.f32 %v3088_v41, %v3058_v4  ;;  %v5466_v0 = vpop.f32.mrb[185].mxu1 }
 0x8c4   : > { %v3059_v59 = vsel %vm2994_vm11, %v2947_v39, %v3027_v25  ;;  %v5467_v9 = vadd.f32 %v5466_v0, %v5465_v38  ;;  %v5468_v56 = vpop.f32.mrb[186].mxu1 }
 0x8c5   : > { %v3090_v40 = vadd.f32 %v3089_v11, %v3059_v59  ;;  %v5469_v1 = vpop.f32.mrb[187].mxu1 }
 0x8c6   : > { %v2952_v34 = vadd.f32 %v5467_v9, %v8038_v27  ;;  %v5470_v63 = vadd.f32 %v5469_v1, %v5468_v56 }
 0x8c8   : > { %vm2995_vm12 = vcmp.ge.f32.partialorder %v2952_v34, 0.0  ;;  %v3028_v6 = vmul.f32 %v8043_v33, %v2952_v34  ;;  %v2955_v12 = vadd.f32 %v5470_v63, %v8038_v27 }
 0x8ca   : > { %v3060_v7 = vsel %vm2995_vm12, %v2952_v34, %v3028_v6  ;;  %vm2996_vm13 = vcmp.ge.f32.partialorder %v2955_v12, 0.0  ;;  %v3029_v26 = vmul.f32 %v8043_v33, %v2955_v12  ;;  %v5471_v47 = vpop.f32.mrb[188].mxu1 }
 0x8cb   : > { %v3091_v24 = vadd.f32 %v3090_v40, %v3060_v7  ;;  %v5472_v51 = vpop.f32.mrb[189].mxu1 }
 0x8cc   : > { %v3061_v35 = vsel %vm2996_vm13, %v2955_v12, %v3029_v26  ;;  %v5473_v42 = vadd.f32 %v5472_v51, %v5471_v47  ;;  %v5474_v30 = vpop.f32.mrb[190].mxu1 }
 0x8cd   : > { %v3092_v37 = vadd.f32 %v3091_v24, %v3061_v35  ;;  %v5475_v48 = vpop.f32.mrb[191].mxu1 }
 0x8ce   : > { %v2960_v49 = vadd.f32 %v5473_v42, %v8038_v27  ;;  %v5476_v10 = vadd.f32 %v5475_v48, %v5474_v30 }
 0x8d0   : > { %vm2997_vm14 = vcmp.ge.f32.partialorder %v2960_v49, 0.0  ;;  %v3030_v2 = vmul.f32 %v8043_v33, %v2960_v49  ;;  %v2963_v53 = vadd.f32 %v5476_v10, %v8038_v27 }
 0x8d2   : > { %v3062_v36 = vsel %vm2997_vm14, %v2960_v49, %v3030_v2  ;;  %vm2998_vm15 = vcmp.ge.f32.partialorder %v2963_v53, 0.0  ;;  %v3031_v55 = vmul.f32 %v8043_v33, %v2963_v53 }
 0x8d3   : > { %v3093_v41 = vadd.f32 %v3092_v37, %v3062_v36 }
 0x8d4   : > { %v3063_v29 = vsel %vm2998_vm15, %v2963_v53, %v3031_v55 }
 0x8d5   : > { %v3094_v18 = vadd.f32 %v3093_v41, %v3063_v29 }
 0x8d7   : > { %v3095_v5 = vrot.slane %v3094_v18, 4 }
 0x8d9   : > { %v3096_v15 = vadd.f32 %v3095_v5, %v3094_v18 }
 0x8db   : > { %v3097_v39 = vrot.slane %v3096_v15, 2 }
 0x8dd   : > { %v3098_v25 = vadd.f32 %v3097_v39, %v3096_v15 }
 0x8df   : > { %v3099_v38 = vrot.slane %v3098_v25, 1 }
 0x8e1   : > { %v3100_v11 = vadd.f32 %v3099_v38, %v3098_v25 }
 0x8e3   : > { %v8181_v0 = vmul.f32 0.00390625, %v3100_v11 }
 0x8e5   : > { %v8185_v9 = vsub.f32 %v8145_v16, %v8181_v0  ;;  %v8189_v27 = vsub.f32 %v8149_v8, %v8181_v0  ;;  %v8193_v33 = vsub.f32 %v8155_v20, %v8181_v0  ;;  %v8197_v56 = vsub.f32 %v8159_v31, %v8181_v0 }
 0x8e6   : > { %v8201_v40 = vsub.f32 %v8165_v32, %v8181_v0  ;;  %v8204_v1 = vsub.f32 %v3057_v14, %v8181_v0  ;;  %v8207_v16 = vsub.f32 %v3058_v4, %v8181_v0  ;;  %v8210_v8 = vsub.f32 %v3059_v59, %v8181_v0 }
 0x8e7   : > { %v8213_v20 = vsub.f32 %v3060_v7, %v8181_v0  ;;  %v8216_v34 = vsub.f32 %v3061_v35, %v8181_v0  ;;  %v8219_v31 = vsub.f32 %v3062_v36, %v8181_v0  ;;  %v8222_v32 = vsub.f32 %v3063_v29, %v8181_v0 }
 0x8e8   : > { %v8226_v14 = vsub.f32 %v8052_v46, %v8181_v0  ;;  %v8230_v4 = vsub.f32 %v8049_v28, %v8181_v0  ;;  %v8234_v59 = vsub.f32 %v8054_v58, %v8181_v0  ;;  %v8242_v12 = vsub.f32 %v8062_v60, %v8181_v0 }
 0x8e9   : > { %v8246_v46 = vsub.f32 %v8065_v54, %v8181_v0  ;;  %v8252_v58 = vsub.f32 %v8072_v17, %v8181_v0  ;;  %v8258_v60 = vsub.f32 %v8075_v61, %v8181_v0  ;;  %v8264_v51 = vsub.f32 %v8082_v23, %v8181_v0 }
 0x8ea   : > { %v3134_v63 = vmul.f32 %v8226_v14, %v8226_v14  ;;  %v3135_v6 = vmul.f32 %v8230_v4, %v8230_v4  ;;  %v3136_v28 = vmul.f32 %v8234_v59, %v8234_v59  ;;  %v3137_v26 = vmul.f32 %v8242_v12, %v8242_v12 }
 0x8eb   : > { %v3138_v54 = vmul.f32 %v8246_v46, %v8246_v46  ;;  %v3139_v17 = vmul.f32 %v8252_v58, %v8252_v58  ;;  %v8270_v42 = vsub.f32 %v8085_v13, %v8181_v0  ;;  %v3140_v61 = vmul.f32 %v8258_v60, %v8258_v60 }
 0x8ec   : > { %v3166_v7 = vadd.f32 %v3135_v6, %v3134_v63  ;;  %v8276_v37 = vsub.f32 %v8092_v50, %v8181_v0  ;;  %v3141_v23 = vmul.f32 %v8264_v51, %v8264_v51  ;;  %v8282_v49 = vsub.f32 %v8095_v43, %v8181_v0 }
 0x8ed   : > { %v3142_v13 = vmul.f32 %v8270_v42, %v8270_v42  ;;  %v8288_v2 = vsub.f32 %v8102_v22, %v8181_v0  ;;  %v8294_v36 = vsub.f32 %v8105_v52, %v8181_v0  ;;  %v8300_v41 = vsub.f32 %v8112_v57, %v8181_v0 }
 0x8ee   : > { %v3167_v47 = vadd.f32 %v3166_v7, %v3136_v28  ;;  %v3143_v50 = vmul.f32 %v8276_v37, %v8276_v37  ;;  %v3144_v43 = vmul.f32 %v8282_v49, %v8282_v49  ;;  %v8306_v18 = vsub.f32 %v8114_v44, %v8181_v0 }
 0x8ef   : > { %v3145_v22 = vmul.f32 %v8288_v2, %v8288_v2  ;;  %v3146_v52 = vmul.f32 %v8294_v36, %v8294_v36  ;;  %v8312_v15 = vsub.f32 %v8122_v45, %v8181_v0  ;;  %v3147_v57 = vmul.f32 %v8300_v41, %v8300_v41 }
 0x8f0   : > { %v3168_v24 = vadd.f32 %v3167_v47, %v3137_v26  ;;  %v3118_v25 = vsub.f32 %v8124_v21, %v8181_v0  ;;  %v3148_v38 = vmul.f32 %v8306_v18, %v8306_v18  ;;  %v3119_v11 = vsub.f32 %v8130_v19, %v8181_v0 }
 0x8f1   : > { %v3149_v63 = vmul.f32 %v8312_v15, %v8312_v15  ;;  %v3120_v45 = vsub.f32 %v8134_v3, %v8181_v0  ;;  %v3121_v26 = vsub.f32 %v8139_v62, %v8181_v0  ;;  %v3154_v19 = vmul.f32 %v8185_v9, %v8185_v9 }
 0x8f2   : > { %v3169_v35 = vadd.f32 %v3168_v24, %v3138_v54  ;;  %v3150_v28 = vmul.f32 %v3118_v25, %v3118_v25  ;;  %v3151_v21 = vmul.f32 %v3119_v11, %v3119_v11  ;;  %v3156_v3 = vmul.f32 %v8193_v33, %v8193_v33 }
 0x8f3   : > { %v3152_v54 = vmul.f32 %v3120_v45, %v3120_v45  ;;  %v3157_v62 = vmul.f32 %v8197_v56, %v8197_v56 }
 0x8f4   : > { %v3170_v30 = vadd.f32 %v3169_v35, %v3139_v17  ;;  %v3153_v17 = vmul.f32 %v3121_v26, %v3121_v26 }
 0x8f6   : > { %v3171_v48 = vadd.f32 %v3170_v30, %v3140_v61  ;;  %v3155_v30 = vmul.f32 %v8189_v27, %v8189_v27 }
 0x8f8   : > { %v3172_v10 = vadd.f32 %v3171_v48, %v3141_v23 }
 0x8fa   : > { %v3173_v53 = vadd.f32 %v3172_v10, %v3142_v13  ;;  %v3158_v13 = vmul.f32 %v8201_v40, %v8201_v40 }
 0x8fc   : > { %v3174_v55 = vadd.f32 %v3173_v53, %v3143_v50  ;;  %v3159_v50 = vmul.f32 %v8204_v1, %v8204_v1 }
 0x8fe   : > { %v3175_v29 = vadd.f32 %v3174_v55, %v3144_v43  ;;  %v3160_v43 = vmul.f32 %v8207_v16, %v8207_v16 }
 0x900   : > { %v3176_v5 = vadd.f32 %v3175_v29, %v3145_v22  ;;  %v3161_v22 = vmul.f32 %v8210_v8, %v8210_v8 }
 0x902   : > { %v3177_v39 = vadd.f32 %v3176_v5, %v3146_v52  ;;  %v3162_v52 = vmul.f32 %v8213_v20, %v8213_v20 }
 0x904   : > { %v3178_v44 = vadd.f32 %v3177_v39, %v3147_v57  ;;  %v3163_v57 = vmul.f32 %v8216_v34, %v8216_v34 }
 0x906   : > { %v3179_v6 = vadd.f32 %v3178_v44, %v3148_v38  ;;  %v3164_v38 = vmul.f32 %v8219_v31, %v8219_v31 }
 0x908   : > { %v3180_v7 = vadd.f32 %v3179_v6, %v3149_v63  ;;  %v3165_v63 = vmul.f32 %v8222_v32, %v8222_v32 }
 0x90a   : > { %v3181_v47 = vadd.f32 %v3180_v7, %v3150_v28 }
 0x90c   : > { %v3182_v24 = vadd.f32 %v3181_v47, %v3151_v21 }
 0x90e   : > { %v3183_v35 = vadd.f32 %v3182_v24, %v3152_v54 }
 0x910   : > { %v3184_v61 = vadd.f32 %v3183_v35, %v3153_v17 }
 0x912   : > { %v3185_v23 = vadd.f32 %v3184_v61, %v3154_v19 }
 0x914   : > { %v3186_v48 = vadd.f32 %v3185_v23, %v3155_v30 }
 0x916   : > { %v3187_v0 = vadd.f32 %v3186_v48, %v3156_v3 }
 0x918   : > { %v3188_v10 = vadd.f32 %v3187_v0, %v3157_v62  ;;  %v8365_v62 = vld [vmem:[%s9130_s6 + $0x2] ss:$0 sm:$0xff] }
 0x91a   : > { %v3189_v53 = vadd.f32 %v3188_v10, %v3158_v13 }
 0x91c   : > { %v3190_v55 = vadd.f32 %v3189_v53, %v3159_v50 }
 0x91e   : > { %v3191_v29 = vadd.f32 %v3190_v55, %v3160_v43 }
 0x920   : > { %v3192_v5 = vadd.f32 %v3191_v29, %v3161_v22 }
 0x922   : > { %v3193_v39 = vadd.f32 %v3192_v5, %v3162_v52 }
 0x924   : > { %v3194_v44 = vadd.f32 %v3193_v39, %v3163_v57 }
 0x926   : > { %v3195_v6 = vadd.f32 %v3194_v44, %v3164_v38 }
 0x928   : > { %v3196_v28 = vadd.f32 %v3195_v6, %v3165_v63 }
 0x92a   : > { %v3197_v7 = vrot.slane %v3196_v28, 4 }
 0x92c   : > { %v3198_v21 = vadd.f32 %v3197_v7, %v3196_v28 }
 0x92e   : > { %v3199_v47 = vrot.slane %v3198_v21, 2 }
 0x930   : > { %v3200_v54 = vadd.f32 %v3199_v47, %v3198_v21 }
 0x932   : > { %v3201_v24 = vrot.slane %v3200_v54, 1 }
 0x934   : > { %v3202_v17 = vadd.f32 %v3201_v24, %v3200_v54 }
 0x936   : > { %v3203_v35 = vmul.f32 0.00390625, %v3202_v17 }
 0x938   : > { %v3204_v19 = vadd.f32 1e-05, %v3203_v35 }
 0x93a   : > { %6021 = vrsqrt.f32 %v3204_v19 }
 0x944   : > { %v8352_v61 = vpop.eup %6021 }
 0x945   : > { %v3206_v30 = vmul.f32 %v8352_v61, %v8226_v14  ;;  %v3207_v23 = vmul.f32 %v8352_v61, %v8230_v4  ;;  %v3208_v3 = vmul.f32 %v8352_v61, %v8234_v59  ;;  %v3209_v48 = vmul.f32 %v8352_v61, %v8242_v12  ;;  %v8378_v12 = vld [vmem:[%s9131_s7 + $0x2] ss:$0 sm:$0xff] }
 0x946   : > { %v3210_v0 = vmul.f32 %v8352_v61, %v8246_v46  ;;  %v3211_v14 = vmul.f32 %v8352_v61, %v8252_v58  ;;  %v3212_v4 = vmul.f32 %v8352_v61, %v8258_v60  ;;  %v3213_v59 = vmul.f32 %v8352_v61, %v8264_v51 }
 0x947   : > { %v3222_v13 = vmul.f32 %v8352_v61, %v3118_v25  ;;  %v3223_v10 = vmul.f32 %v8352_v61, %v3119_v11  ;;  %v3246_v46 = vmul.f32 %v8365_v62, %v3206_v30  ;;  %v3247_v50 = vmul.f32 %v8365_v62, %v3207_v23 }
 0x948   : > { %v3224_v58 = vmul.f32 %v8352_v61, %v3120_v45  ;;  %v3225_v60 = vmul.f32 %v8352_v61, %v3121_v26  ;;  %v3248_v53 = vmul.f32 %v8365_v62, %v3208_v3  ;;  %v3249_v51 = vmul.f32 %v8365_v62, %v3209_v48 }
 0x949   : > { %v3262_v43 = vmul.f32 %v8365_v62, %v3222_v13  ;;  %v3263_v55 = vmul.f32 %v8365_v62, %v3223_v10  ;;  %v3286_v25 = vadd.f32 %v8378_v12, %v3246_v46  ;;  %v3287_v11 = vadd.f32 %v8378_v12, %v3247_v50 }
 0x94a   : > { %v3214_v22 = vmul.f32 %v8352_v61, %v8270_v42  ;;  %v3264_v29 = vmul.f32 %v8365_v62, %v3224_v58  ;;  %v3265_v45 = vmul.f32 %v8365_v62, %v3225_v60  ;;  %v3288_v26 = vadd.f32 %v8378_v12, %v3248_v53 }
 0x94b   : > { %v3302_v52 = vadd.f32 %v8378_v12, %v3262_v43  ;;  %v3303_v5 = vadd.f32 %v8378_v12, %v3263_v55  ;;  %v3289_v57 = vadd.f32 %v8378_v12, %v3249_v51  ;;  %v3226_v39 = vmul.f32 %v8352_v61, %v8185_v9 }
 0x94c   : > { %v8402_v38 = vpack.c.bf16 %v3287_v11, %v3286_v25  ;;  %v3304_v44 = vadd.f32 %v8378_v12, %v3264_v29  ;;  %v3305_v42 = vadd.f32 %v8378_v12, %v3265_v45  ;;  %v3227_v63 = vmul.f32 %v8352_v61, %v8189_v27 }
 0x94d   : > { %v8408_v6 = vpack.c.bf16 %v3303_v5, %v3302_v52  ;;  %v3266_v28 = vmul.f32 %v8365_v62, %v3226_v39  ;;  %v3250_v7 = vmul.f32 %v8365_v62, %v3210_v0  ;;  %v3251_v21 = vmul.f32 %v8365_v62, %v3211_v14 }
 0x94e   : > { %v8413_v47 = vpack.c.bf16 %v3305_v42, %v3304_v44  ;;  %v3267_v9 = vmul.f32 %v8365_v62, %v3227_v63  ;;  %v3228_v54 = vmul.f32 %v8352_v61, %v8193_v33  ;;  %v3229_v24 = vmul.f32 %v8352_v61, %v8197_v56 }
 0x94f   : > { %v3215_v27 = vmul.f32 %v8352_v61, %v8276_v37  ;;  %v3216_v17 = vmul.f32 %v8352_v61, %v8282_v49  ;;  %5477 = vmatprep.subr.bf16.mxu0 %v8408_v6  ;;  %v8425_v35 = vpack.c.bf16 %v3289_v57, %v3288_v26  ;;  %v3306_v19 = vadd.f32 %v8378_v12, %v3266_v28 }
 0x950   : > { %5478 = vmatpush3.bf16.msra.mxu0 %v8402_v38  ;;  %v3307_v30 = vadd.f32 %v8378_v12, %v3267_v9  ;;  %v3290_v33 = vadd.f32 %v8378_v12, %v3250_v7  ;;  %v3268_v56 = vmul.f32 %v8365_v62, %v3228_v54  ;;  %v3269_v23 = vmul.f32 %v8365_v62, %v3229_v24 }
 0x951   : > { %5479 = vmatprep.subr.bf16.mxu0 %v8413_v47  ;;  %v3291_v37 = vadd.f32 %v8378_v12, %v3251_v21  ;;  %v3252_v49 = vmul.f32 %v8365_v62, %v3212_v4  ;;  %v3230_v3 = vmul.f32 %v8352_v61, %v8201_v40  ;;  %v3231_v48 = vmul.f32 %v8352_v61, %v8204_v1 }
 0x952   : > { %v8440_v0 = vpack.c.bf16 %v3307_v30, %v3306_v19  ;;  %v3308_v14 = vadd.f32 %v8378_v12, %v3268_v56  ;;  %v3309_v13 = vadd.f32 %v8378_v12, %v3269_v23  ;;  %v3253_v10 = vmul.f32 %v8365_v62, %v3213_v59 }
 0x953   : > { %v3217_v46 = vmul.f32 %v8352_v61, %v8288_v2  ;;  %v3270_v50 = vmul.f32 %v8365_v62, %v3230_v3  ;;  %v3271_v4 = vmul.f32 %v8365_v62, %v3231_v48  ;;  %v3254_v40 = vmul.f32 %v8365_v62, %v3214_v22 }
 0x954   : > { %5480 = vmatpush3.bf16.msra.mxu0 %v8425_v35  ;;  %v8451_v1 = vpack.c.bf16 %v3309_v13, %v3308_v14  ;;  %v3255_v58 = vmul.f32 %v8365_v62, %v3215_v27  ;;  %v3232_v60 = vmul.f32 %v8352_v61, %v8207_v16  ;;  %v3233_v59 = vmul.f32 %v8352_v61, %v8210_v8  ;;  %v5982_v13 = vld [vmem:[#allocation10 + $0x1c0] sm:$0xff]  }
 0x955   : > { %v3218_v2 = vmul.f32 %v8352_v61, %v8294_v36  ;;  %5481 = vmatprep.subr.bf16.mxu0 %v8440_v0  ;;  %v8461_v53 = vpack.c.bf16 %v3291_v37, %v3290_v33  ;;  %v3310_v51 = vadd.f32 %v8378_v12, %v3270_v50  ;;  %v3311_v43 = vadd.f32 %v8378_v12, %v3271_v4  ;;  %v5985_v50 = vld [vmem:[#allocation10 + $0x188] sm:$0xff]   ;;  %v5986_v4 = vld [vmem:[#allocation10 + $0x1d0] sm:$0xff]  }
 0x956   : > { %v3292_v55 = vadd.f32 %v8378_v12, %v3252_v49  ;;  %v3293_v25 = vadd.f32 %v8378_v12, %v3253_v10  ;;  %v3272_v16 = vmul.f32 %v8365_v62, %v3232_v60  ;;  %v3273_v11 = vmul.f32 %v8365_v62, %v3233_v59  ;;  %v5983_v10 = vld [vmem:[#allocation10 + $0x180] sm:$0xff]   ;;  %5589 = vmatprep.subr.bf16.mxu1 %v5982_v13  ;;  %v6090_v60 = vld [vmem:[%s6786_s4 + $0x14] ss:$8 sps:$4 sm:$0xff]  }
 0x957   : > { %v3219_v8 = vmul.f32 %v8352_v61, %v8300_v41  ;;  %v8471_v36 = vpack.c.bf16 %v3311_v43, %v3310_v51  ;;  %v3234_v22 = vmul.f32 %v8352_v61, %v8213_v20  ;;  %v3235_v29 = vmul.f32 %v8352_v61, %v8216_v34  ;;  %5590 = vmatpush3.bf16.msra.mxu1 %v5983_v10  ;;  %v5989_v59 = vld [vmem:[#allocation10 + $0x198] sm:$0xff]   ;;  %v5991_v51 = vld [vmem:[#allocation10 + $0x1a0] sm:$0xff]  }
 0x958   : > { %5482 = vmatpush3.bf16.msra.mxu0 %v8461_v53  ;;  %v3294_v45 = vadd.f32 %v8378_v12, %v3254_v40  ;;  %v3295_v26 = vadd.f32 %v8378_v12, %v3255_v58  ;;  %v3312_v52 = vadd.f32 %v8378_v12, %v3272_v16  ;;  %v3313_v5 = vadd.f32 %v8378_v12, %v3273_v11  ;;  %v6089_v40 = vld [vmem:[%s6786_s4] ss:$8 sps:$4 sm:$0xff]   ;;  %v5988_v58 = vld [vmem:[#allocation10 + $0x1d8] sm:$0xff]  }
 0x959   : > { %5483 = vmatprep.subr.bf16.mxu0 %v8451_v1  ;;  %v3256_v41 = vmul.f32 %v8365_v62, %v3216_v17  ;;  %v3257_v57 = vmul.f32 %v8365_v62, %v3217_v46  ;;  %v3274_v20 = vmul.f32 %v8365_v62, %v3234_v22  ;;  %v3275_v34 = vmul.f32 %v8365_v62, %v3235_v29  ;;  %v5984_v46 = vld [vmem:[#allocation10 + $0x1c8] sm:$0xff]   ;;  %v6091_v43 = vld [vmem:[%s6786_s4 + $0x10] ss:$8 sps:$4 sm:$0xff]  }
 0x95a   : > { %v8487_v39 = vpack.c.bf16 %v3293_v25, %v3292_v55  ;;  %v8489_v44 = vpack.c.bf16 %v3313_v5, %v3312_v52  ;;  %v3236_v42 = vmul.f32 %v8352_v61, %v8219_v31  ;;  %v3237_v63 = vmul.f32 %v8352_v61, %v8222_v32  ;;  %5591 = vmatprep.subr.bf16.mxu1 %v5984_v46  ;;  %v5992_v55 = vld [vmem:[#allocation10 + $0x1e8] sm:$0xff]   ;;  %v6095_v22 = vld [vmem:[%s6786_s4 + $0x30] ss:$8 sps:$4 sm:$0xff]  }
 0x95b   : > { %v3314_v28 = vadd.f32 %v8378_v12, %v3274_v20  ;;  %v3315_v7 = vadd.f32 %v8378_v12, %v3275_v34  ;;  %v3220_v21 = vmul.f32 %v8352_v61, %v8306_v18  ;;  %v3221_v9 = vmul.f32 %v8352_v61, %v8312_v15  ;;  %5592 = vmatpush3.bf16.msra.mxu1 %v5985_v50  ;;  %v6092_v25 = vld [vmem:[%s6786_s4 + $0x24] ss:$8 sps:$4 sm:$0xff]   ;;  %v6093_v11 = vld [vmem:[%s6786_s4 + $0x20] ss:$8 sps:$4 sm:$0xff]   ;;  %v6099_v52 = vld [vmem:[%s6786_s4 + $0x50] ss:$8 sps:$4 sm:$0xff]  }
 0x95c   : > { %5484 = vmatpush3.bf16.msra.mxu0 %v8487_v39  ;;  %v3276_v54 = vmul.f32 %v8365_v62, %v3236_v42  ;;  %v3277_v24 = vmul.f32 %v8365_v62, %v3237_v63  ;;  %v8505_v31 = vpack.c.bf16 %v3295_v26, %v3294_v45  ;;  %v3296_v32 = vadd.f32 %v8378_v12, %v3256_v41  ;;  %v5993_v16 = vld [vmem:[#allocation10 + $0x1a8] sm:$0xff]   ;;  %v6098_v26 = vld [vmem:[%s6786_s4 + $0x54] ss:$8 sps:$4 sm:$0xff]   ;;  %v6103_v20 = vld [vmem:[%s6786_s4 + $0x70] ss:$8 sps:$4 sm:$0xff]  }
 0x95d   : > { %5485 = vmatprep.subr.bf16.mxu0 %v8471_v36  ;;  %v3297_v27 = vadd.f32 %v8378_v12, %v3257_v57  ;;  %v8509_v17 = vpack.c.bf16 %v3315_v7, %v3314_v28  ;;  %v3258_v18 = vmul.f32 %v8365_v62, %v3218_v2  ;;  %v3259_v15 = vmul.f32 %v8365_v62, %v3219_v8  ;;  %v5990_v2 = vld [vmem:[#allocation10 + $0x1e0] sm:$0xff]   ;;  %v6094_v8 = vld [vmem:[%s6786_s4 + $0x34] ss:$8 sps:$4 sm:$0xff]   ;;  %v6107_v28 = vld [vmem:[%s6786_s4 + $0x90] ss:$8 sps:$4 sm:$0xff]  }
 0x95e   : > { %v3316_v61 = vadd.f32 %v8378_v12, %v3276_v54  ;;  %v3317_v19 = vadd.f32 %v8378_v12, %v3277_v24  ;;  %v3260_v37 = vmul.f32 %v8365_v62, %v3220_v21  ;;  %v3261_v49 = vmul.f32 %v8365_v62, %v3221_v9  ;;  %5593 = vmatprep.subr.bf16.mxu1 %v5986_v4  ;;  %v6096_v29 = vld [vmem:[%s6786_s4 + $0x44] ss:$8 sps:$4 sm:$0xff]   ;;  %v6097_v45 = vld [vmem:[%s6786_s4 + $0x40] ss:$8 sps:$4 sm:$0xff]   ;;  %v6102_v57 = vld [vmem:[%s6786_s4 + $0x74] ss:$8 sps:$4 sm:$0xff]  }
 0x95f   : > { %v8519_v33 = vpack.c.bf16 %v3297_v27, %v3296_v32  ;;  %v3298_v56 = vadd.f32 %v8378_v12, %v3258_v18  ;;  %v3299_v23 = vadd.f32 %v8378_v12, %v3259_v15  ;;  %v6100_v5 = vld [vmem:[%s6786_s4 + $0x64] ss:$8 sps:$4 sm:$0xff]   ;;  %v6101_v41 = vld [vmem:[%s6786_s4 + $0x60] ss:$8 sps:$4 sm:$0xff]   ;;  %v6106_v63 = vld [vmem:[%s6786_s4 + $0x94] ss:$8 sps:$4 sm:$0xff]  }
 0x960   : > { %5486 = vmatpush3.bf16.msra.mxu0 %v8505_v31  ;;  %v8516_v30 = vpack.c.bf16 %v3317_v19, %v3316_v61  ;;  %v3300_v48 = vadd.f32 %v8378_v12, %v3260_v37  ;;  %v3301_v14 = vadd.f32 %v8378_v12, %v3261_v49  ;;  %v5987_v12 = vld [vmem:[#allocation10 + $0x190] sm:$0xff]   ;;  %v6104_v34 = vld [vmem:[%s6786_s4 + $0x84] ss:$8 sps:$4 sm:$0xff]   ;;  %v6105_v42 = vld [vmem:[%s6786_s4 + $0x80] ss:$8 sps:$4 sm:$0xff]  }
 0x961   : > { %5487 = vmatprep.subr.bf16.mxu0 %v8489_v44  ;;  %v8527_v3 = vpack.c.bf16 %v3299_v23, %v3298_v56  ;;  %5594 = vmatpush3.bf16.msra.mxu1 %v5987_v12  ;;  %v6108_v7 = vld [vmem:[%s6786_s4 + $0xa4] ss:$8 sps:$4 sm:$0xff]   ;;  %v6109_v21 = vld [vmem:[%s6786_s4 + $0xa0] ss:$8 sps:$4 sm:$0xff]   ;;  %v6110_v9 = vld [vmem:[%s6786_s4 + $0xb4] ss:$8 sps:$4 sm:$0xff]  }
 0x962   : > { %v8533_v62 = vpack.c.bf16 %v3301_v14, %v3300_v48  ;;  %5595 = vmatprep.subr.bf16.mxu1 %v5988_v58  ;;  %v5994_v54 = vld [vmem:[#allocation10 + $0x1f0] sm:$0xff]   ;;  %v6112_v27 = vld [vmem:[%s6786_s4 + $0xc4] ss:$8 sps:$4 sm:$0xff]   ;;  %v5996_v18 = vld [vmem:[#allocation10 + $0x1f8] sm:$0xff]  }
 0x963   : > { %v5995_v24 = vld [vmem:[#allocation10 + $0x1b0] sm:$0xff]   ;;  %v5997_v15 = vld [vmem:[#allocation10 + $0x1b8] sm:$0xff]   ;;  %v6113_v61 = vld [vmem:[%s6786_s4 + $0xc0] ss:$8 sps:$4 sm:$0xff]  }
 0x964   : > { %5488 = vmatpush3.bf16.msra.mxu0 %v8519_v33  ;;  %v6111_v32 = vld [vmem:[%s6786_s4 + $0xb0] ss:$8 sps:$4 sm:$0xff]   ;;  %v6114_v19 = vld [vmem:[%s6786_s4 + $0xd4] ss:$8 sps:$4 sm:$0xff]   ;;  %v6116_v23 = vld [vmem:[%s6786_s4 + $0xe4] ss:$8 sps:$4 sm:$0xff]  }
 0x965   : > { %5489 = vmatprep.subr.bf16.mxu0 %v8509_v17  ;;  %5596 = vmatpush3.bf16.msra.mxu1 %v5989_v59  ;;  %v6115_v56 = vld [vmem:[%s6786_s4 + $0xd0] ss:$8 sps:$4 sm:$0xff]   ;;  %v6117_v37 = vld [vmem:[%s6786_s4 + $0xe0] ss:$8 sps:$4 sm:$0xff]   ;;  %v6118_v49 = vld [vmem:[%s6786_s4 + $0xf4] ss:$8 sps:$4 sm:$0xff]  }
 0x966   : > { %5597 = vmatprep.subr.bf16.mxu1 %v5990_v2  ;;  %v6119_v48 = vld [vmem:[%s6786_s4 + $0xf0] ss:$8 sps:$4 sm:$0xff]   ;;  %s4771_s4 = sld [smem:[#allocation2 + $0x3]] }
 0x968   : > { %5490 = vmatpush3.bf16.msra.mxu0 %v8527_v3 }
 0x969   : > { %5491 = vmatprep.subr.bf16.mxu0 %v8516_v30  ;;  %5598 = vmatpush3.bf16.msra.mxu1 %v5991_v51 }
 0x96a   : > { %5599 = vmatprep.subr.bf16.mxu1 %v5992_v55 }
 0x96c   : > { %5492 = vmatpush3.bf16.msra.mxu0 %v8533_v62 }
 0x96d   : > { %5600 = vmatpush3.bf16.msra.mxu1 %v5993_v16 }
 0x96e   : > { %5601 = vmatprep.subr.bf16.mxu1 %v5994_v54 }
 0x96f   : > { %3367 = vmatmul.mubr.bf16.vlgmr.msra.gmra.mrb[192].mxu0 %v6089_v40 }
 0x970   : > { %3374 = vmatprep.mubr.bf16.mxu0 %v6090_v60 }
 0x971   : > { %5602 = vmatpush3.bf16.msra.mxu1 %v5995_v24 }
 0x972   : > { %5603 = vmatprep.subr.bf16.mxu1 %v5996_v18 }
 0x975   : > { %5604 = vmatpush3.bf16.msra.mxu1 %v5997_v15 }
 0x977   : > { %3375 = vmatmul.mubr.bf16.gmra.mrb[196].mxu0 %v6091_v43 }
 0x978   : > { %3382 = vmatprep.mubr.bf16.mxu0 %v6092_v25 }
 0x97f   : > { %3383 = vmatmul.mubr.bf16.gmra.mrb[200].mxu0 %v6093_v11 }
 0x980   : > { %3390 = vmatprep.mubr.bf16.mxu0 %v6094_v8 }
 0x987   : > { %3391 = vmatmul.mubr.bf16.gmra.mrb[204].mxu0 %v6095_v22 }
 0x988   : > { %3398 = vmatprep.mubr.bf16.mxu0 %v6096_v29 }
 0x98f   : > { %3399 = vmatmul.mubr.bf16.gmra.mrb[208].mxu0 %v6097_v45 }
 0x990   : > { %3406 = vmatprep.mubr.bf16.mxu0 %v6098_v26 }
 0x997   : > { %3407 = vmatmul.mubr.bf16.gmra.mrb[212].mxu0 %v6099_v52 }
 0x998   : > { %3414 = vmatprep.mubr.bf16.mxu0 %v6100_v5 }
 0x99f   : > { %3415 = vmatmul.mubr.bf16.gmra.mrb[216].mxu0 %v6101_v41 }
 0x9a0   : > { %3422 = vmatprep.mubr.bf16.mxu0 %v6102_v57 }
 0x9a7   : > { %3423 = vmatmul.mubr.bf16.gmra.mrb[220].mxu0 %v6103_v20 }
 0x9a8   : > { %3430 = vmatprep.mubr.bf16.mxu0 %v6104_v34 }
 0x9af   : > { %3431 = vmatmul.mubr.bf16.gmra.mrb[224].mxu0 %v6105_v42 }
 0x9b0   : > { %3438 = vmatprep.mubr.bf16.mxu0 %v6106_v63 }
 0x9b7   : > { %3439 = vmatmul.mubr.bf16.gmra.mrb[228].mxu0 %v6107_v28 }
 0x9b8   : > { %3446 = vmatprep.mubr.bf16.mxu0 %v6108_v7 }
 0x9bf   : > { %3447 = vmatmul.mubr.bf16.gmra.mrb[232].mxu0 %v6109_v21 }
 0x9c0   : > { %3454 = vmatprep.mubr.bf16.mxu0 %v6110_v9 }
 0x9c7   : > { %3455 = vmatmul.mubr.bf16.gmra.mrb[236].mxu0 %v6111_v32 }
 0x9c8   : > { %3462 = vmatprep.mubr.bf16.mxu0 %v6112_v27 }
 0x9cf   : > { %3463 = vmatmul.mubr.bf16.gmra.mrb[240].mxu0 %v6113_v61 }
 0x9d0   : > { %3470 = vmatprep.mubr.bf16.mxu0 %v6114_v19 }
 0x9d7   : > { %3471 = vmatmul.mubr.bf16.gmra.mrb[244].mxu0 %v6115_v56 }
 0x9d8   : > { %3478 = vmatprep.mubr.bf16.mxu0 %v6116_v23 }
 0x9df   : > { %3479 = vmatmul.mubr.bf16.gmra.mrb[248].mxu0 %v6117_v37 }
 0x9e0   : > { %3486 = vmatprep.mubr.bf16.mxu0 %v6118_v49 }
 0x9e7   : > { %3487 = vmatmul.mubr.bf16.gmra.mrb[252].mxu0 %v6119_v48 }
 0xa42   : > { %v5493_v14 = vpop.f32.mrb[192].mxu0 }
 0xa43   : > { %v5494_v13 = vpop.f32.mrb[193].mxu0 }
 0xa44   : > { %v5495_v10 = vadd.f32 %v5494_v13, %v5493_v14  ;;  %v5496_v46 = vpop.f32.mrb[194].mxu0 }
 0xa45   : > { %v5497_v50 = vpop.f32.mrb[195].mxu0 }
 0xa46   : > { %v5498_v4 = vadd.f32 %v5497_v50, %v5496_v46 }
 0xa48   : > { %v3495_v12 = vpack.c.bf16 %v5498_v4, %v5495_v10 }
 0xa4a   : > { %v5499_v40 = vpop.f32.mrb[196].mxu0  ;;  %3680 = vmatprep.mubr.bf16.mxu1 %v3495_v12 }
 0xa4b   : > { %v5500_v58 = vpop.f32.mrb[197].mxu0  ;;  %3681 = vmatmul.mubr.bf16.vlgmr.msra.gmra.mrb[192].mxu1 %v8402_v38 }
 0xa4c   : > { %v5501_v60 = vadd.f32 %v5500_v58, %v5499_v40  ;;  %v5502_v59 = vpop.f32.mrb[198].mxu0 }
 0xa4d   : > { %v5503_v2 = vpop.f32.mrb[199].mxu0 }
 0xa4e   : > { %v5504_v51 = vadd.f32 %v5503_v2, %v5502_v59 }
 0xa50   : > { %v3496_v43 = vpack.c.bf16 %v5504_v51, %v5501_v60 }
 0xa52   : > { %v5505_v55 = vpop.f32.mrb[200].mxu0  ;;  %3688 = vmatprep.mubr.bf16.mxu1 %v3496_v43 }
 0xa53   : > { %v5506_v25 = vpop.f32.mrb[201].mxu0  ;;  %3689 = vmatmul.mubr.bf16.gmra.mrb[196].mxu1 %v8425_v35 }
 0xa54   : > { %v5507_v16 = vadd.f32 %v5506_v25, %v5505_v55  ;;  %v5508_v11 = vpop.f32.mrb[202].mxu0 }
 0xa55   : > { %v5509_v8 = vpop.f32.mrb[203].mxu0 }
 0xa56   : > { %v5510_v22 = vadd.f32 %v5509_v8, %v5508_v11 }
 0xa58   : > { %v3497_v29 = vpack.c.bf16 %v5510_v22, %v5507_v16 }
 0xa5a   : > { %v5511_v45 = vpop.f32.mrb[204].mxu0  ;;  %3696 = vmatprep.mubr.bf16.mxu1 %v3497_v29 }
 0xa5b   : > { %v5512_v26 = vpop.f32.mrb[205].mxu0  ;;  %3697 = vmatmul.mubr.bf16.gmra.mrb[200].mxu1 %v8461_v53 }
 0xa5c   : > { %v5513_v38 = vadd.f32 %v5512_v26, %v5511_v45  ;;  %v5514_v52 = vpop.f32.mrb[206].mxu0 }
 0xa5d   : > { %v5515_v5 = vpop.f32.mrb[207].mxu0 }
 0xa5e   : > { %v5516_v41 = vadd.f32 %v5515_v5, %v5514_v52 }
 0xa60   : > { %v3498_v57 = vpack.c.bf16 %v5516_v41, %v5513_v38 }
 0xa62   : > { %v5517_v20 = vpop.f32.mrb[208].mxu0  ;;  %3704 = vmatprep.mubr.bf16.mxu1 %v3498_v57 }
 0xa63   : > { %v5518_v34 = vpop.f32.mrb[209].mxu0  ;;  %3705 = vmatmul.mubr.bf16.gmra.mrb[204].mxu1 %v8487_v39 }
 0xa64   : > { %v5519_v35 = vadd.f32 %v5518_v34, %v5517_v20  ;;  %v5520_v42 = vpop.f32.mrb[210].mxu0 }
 0xa65   : > { %v5521_v63 = vpop.f32.mrb[211].mxu0 }
 0xa66   : > { %v5522_v28 = vadd.f32 %v5521_v63, %v5520_v42 }
 0xa68   : > { %v3499_v7 = vpack.c.bf16 %v5522_v28, %v5519_v35 }
 0xa6a   : > { %v5523_v21 = vpop.f32.mrb[212].mxu0  ;;  %3712 = vmatprep.mubr.bf16.mxu1 %v3499_v7 }
 0xa6b   : > { %v5524_v9 = vpop.f32.mrb[213].mxu0  ;;  %3713 = vmatmul.mubr.bf16.gmra.mrb[208].mxu1 %v8505_v31 }
 0xa6c   : > { %v5525_v53 = vadd.f32 %v5524_v9, %v5523_v21  ;;  %v5526_v54 = vpop.f32.mrb[214].mxu0 }
 0xa6d   : > { %v5527_v24 = vpop.f32.mrb[215].mxu0 }
 0xa6e   : > { %v5528_v32 = vadd.f32 %v5527_v24, %v5526_v54 }
 0xa70   : > { %v3500_v27 = vpack.c.bf16 %v5528_v32, %v5525_v53 }
 0xa72   : > { %v5529_v18 = vpop.f32.mrb[216].mxu0  ;;  %3720 = vmatprep.mubr.bf16.mxu1 %v3500_v27 }
 0xa73   : > { %v5530_v15 = vpop.f32.mrb[217].mxu0  ;;  %3721 = vmatmul.mubr.bf16.gmra.mrb[212].mxu1 %v8519_v33 }
 0xa74   : > { %v5531_v39 = vadd.f32 %v5530_v15, %v5529_v18  ;;  %v5532_v61 = vpop.f32.mrb[218].mxu0 }
 0xa75   : > { %v5533_v19 = vpop.f32.mrb[219].mxu0 }
 0xa76   : > { %v5534_v56 = vadd.f32 %v5533_v19, %v5532_v61 }
 0xa78   : > { %v3501_v23 = vpack.c.bf16 %v5534_v56, %v5531_v39 }
 0xa7a   : > { %v5535_v37 = vpop.f32.mrb[220].mxu0  ;;  %3728 = vmatprep.mubr.bf16.mxu1 %v3501_v23 }
 0xa7b   : > { %v5536_v49 = vpop.f32.mrb[221].mxu0  ;;  %3729 = vmatmul.mubr.bf16.gmra.mrb[216].mxu1 %v8527_v3 }
 0xa7c   : > { %v5537_v31 = vadd.f32 %v5536_v49, %v5535_v37  ;;  %v5538_v48 = vpop.f32.mrb[222].mxu0 }
 0xa7d   : > { %v5539_v14 = vpop.f32.mrb[223].mxu0 }
 0xa7e   : > { %v5540_v13 = vadd.f32 %v5539_v14, %v5538_v48 }
 0xa80   : > { %v3502_v10 = vpack.c.bf16 %v5540_v13, %v5537_v31 }
 0xa82   : > { %v5541_v46 = vpop.f32.mrb[224].mxu0  ;;  %3736 = vmatprep.mubr.bf16.mxu1 %v3502_v10 }
 0xa83   : > { %v5542_v50 = vpop.f32.mrb[225].mxu0  ;;  %3737 = vmatmul.mubr.bf16.gmra.mrb[220].mxu1 %v8533_v62 }
 0xa84   : > { %v5543_v33 = vadd.f32 %v5542_v50, %v5541_v46  ;;  %v5544_v4 = vpop.f32.mrb[226].mxu0 }
 0xa85   : > { %v5545_v12 = vpop.f32.mrb[227].mxu0 }
 0xa86   : > { %v5546_v40 = vadd.f32 %v5545_v12, %v5544_v4 }
 0xa88   : > { %v3503_v58 = vpack.c.bf16 %v5546_v40, %v5543_v33 }
 0xa8a   : > { %v5547_v60 = vpop.f32.mrb[228].mxu0  ;;  %3744 = vmatprep.mubr.bf16.mxu1 %v3503_v58 }
 0xa8b   : > { %v5548_v59 = vpop.f32.mrb[229].mxu0  ;;  %3745 = vmatmul.mubr.bf16.gmra.mrb[224].mxu1 %v8408_v6 }
 0xa8c   : > { %v5549_v3 = vadd.f32 %v5548_v59, %v5547_v60  ;;  %v5550_v2 = vpop.f32.mrb[230].mxu0 }
 0xa8d   : > { %v5551_v51 = vpop.f32.mrb[231].mxu0 }
 0xa8e   : > { %v5552_v43 = vadd.f32 %v5551_v51, %v5550_v2 }
 0xa90   : > { %v3504_v55 = vpack.c.bf16 %v5552_v43, %v5549_v3 }
 0xa92   : > { %v5553_v25 = vpop.f32.mrb[232].mxu0  ;;  %3752 = vmatprep.mubr.bf16.mxu1 %v3504_v55 }
 0xa93   : > { %v5554_v16 = vpop.f32.mrb[233].mxu0  ;;  %3753 = vmatmul.mubr.bf16.gmra.mrb[228].mxu1 %v8413_v47 }
 0xa94   : > { %v5555_v62 = vadd.f32 %v5554_v16, %v5553_v25  ;;  %v5556_v11 = vpop.f32.mrb[234].mxu0  ;;  %v8591_v16 = vstv %s4771_s4  ;;  %s9212_s4 = sld [smem:[#allocation33_spill]] }
 0xa95   : > { %v5557_v8 = vpop.f32.mrb[235].mxu0 }
 0xa96   : > { %v5558_v22 = vadd.f32 %v5557_v8, %v5556_v11 }
 0xa98   : > { %v3505_v29 = vpack.c.bf16 %v5558_v22, %v5555_v62 }
 0xa9a   : > { %v5559_v45 = vpop.f32.mrb[236].mxu0  ;;  %3760 = vmatprep.mubr.bf16.mxu1 %v3505_v29  ;;  %s9080_s26 = scalar_lea.hbm %s9212_s4, %s4804_s28 }
 0xa9b   : > { %v5560_v26 = vpop.f32.mrb[237].mxu0  ;;  %3761 = vmatmul.mubr.bf16.gmra.mrb[232].mxu1 %v8440_v0 }
 0xa9c   : > { %v5561_v6 = vadd.f32 %v5560_v26, %v5559_v45  ;;  %v5562_v38 = vpop.f32.mrb[238].mxu0 }
 0xa9d   : > { %v5563_v52 = vpop.f32.mrb[239].mxu0 }
 0xa9e   : > { %v5564_v5 = vadd.f32 %v5563_v52, %v5562_v38 }
 0xaa0   : > { %v3506_v41 = vpack.c.bf16 %v5564_v5, %v5561_v6 }
 0xaa2   : > { %v5565_v57 = vpop.f32.mrb[240].mxu0  ;;  %3768 = vmatprep.mubr.bf16.mxu1 %v3506_v41 }
 0xaa3   : > { %v5566_v20 = vpop.f32.mrb[241].mxu0  ;;  %3769 = vmatmul.mubr.bf16.gmra.mrb[236].mxu1 %v8451_v1 }
 0xaa4   : > { %v5567_v47 = vadd.f32 %v5566_v20, %v5565_v57  ;;  %v5568_v34 = vpop.f32.mrb[242].mxu0 }
 0xaa5   : > { %v5569_v35 = vpop.f32.mrb[243].mxu0 }
 0xaa6   : > { %v5570_v42 = vadd.f32 %v5569_v35, %v5568_v34 }
 0xaa8   : > { %v3507_v63 = vpack.c.bf16 %v5570_v42, %v5567_v47 }
 0xaaa   : > { %v5571_v28 = vpop.f32.mrb[244].mxu0  ;;  %3776 = vmatprep.mubr.bf16.mxu1 %v3507_v63 }
 0xaab   : > { %v5572_v7 = vpop.f32.mrb[245].mxu0  ;;  %3777 = vmatmul.mubr.bf16.gmra.mrb[240].mxu1 %v8471_v36 }
 0xaac   : > { %v5573_v0 = vadd.f32 %v5572_v7, %v5571_v28  ;;  %v5574_v21 = vpop.f32.mrb[246].mxu0 }
 0xaad   : > { %v5575_v9 = vpop.f32.mrb[247].mxu0 }
 0xaae   : > { %v5576_v53 = vadd.f32 %v5575_v9, %v5574_v21 }
 0xab0   : > { %v3508_v54 = vpack.c.bf16 %v5576_v53, %v5573_v0 }
 0xab2   : > { %v5577_v24 = vpop.f32.mrb[248].mxu0  ;;  %3784 = vmatprep.mubr.bf16.mxu1 %v3508_v54 }
 0xab3   : > { %v5578_v32 = vpop.f32.mrb[249].mxu0  ;;  %3785 = vmatmul.mubr.bf16.gmra.mrb[244].mxu1 %v8489_v44 }
 0xab4   : > { %v5579_v1 = vadd.f32 %v5578_v32, %v5577_v24  ;;  %v5580_v27 = vpop.f32.mrb[250].mxu0 }
 0xab5   : > { %v5581_v18 = vpop.f32.mrb[251].mxu0 }
 0xab6   : > { %v5582_v15 = vadd.f32 %v5581_v18, %v5580_v27 }
 0xab8   : > { %v3509_v39 = vpack.c.bf16 %v5582_v15, %v5579_v1 }
 0xaba   : > { %v5583_v61 = vpop.f32.mrb[252].mxu0  ;;  %3792 = vmatprep.mubr.bf16.mxu1 %v3509_v39 }
 0xabb   : > { %v5584_v19 = vpop.f32.mrb[253].mxu0  ;;  %3793 = vmatmul.mubr.bf16.gmra.mrb[248].mxu1 %v8509_v17 }
 0xabc   : > { %v5585_v36 = vadd.f32 %v5584_v19, %v5583_v61  ;;  %v5586_v56 = vpop.f32.mrb[254].mxu0 }
 0xabd   : > { %v5587_v23 = vpop.f32.mrb[255].mxu0 }
 0xabe   : > { %v5588_v37 = vadd.f32 %v5587_v23, %v5586_v56 }
 0xac0   : > { %v3510_v49 = vpack.c.bf16 %v5588_v37, %v5585_v36 }
 0xac2   : > { %3800 = vmatprep.mubr.bf16.mxu1 %v3510_v49 }
 0xac3   : > { %3801 = vmatmul.mubr.bf16.gmra.mrb[252].mxu1 %v8516_v30  ;;  %v8586_v30 = vld [vmem:[%s9129_s5 + $0x3] ss:$0 sm:$0xff] }
 0xb1e   : > { %v5605_v31 = vpop.f32.mrb[192].mxu1 }
 0xb1f   : > { %v5606_v44 = vpop.f32.mrb[193].mxu1 }
 0xb20   : > { %v5607_v48 = vadd.f32 %v5606_v44, %v5605_v31  ;;  %v5608_v14 = vpop.f32.mrb[194].mxu1 }
 0xb21   : > { %v5609_v13 = vpop.f32.mrb[195].mxu1 }
 0xb22   : > { %v5610_v10 = vadd.f32 %v5609_v13, %v5608_v14  ;;  %v3683_v43 = vadd.f32 %v5607_v48, %v8586_v30 }
 0xb24   : > { %v3686_v51 = vadd.f32 %v5610_v10, %v8586_v30  ;;  %v3843_v45 = vmul.f32 %v8591_v16, %v3683_v43  ;;  %vm3810_vm1 = vcmp.ge.f32.partialorder %v3683_v43, 0.0 }
 0xb26   : > { %v5611_v46 = vpop.f32.mrb[196].mxu1  ;;  %v3844_v11 = vmul.f32 %v8591_v16, %v3686_v51  ;;  %vm3811_vm0 = vcmp.ge.f32.partialorder %v3686_v51, 0.0  ;;  %v8600_v41 = vsel %vm3810_vm1, %v3683_v43, %v3843_v45 }
 0xb27   : > { %v5612_v50 = vpop.f32.mrb[197].mxu1 }
 0xb28   : > { %v5613_v33 = vadd.f32 %v5612_v50, %v5611_v46  ;;  %v5614_v4 = vpop.f32.mrb[198].mxu1  ;;  %v8597_v52 = vsel %vm3811_vm0, %v3686_v51, %v3844_v11 }
 0xb29   : > { %v5615_v12 = vpop.f32.mrb[199].mxu1  ;;  %v3907_v34 = vadd.f32 %v8597_v52, %v8600_v41 }
 0xb2a   : > { %v5616_v17 = vadd.f32 %v5615_v12, %v5614_v4  ;;  %v3691_v55 = vadd.f32 %v5613_v33, %v8586_v30 }
 0xb2c   : > { %v3845_v26 = vmul.f32 %v8591_v16, %v3691_v55  ;;  %v3694_v6 = vadd.f32 %v5616_v17, %v8586_v30  ;;  %vm3812_vm2 = vcmp.ge.f32.partialorder %v3691_v55, 0.0 }
 0xb2e   : > { %v5617_v40 = vpop.f32.mrb[200].mxu1  ;;  %v8602_v57 = vsel %vm3812_vm2, %v3691_v55, %v3845_v26  ;;  %v3846_v20 = vmul.f32 %v8591_v16, %v3694_v6  ;;  %vm3813_vm3 = vcmp.ge.f32.partialorder %v3694_v6, 0.0 }
 0xb2f   : > { %v5618_v58 = vpop.f32.mrb[201].mxu1  ;;  %v3908_v0 = vadd.f32 %v3907_v34, %v8602_v57 }
 0xb30   : > { %v5619_v60 = vadd.f32 %v5618_v58, %v5617_v40  ;;  %v5620_v59 = vpop.f32.mrb[202].mxu1  ;;  %v8610_v9 = vsel %vm3813_vm3, %v3694_v6, %v3846_v20 }
 0xb31   : > { %v5621_v3 = vpop.f32.mrb[203].mxu1  ;;  %v3909_v1 = vadd.f32 %v3908_v0, %v8610_v9 }
 0xb32   : > { %v5622_v2 = vadd.f32 %v5621_v3, %v5620_v59  ;;  %v3699_v5 = vadd.f32 %v5619_v60, %v8586_v30 }
 0xb34   : > { %v3847_v42 = vmul.f32 %v8591_v16, %v3699_v5  ;;  %v3702_v63 = vadd.f32 %v5622_v2, %v8586_v30  ;;  %vm3814_vm4 = vcmp.ge.f32.partialorder %v3699_v5, 0.0 }
 0xb36   : > { %v5623_v25 = vpop.f32.mrb[204].mxu1  ;;  %v8613_v24 = vsel %vm3814_vm4, %v3699_v5, %v3847_v42  ;;  %v3848_v32 = vmul.f32 %v8591_v16, %v3702_v63  ;;  %vm3815_vm5 = vcmp.ge.f32.partialorder %v3702_v63, 0.0 }
 0xb37   : > { %v5624_v62 = vpop.f32.mrb[205].mxu1  ;;  %v3910_v39 = vadd.f32 %v3909_v1, %v8613_v24 }
 0xb38   : > { %v5625_v8 = vadd.f32 %v5624_v62, %v5623_v25  ;;  %v5626_v22 = vpop.f32.mrb[206].mxu1  ;;  %v8620_v19 = vsel %vm3815_vm5, %v3702_v63, %v3848_v32 }
 0xb39   : > { %v5627_v29 = vpop.f32.mrb[207].mxu1  ;;  %v3911_v48 = vadd.f32 %v3910_v39, %v8620_v19 }
 0xb3a   : > { %v5628_v38 = vadd.f32 %v5627_v29, %v5626_v22  ;;  %v3707_v53 = vadd.f32 %v5625_v8, %v8586_v30 }
 0xb3c   : > { %v3849_v27 = vmul.f32 %v8591_v16, %v3707_v53  ;;  %v3710_v18 = vadd.f32 %v5628_v38, %v8586_v30  ;;  %vm3816_vm6 = vcmp.ge.f32.partialorder %v3707_v53, 0.0 }
 0xb3e   : > { %v5629_v47 = vpop.f32.mrb[208].mxu1  ;;  %v8623_v49 = vsel %vm3816_vm6, %v3707_v53, %v3849_v27  ;;  %v3850_v31 = vmul.f32 %v8591_v16, %v3710_v18  ;;  %vm3817_vm7 = vcmp.ge.f32.partialorder %v3710_v18, 0.0 }
 0xb3f   : > { %v5630_v35 = vpop.f32.mrb[209].mxu1  ;;  %v3912_v10 = vadd.f32 %v3911_v48, %v8623_v49 }
 0xb40   : > { %v5631_v28 = vadd.f32 %v5630_v35, %v5629_v47  ;;  %v5632_v7 = vpop.f32.mrb[210].mxu1  ;;  %v8630_v46 = vsel %vm3817_vm7, %v3710_v18, %v3850_v31 }
 0xb41   : > { %v5633_v21 = vpop.f32.mrb[211].mxu1  ;;  %v3913_v60 = vadd.f32 %v3912_v10, %v8630_v46 }
 0xb42   : > { %v5634_v54 = vadd.f32 %v5633_v21, %v5632_v7  ;;  %v3715_v36 = vadd.f32 %v5631_v28, %v8586_v30 }
 0xb44   : > { %v3851_v14 = vmul.f32 %v8591_v16, %v3715_v36  ;;  %v3718_v13 = vadd.f32 %v5634_v54, %v8586_v30  ;;  %vm3818_vm8 = vcmp.ge.f32.partialorder %v3715_v36, 0.0 }
 0xb46   : > { %v5635_v15 = vpop.f32.mrb[212].mxu1  ;;  %v8633_v12 = vsel %vm3818_vm8, %v3715_v36, %v3851_v14  ;;  %v3852_v17 = vmul.f32 %v8591_v16, %v3718_v13  ;;  %vm3819_vm9 = vcmp.ge.f32.partialorder %v3718_v13, 0.0 }
 0xb47   : > { %v5636_v61 = vpop.f32.mrb[213].mxu1  ;;  %v3914_v43 = vadd.f32 %v3913_v60, %v8633_v12 }
 0xb48   : > { %v5637_v56 = vadd.f32 %v5636_v61, %v5635_v15  ;;  %v5638_v23 = vpop.f32.mrb[214].mxu1  ;;  %v8640_v55 = vsel %vm3819_vm9, %v3718_v13, %v3852_v17 }
 0xb49   : > { %v5639_v37 = vpop.f32.mrb[215].mxu1  ;;  %v3915_v22 = vadd.f32 %v3914_v43, %v8640_v55 }
 0xb4a   : > { %v5640_v44 = vadd.f32 %v5639_v37, %v5638_v23  ;;  %v3723_v50 = vadd.f32 %v5637_v56, %v8586_v30 }
 0xb4c   : > { %v3853_v3 = vmul.f32 %v8591_v16, %v3723_v50  ;;  %v3726_v2 = vadd.f32 %v5640_v44, %v8586_v30  ;;  %vm3820_vm10 = vcmp.ge.f32.partialorder %v3723_v50, 0.0 }
 0xb4e   : > { %v5641_v33 = vpop.f32.mrb[216].mxu1  ;;  %v8643_v62 = vsel %vm3820_vm10, %v3723_v50, %v3853_v3  ;;  %v3854_v11 = vmul.f32 %v8591_v16, %v3726_v2  ;;  %vm3821_vm11 = vcmp.ge.f32.partialorder %v3726_v2, 0.0 }
 0xb4f   : > { %v5642_v4 = vpop.f32.mrb[217].mxu1  ;;  %v3916_v5 = vadd.f32 %v3915_v22, %v8643_v62 }
 0xb50   : > { %v5643_v40 = vadd.f32 %v5642_v4, %v5641_v33  ;;  %v5644_v58 = vpop.f32.mrb[218].mxu1  ;;  %v8650_v47 = vsel %vm3821_vm11, %v3726_v2, %v3854_v11 }
 0xb51   : > { %v5645_v59 = vpop.f32.mrb[219].mxu1  ;;  %v3917_v28 = vadd.f32 %v3916_v5, %v8650_v47 }
 0xb52   : > { %v5646_v51 = vadd.f32 %v5645_v59, %v5644_v58  ;;  %v3731_v25 = vadd.f32 %v5643_v40, %v8586_v30 }
 0xb54   : > { %v3855_v45 = vmul.f32 %v8591_v16, %v3731_v25  ;;  %v3734_v26 = vadd.f32 %v5646_v51, %v8586_v30  ;;  %vm3822_vm12 = vcmp.ge.f32.partialorder %v3731_v25, 0.0 }
 0xb56   : > { %v5647_v8 = vpop.f32.mrb[220].mxu1  ;;  %v8653_v42 = vsel %vm3822_vm12, %v3731_v25, %v3855_v45  ;;  %v3856_v63 = vmul.f32 %v8591_v16, %v3734_v26  ;;  %vm3823_vm13 = vcmp.ge.f32.partialorder %v3734_v26, 0.0 }
 0xb57   : > { %v5648_v29 = vpop.f32.mrb[221].mxu1  ;;  %v3918_v53 = vadd.f32 %v3917_v28, %v8653_v42 }
 0xb58   : > { %v5649_v6 = vadd.f32 %v5648_v29, %v5647_v8  ;;  %v5650_v38 = vpop.f32.mrb[222].mxu1  ;;  %v8660_v32 = vsel %vm3823_vm13, %v3734_v26, %v3856_v63 }
 0xb59   : > { %v5651_v20 = vpop.f32.mrb[223].mxu1  ;;  %v3919_v56 = vadd.f32 %v3918_v53, %v8660_v32 }
 0xb5a   : > { %v3739_v34 = vadd.f32 %v5649_v6, %v8586_v30  ;;  %v5652_v35 = vadd.f32 %v5651_v20, %v5650_v38 }
 0xb5c   : > { %v3857_v7 = vmul.f32 %v8591_v16, %v3739_v34  ;;  %v3742_v0 = vadd.f32 %v5652_v35, %v8586_v30  ;;  %vm3824_vm14 = vcmp.ge.f32.partialorder %v3739_v34, 0.0 }
 0xb5e   : > { %v5653_v21 = vpop.f32.mrb[224].mxu1  ;;  %v8662_v15 = vsel %vm3824_vm14, %v3739_v34, %v3857_v7  ;;  %v3858_v39 = vmul.f32 %v8591_v16, %v3742_v0  ;;  %vm3825_vm15 = vcmp.ge.f32.partialorder %v3742_v0, 0.0 }
 0xb5f   : > { %v5654_v54 = vpop.f32.mrb[225].mxu1  ;;  %v3920_v31 = vadd.f32 %v3919_v56, %v8662_v15 }
 0xb60   : > { %v5655_v1 = vadd.f32 %v5654_v54, %v5653_v21  ;;  %v5656_v27 = vpop.f32.mrb[226].mxu1  ;;  %v8670_v44 = vsel %vm3825_vm15, %v3742_v0, %v3858_v39 }
 0xb61   : > { %v5657_v18 = vpop.f32.mrb[227].mxu1  ;;  %v3921_v4 = vadd.f32 %v3920_v31, %v8670_v44 }
 0xb62   : > { %v3747_v61 = vadd.f32 %v5655_v1, %v8586_v30  ;;  %v5658_v36 = vadd.f32 %v5657_v18, %v5656_v27 }
 0xb64   : > { %v3859_v23 = vmul.f32 %v8591_v16, %v3747_v61  ;;  %v3750_v37 = vadd.f32 %v5658_v36, %v8586_v30  ;;  %vm3826_vm0 = vcmp.ge.f32.partialorder %v3747_v61, 0.0 }
 0xb66   : > { %v5659_v48 = vpop.f32.mrb[228].mxu1  ;;  %v8672_v13 = vsel %vm3826_vm0, %v3747_v61, %v3859_v23  ;;  %v3860_v10 = vmul.f32 %v8591_v16, %v3750_v37  ;;  %vm3827_vm1 = vcmp.ge.f32.partialorder %v3750_v37, 0.0  ;;  %vm6405_vm0 = vmmov 0  }
 0xb67   : > { %v5660_v14 = vpop.f32.mrb[229].mxu1  ;;  %v3922_v60 = vadd.f32 %v3921_v4, %v8672_v13 }
 0xb68   : > { %v5661_v50 = vadd.f32 %v5660_v14, %v5659_v48  ;;  %v5662_v33 = vpop.f32.mrb[230].mxu1  ;;  %v8678_v59 = vsel %vm3827_vm1, %v3750_v37, %v3860_v10 }
 0xb69   : > { %v5663_v17 = vpop.f32.mrb[231].mxu1  ;;  %v3923_v11 = vadd.f32 %v3922_v60, %v8678_v59 }
 0xb6a   : > { %v3755_v40 = vadd.f32 %v5661_v50, %v8586_v30  ;;  %v5664_v58 = vadd.f32 %v5663_v17, %v5662_v33 }
 0xb6c   : > { %vm3828_vm2 = vcmp.ge.f32.partialorder %v3755_v40, 0.0  ;;  %v3861_v3 = vmul.f32 %v8591_v16, %v3755_v40  ;;  %v3758_v2 = vadd.f32 %v5664_v58, %v8586_v30 }
 0xb6e   : > { %v8682_v51 = vsel %vm3828_vm2, %v3755_v40, %v3861_v3  ;;  %v3862_v43 = vmul.f32 %v8591_v16, %v3758_v2  ;;  %v5665_v25 = vpop.f32.mrb[232].mxu1  ;;  %vm3829_vm3 = vcmp.ge.f32.partialorder %v3758_v2, 0.0 }
 0xb6f   : > { %v5666_v8 = vpop.f32.mrb[233].mxu1  ;;  %v3924_v45 = vadd.f32 %v3923_v11, %v8682_v51 }
 0xb70   : > { %v5667_v22 = vadd.f32 %v5666_v8, %v5665_v25  ;;  %v5668_v29 = vpop.f32.mrb[234].mxu1  ;;  %v8687_v6 = vsel %vm3829_vm3, %v3758_v2, %v3862_v43 }
 0xb71   : > { %v5669_v26 = vpop.f32.mrb[235].mxu1  ;;  %v3925_v35 = vadd.f32 %v3924_v45, %v8687_v6 }
 0xb72   : > { %v3763_v38 = vadd.f32 %v5667_v22, %v8586_v30  ;;  %v5670_v5 = vadd.f32 %v5669_v26, %v5668_v29 }
 0xb74   : > { %vm3830_vm4 = vcmp.ge.f32.partialorder %v3763_v38, 0.0  ;;  %v3863_v20 = vmul.f32 %v8591_v16, %v3763_v38  ;;  %v3766_v34 = vadd.f32 %v5670_v5, %v8586_v30 }
 0xb76   : > { %v8693_v63 = vsel %vm3830_vm4, %v3763_v38, %v3863_v20  ;;  %vm3831_vm5 = vcmp.ge.f32.partialorder %v3766_v34, 0.0  ;;  %v3864_v28 = vmul.f32 %v8591_v16, %v3766_v34  ;;  %v5671_v7 = vpop.f32.mrb[236].mxu1 }
 0xb77   : > { %v3926_v0 = vadd.f32 %v3925_v35, %v8693_v63  ;;  %v5672_v21 = vpop.f32.mrb[237].mxu1 }
 0xb78   : > { %v8697_v53 = vsel %vm3831_vm5, %v3766_v34, %v3864_v28  ;;  %v5673_v54 = vadd.f32 %v5672_v21, %v5671_v7  ;;  %v5674_v1 = vpop.f32.mrb[238].mxu1 }
 0xb79   : > { %v3927_v27 = vadd.f32 %v3926_v0, %v8697_v53  ;;  %v5675_v18 = vpop.f32.mrb[239].mxu1 }
 0xb7a   : > { %v3771_v39 = vadd.f32 %v5673_v54, %v8586_v30  ;;  %v5676_v61 = vadd.f32 %v5675_v18, %v5674_v1 }
 0xb7c   : > { %vm3832_vm6 = vcmp.ge.f32.partialorder %v3771_v39, 0.0  ;;  %v3865_v36 = vmul.f32 %v8591_v16, %v3771_v39  ;;  %v3774_v56 = vadd.f32 %v5676_v61, %v8586_v30 }
 0xb7e   : > { %v8703_v23 = vsel %vm3832_vm6, %v3771_v39, %v3865_v36  ;;  %vm3833_vm7 = vcmp.ge.f32.partialorder %v3774_v56, 0.0  ;;  %v3866_v37 = vmul.f32 %v8591_v16, %v3774_v56  ;;  %v5677_v31 = vpop.f32.mrb[240].mxu1 }
 0xb7f   : > { %v3928_v48 = vadd.f32 %v3927_v27, %v8703_v23  ;;  %v5678_v14 = vpop.f32.mrb[241].mxu1 }
 0xb80   : > { %v8707_v10 = vsel %vm3833_vm7, %v3774_v56, %v3866_v37  ;;  %v5679_v50 = vadd.f32 %v5678_v14, %v5677_v31  ;;  %v5680_v33 = vpop.f32.mrb[242].mxu1 }
 0xb81   : > { %v3929_v4 = vadd.f32 %v3928_v48, %v8707_v10  ;;  %v5681_v17 = vpop.f32.mrb[243].mxu1 }
 0xb82   : > { %v3779_v40 = vadd.f32 %v5679_v50, %v8586_v30  ;;  %v5682_v58 = vadd.f32 %v5681_v17, %v5680_v33 }
 0xb84   : > { %vm3834_vm8 = vcmp.ge.f32.partialorder %v3779_v40, 0.0  ;;  %v3867_v60 = vmul.f32 %v8591_v16, %v3779_v40  ;;  %v3782_v3 = vadd.f32 %v5682_v58, %v8586_v30 }
 0xb86   : > { %v8713_v2 = vsel %vm3834_vm8, %v3779_v40, %v3867_v60  ;;  %vm3835_vm9 = vcmp.ge.f32.partialorder %v3782_v3, 0.0  ;;  %v3868_v43 = vmul.f32 %v8591_v16, %v3782_v3  ;;  %v5683_v25 = vpop.f32.mrb[244].mxu1 }
 0xb87   : > { %v3930_v11 = vadd.f32 %v3929_v4, %v8713_v2  ;;  %v5684_v8 = vpop.f32.mrb[245].mxu1 }
 0xb88   : > { %v3900_v22 = vsel %vm3835_vm9, %v3782_v3, %v3868_v43  ;;  %v5685_v29 = vadd.f32 %v5684_v8, %v5683_v25  ;;  %v5686_v45 = vpop.f32.mrb[246].mxu1 }
 0xb89   : > { %v3931_v26 = vadd.f32 %v3930_v11, %v3900_v22  ;;  %v5687_v38 = vpop.f32.mrb[247].mxu1 }
 0xb8a   : > { %v3787_v5 = vadd.f32 %v5685_v29, %v8586_v30  ;;  %v5688_v20 = vadd.f32 %v5687_v38, %v5686_v45 }
 0xb8c   : > { %vm3836_vm10 = vcmp.ge.f32.partialorder %v3787_v5, 0.0  ;;  %v3869_v34 = vmul.f32 %v8591_v16, %v3787_v5  ;;  %v3790_v35 = vadd.f32 %v5688_v20, %v8586_v30 }
 0xb8e   : > { %v3901_v28 = vsel %vm3836_vm10, %v3787_v5, %v3869_v34  ;;  %vm3837_vm11 = vcmp.ge.f32.partialorder %v3790_v35, 0.0  ;;  %v3870_v7 = vmul.f32 %v8591_v16, %v3790_v35  ;;  %v5689_v0 = vpop.f32.mrb[248].mxu1 }
 0xb8f   : > { %v3932_v21 = vadd.f32 %v3931_v26, %v3901_v28  ;;  %v5690_v54 = vpop.f32.mrb[249].mxu1 }
 0xb90   : > { %v3902_v1 = vsel %vm3837_vm11, %v3790_v35, %v3870_v7  ;;  %v5691_v27 = vadd.f32 %v5690_v54, %v5689_v0  ;;  %v5692_v18 = vpop.f32.mrb[250].mxu1 }
 0xb91   : > { %v3933_v39 = vadd.f32 %v3932_v21, %v3902_v1  ;;  %v5693_v61 = vpop.f32.mrb[251].mxu1 }
 0xb92   : > { %v3795_v36 = vadd.f32 %v5691_v27, %v8586_v30  ;;  %v5694_v56 = vadd.f32 %v5693_v61, %v5692_v18 }
 0xb94   : > { %vm3838_vm12 = vcmp.ge.f32.partialorder %v3795_v36, 0.0  ;;  %v3871_v37 = vmul.f32 %v8591_v16, %v3795_v36  ;;  %v3798_v31 = vadd.f32 %v5694_v56, %v8586_v30 }
 0xb96   : > { %v3903_v48 = vsel %vm3838_vm12, %v3795_v36, %v3871_v37  ;;  %vm3839_vm13 = vcmp.ge.f32.partialorder %v3798_v31, 0.0  ;;  %v3872_v14 = vmul.f32 %v8591_v16, %v3798_v31  ;;  %v5695_v50 = vpop.f32.mrb[252].mxu1 }
 0xb97   : > { %v3934_v33 = vadd.f32 %v3933_v39, %v3903_v48  ;;  %v5696_v4 = vpop.f32.mrb[253].mxu1 }
 0xb98   : > { %v3904_v17 = vsel %vm3839_vm13, %v3798_v31, %v3872_v14  ;;  %v5697_v40 = vadd.f32 %v5696_v4, %v5695_v50  ;;  %v5698_v58 = vpop.f32.mrb[254].mxu1 }
 0xb99   : > { %v3935_v60 = vadd.f32 %v3934_v33, %v3904_v17  ;;  %v5699_v3 = vpop.f32.mrb[255].mxu1  ;;  %v6000_v33 = vld [vmem:[%s6795_s2 + $0x4] ss:$8 sps:$4 sm:$0xff]  }
 0xb9a   : > { %v3803_v43 = vadd.f32 %v5697_v40, %v8586_v30  ;;  %v5700_v25 = vadd.f32 %v5699_v3, %v5698_v58  ;;  %4221 = vmatprep.mubr.bf16.mxu0 %v6000_v33 }
 0xb9c   : > { %vm3840_vm14 = vcmp.ge.f32.partialorder %v3803_v43, 0.0  ;;  %v3873_v11 = vmul.f32 %v8591_v16, %v3803_v43  ;;  %v3806_v8 = vadd.f32 %v5700_v25, %v8586_v30 }
 0xb9e   : > { %v3905_v29 = vsel %vm3840_vm14, %v3803_v43, %v3873_v11  ;;  %vm3841_vm15 = vcmp.ge.f32.partialorder %v3806_v8, 0.0  ;;  %v3874_v45 = vmul.f32 %v8591_v16, %v3806_v8 }
 0xb9f   : > { %v3936_v26 = vadd.f32 %v3935_v60, %v3905_v29  ;;  %v6404_v60 = vmov 0.0  }
 0xba0   : > { %v3906_v38 = vsel %vm3841_vm15, %v3806_v8, %v3874_v45  ;;  %5741 = vmatprep.subr.bf16.mxu1 %v6404_v60  ;;  %5757 = vmatprep.mubr.msk.bf16.mxu1 %vm6405_vm0, %v6404_v60 }
 0xba1   : > { %v3937_v5 = vadd.f32 %v3936_v26, %v3906_v38 }
 0xba3   : > { %v3938_v20 = vrot.slane %v3937_v5, 4 }
 0xba5   : > { %v3939_v34 = vadd.f32 %v3938_v20, %v3937_v5  ;;  %v6004_v20 = vld [vmem:[#allocation12 + $0x18] sm:$0xff]  }
 0xba7   : > { %v3940_v35 = vrot.slane %v3939_v34, 2 }
 0xba9   : > { %v3941_v7 = vadd.f32 %v3940_v35, %v3939_v34 }
 0xbab   : > { %v3942_v0 = vrot.slane %v3941_v7, 1 }
 0xbad   : > { %v3943_v21 = vadd.f32 %v3942_v0, %v3941_v7 }
 0xbaf   : > { %v8729_v54 = vmul.f32 0.00390625, %v3943_v21  ;;  %v6005_v21 = vld [vmem:[#allocation12 + $0x20] sm:$0xff]  }
 0xbb1   : > { %v8733_v27 = vsub.f32 %v8693_v63, %v8729_v54  ;;  %v8737_v30 = vsub.f32 %v8697_v53, %v8729_v54  ;;  %v8741_v16 = vsub.f32 %v8703_v23, %v8729_v54  ;;  %v8745_v18 = vsub.f32 %v8707_v10, %v8729_v54 }
 0xbb2   : > { %v8749_v39 = vsub.f32 %v8713_v2, %v8729_v54  ;;  %v8752_v61 = vsub.f32 %v3900_v22, %v8729_v54  ;;  %v8755_v63 = vsub.f32 %v3901_v28, %v8729_v54  ;;  %v8758_v53 = vsub.f32 %v3902_v1, %v8729_v54 }
 0xbb3   : > { %v8761_v23 = vsub.f32 %v3903_v48, %v8729_v54  ;;  %v8764_v10 = vsub.f32 %v3904_v17, %v8729_v54  ;;  %v8767_v36 = vsub.f32 %v3905_v29, %v8729_v54  ;;  %v8770_v2 = vsub.f32 %v3906_v38, %v8729_v54  ;;  %v6001_v17 = vld [vmem:[#allocation12] sm:$0xff]   ;;  %v6003_v29 = vld [vmem:[#allocation12 + $0x10] sm:$0xff]  }
 0xbb4   : > { %v8774_v22 = vsub.f32 %v8600_v41, %v8729_v54  ;;  %v8778_v28 = vsub.f32 %v8597_v52, %v8729_v54  ;;  %v8782_v1 = vsub.f32 %v8602_v57, %v8729_v54  ;;  %v8790_v31 = vsub.f32 %v8610_v9, %v8729_v54  ;;  %5742 = vmatpush3.bf16.msra.mxu1 %v6001_v17  ;;  %v6007_v17 = vld [vmem:[#allocation12 + $0x30] sm:$0xff]  }
 0xbb5   : > { %v8794_v41 = vsub.f32 %v8613_v24, %v8729_v54  ;;  %v8800_v57 = vsub.f32 %v8620_v19, %v8729_v54  ;;  %v8807_v9 = vsub.f32 %v8623_v49, %v8729_v54  ;;  %v8813_v40 = vsub.f32 %v8630_v46, %v8729_v54  ;;  %v6002_v49 = vld [vmem:[#allocation12 + $0x8] sm:$0xff]   ;;  %5743 = vmatprep.subr.bf16.mxu1 %v6404_v60 }
 0xbb6   : > { %v3977_v56 = vmul.f32 %v8774_v22, %v8774_v22  ;;  %v3978_v37 = vmul.f32 %v8778_v28, %v8778_v28  ;;  %v3979_v52 = vmul.f32 %v8782_v1, %v8782_v1  ;;  %v3980_v14 = vmul.f32 %v8790_v31, %v8790_v31 }
 0xbb7   : > { %v3981_v24 = vmul.f32 %v8794_v41, %v8794_v41  ;;  %v3982_v19 = vmul.f32 %v8800_v57, %v8800_v57  ;;  %v8820_v3 = vsub.f32 %v8633_v12, %v8729_v54  ;;  %v3983_v43 = vmul.f32 %v8807_v9, %v8807_v9 }
 0xbb8   : > { %v4009_v48 = vadd.f32 %v3978_v37, %v3977_v56  ;;  %v8827_v46 = vsub.f32 %v8640_v55, %v8729_v54  ;;  %v3984_v11 = vmul.f32 %v8813_v40, %v8813_v40  ;;  %5744 = vmatpush3.bf16.msra.mxu1 %v6002_v49  ;;  %v8833_v12 = vsub.f32 %v8643_v62, %v8729_v54 }
 0xbb9   : > { %v3985_v45 = vmul.f32 %v8820_v3, %v8820_v3  ;;  %5745 = vmatprep.subr.bf16.mxu1 %v6404_v60  ;;  %v8840_v55 = vsub.f32 %v8650_v47, %v8729_v54  ;;  %v8846_v62 = vsub.f32 %v8653_v42, %v8729_v54  ;;  %v8853_v47 = vsub.f32 %v8660_v32, %v8729_v54 }
 0xbba   : > { %v4010_v50 = vadd.f32 %v4009_v48, %v3979_v52  ;;  %v3986_v38 = vmul.f32 %v8827_v46, %v8827_v46  ;;  %v3987_v34 = vmul.f32 %v8833_v12, %v8833_v12  ;;  %v8859_v42 = vsub.f32 %v8662_v15, %v8729_v54 }
 0xbbb   : > { %v3988_v7 = vmul.f32 %v8840_v55, %v8840_v55  ;;  %v3989_v56 = vmul.f32 %v8846_v62, %v8846_v62  ;;  %v8866_v32 = vsub.f32 %v8670_v44, %v8729_v54  ;;  %v3990_v52 = vmul.f32 %v8853_v47, %v8853_v47 }
 0xbbc   : > { %v4011_v4 = vadd.f32 %v4010_v50, %v3980_v14  ;;  %5746 = vmatpush3.bf16.msra.mxu1 %v6003_v29  ;;  %v6006_v14 = vld [vmem:[#allocation12 + $0x28] sm:$0xff]   ;;  %v8872_v15 = vsub.f32 %v8672_v13, %v8729_v54  ;;  %v3991_v50 = vmul.f32 %v8859_v42, %v8859_v42  ;;  %v8879_v44 = vsub.f32 %v8678_v59, %v8729_v54 }
 0xbbd   : > { %5747 = vmatprep.subr.bf16.mxu1 %v6404_v60  ;;  %v3963_v13 = vsub.f32 %v8682_v51, %v8729_v54  ;;  %v3964_v49 = vsub.f32 %v8687_v6, %v8729_v54  ;;  %v3997_v29 = vmul.f32 %v8733_v27, %v8733_v27  ;;  %v3999_v6 = vmul.f32 %v8741_v16, %v8741_v16 }
 0xbbe   : > { %v4012_v58 = vadd.f32 %v4011_v4, %v3981_v24  ;;  %v3992_v24 = vmul.f32 %v8866_v32, %v8866_v32  ;;  %v3994_v59 = vmul.f32 %v8879_v44, %v8879_v44 }
 0xbc0   : > { %v4013_v25 = vadd.f32 %v4012_v58, %v3982_v19  ;;  %5748 = vmatpush3.bf16.msra.mxu1 %v6004_v20  ;;  %v3993_v19 = vmul.f32 %v8872_v15, %v8872_v15 }
 0xbc1   : > { %5749 = vmatprep.subr.bf16.mxu1 %v6404_v60 }
 0xbc2   : > { %v4014_v8 = vadd.f32 %v4013_v25, %v3983_v43  ;;  %v3995_v25 = vmul.f32 %v3963_v13, %v3963_v13 }
 0xbc4   : > { %v4015_v26 = vadd.f32 %v4014_v8, %v3984_v11  ;;  %5750 = vmatpush3.bf16.msra.mxu1 %v6005_v21  ;;  %v3996_v8 = vmul.f32 %v3964_v49, %v3964_v49  ;;  %v4003_v21 = vmul.f32 %v8755_v63, %v8755_v63 }
 0xbc5   : > { %5751 = vmatprep.subr.bf16.mxu1 %v6404_v60 }
 0xbc6   : > { %v4016_v5 = vadd.f32 %v4015_v26, %v3985_v45  ;;  %v3998_v26 = vmul.f32 %v8737_v30, %v8737_v30 }
 0xbc8   : > { %v4017_v35 = vadd.f32 %v4016_v5, %v3986_v38  ;;  %5752 = vmatpush3.bf16.msra.mxu1 %v6006_v14  ;;  %v4000_v5 = vmul.f32 %v8745_v18, %v8745_v18 }
 0xbc9   : > { %5753 = vmatprep.subr.bf16.mxu1 %v6404_v60 }
 0xbca   : > { %v4018_v0 = vadd.f32 %v4017_v35, %v3987_v34  ;;  %v4001_v34 = vmul.f32 %v8749_v39, %v8749_v39 }
 0xbcc   : > { %v4019_v37 = vadd.f32 %v4018_v0, %v3988_v7  ;;  %5754 = vmatpush3.bf16.msra.mxu1 %v6007_v17  ;;  %v4002_v7 = vmul.f32 %v8752_v61, %v8752_v61  ;;  %v4008_v17 = vmul.f32 %v8770_v2, %v8770_v2 }
 0xbcd   : > { %5755 = vmatprep.subr.bf16.mxu1 %v6404_v60 }
 0xbce   : > { %v4020_v48 = vadd.f32 %v4019_v37, %v3989_v56  ;;  %v4004_v37 = vmul.f32 %v8758_v53, %v8758_v53 }
 0xbd0   : > { %v4021_v33 = vadd.f32 %v4020_v48, %v3990_v52  ;;  %v4005_v48 = vmul.f32 %v8761_v23, %v8761_v23 }
 0xbd2   : > { %v4022_v4 = vadd.f32 %v4021_v33, %v3991_v50  ;;  %v4006_v50 = vmul.f32 %v8764_v10, %v8764_v10 }
 0xbd4   : > { %v4023_v58 = vadd.f32 %v4022_v4, %v3992_v24  ;;  %v4007_v24 = vmul.f32 %v8767_v36, %v8767_v36 }
 0xbd6   : > { %v4024_v43 = vadd.f32 %v4023_v58, %v3993_v19 }
 0xbd8   : > { %v4025_v11 = vadd.f32 %v4024_v43, %v3994_v59 }
 0xbda   : > { %v4026_v51 = vadd.f32 %v4025_v11, %v3995_v25 }
 0xbdc   : > { %v4027_v45 = vadd.f32 %v4026_v51, %v3996_v8 }
 0xbde   : > { %v4028_v38 = vadd.f32 %v4027_v45, %v3997_v29 }
 0xbe0   : > { %v4029_v54 = vadd.f32 %v4028_v38, %v3998_v26 }
 0xbe2   : > { %v4030_v20 = vadd.f32 %v4029_v54, %v3999_v6 }
 0xbe4   : > { %v4031_v35 = vadd.f32 %v4030_v20, %v4000_v5  ;;  %v8930_v20 = vld [vmem:[%s9130_s6 + $0x3] ss:$0 sm:$0xff] }
 0xbe6   : > { %v4032_v0 = vadd.f32 %v4031_v35, %v4001_v34 }
 0xbe8   : > { %v4033_v56 = vadd.f32 %v4032_v0, %v4002_v7 }
 0xbea   : > { %v4034_v52 = vadd.f32 %v4033_v56, %v4003_v21 }
 0xbec   : > { %v4035_v14 = vadd.f32 %v4034_v52, %v4004_v37 }
 0xbee   : > { %v4036_v33 = vadd.f32 %v4035_v14, %v4005_v48 }
 0xbf0   : > { %v4037_v4 = vadd.f32 %v4036_v33, %v4006_v50 }
 0xbf2   : > { %v4038_v19 = vadd.f32 %v4037_v4, %v4007_v24 }
 0xbf4   : > { %v4039_v58 = vadd.f32 %v4038_v19, %v4008_v17 }
 0xbf6   : > { %v4040_v59 = vrot.slane %v4039_v58, 4 }
 0xbf8   : > { %v4041_v43 = vadd.f32 %v4040_v59, %v4039_v58 }
 0xbfa   : > { %v4042_v25 = vrot.slane %v4041_v43, 2 }
 0xbfc   : > { %v4043_v11 = vadd.f32 %v4042_v25, %v4041_v43 }
 0xbfe   : > { %v4044_v8 = vrot.slane %v4043_v11, 1 }
 0xc00   : > { %v4045_v51 = vadd.f32 %v4044_v8, %v4043_v11 }
 0xc02   : > { %v4046_v29 = vmul.f32 0.00390625, %v4045_v51 }
 0xc04   : > { %v4047_v45 = vadd.f32 1e-05, %v4046_v29 }
 0xc06   : > { %6023 = vrsqrt.f32 %v4047_v45 }
 0xc10   : > { %v8917_v26 = vpop.eup %6023 }
 0xc11   : > { %v4049_v38 = vmul.f32 %v8917_v26, %v8774_v22  ;;  %v4050_v6 = vmul.f32 %v8917_v26, %v8778_v28  ;;  %v4051_v54 = vmul.f32 %v8917_v26, %v8782_v1  ;;  %v4052_v5 = vmul.f32 %v8917_v26, %v8790_v31  ;;  %v8943_v31 = vld [vmem:[%s9131_s7 + $0x3] ss:$0 sm:$0xff] }
 0xc12   : > { %v4053_v34 = vmul.f32 %v8917_v26, %v8794_v41  ;;  %v4054_v22 = vmul.f32 %v8917_v26, %v8800_v57  ;;  %v4055_v28 = vmul.f32 %v8917_v26, %v8807_v9  ;;  %v4056_v1 = vmul.f32 %v8917_v26, %v8813_v40 }
 0xc13   : > { %v4065_v35 = vmul.f32 %v8917_v26, %v8872_v15  ;;  %v4066_v41 = vmul.f32 %v8917_v26, %v8879_v44  ;;  %v4089_v7 = vmul.f32 %v8930_v20, %v4049_v38  ;;  %v4090_v57 = vmul.f32 %v8930_v20, %v4050_v6 }
 0xc14   : > { %v4067_v9 = vmul.f32 %v8917_v26, %v3963_v13  ;;  %v4068_v0 = vmul.f32 %v8917_v26, %v3964_v49  ;;  %v4091_v40 = vmul.f32 %v8930_v20, %v4051_v54  ;;  %v4092_v21 = vmul.f32 %v8930_v20, %v4052_v5 }
 0xc15   : > { %v4105_v56 = vmul.f32 %v8930_v20, %v4065_v35  ;;  %v4106_v37 = vmul.f32 %v8930_v20, %v4066_v41  ;;  %v4129_v15 = vadd.f32 %v8943_v31, %v4089_v7  ;;  %v4130_v44 = vadd.f32 %v8943_v31, %v4090_v57 }
 0xc16   : > { %v4057_v52 = vmul.f32 %v8917_v26, %v8820_v3  ;;  %v4107_v48 = vmul.f32 %v8930_v20, %v4067_v9  ;;  %v4108_v13 = vmul.f32 %v8930_v20, %v4068_v0  ;;  %v4131_v49 = vadd.f32 %v8943_v31, %v4091_v40 }
 0xc17   : > { %v4145_v14 = vadd.f32 %v8943_v31, %v4105_v56  ;;  %v4146_v50 = vadd.f32 %v8943_v31, %v4106_v37  ;;  %v4132_v33 = vadd.f32 %v8943_v31, %v4092_v21  ;;  %v4069_v24 = vmul.f32 %v8917_v26, %v8733_v27 }
 0xc18   : > { %v4163_v4 = vpack.c.bf16 %v4130_v44, %v4129_v15  ;;  %v4147_v17 = vadd.f32 %v8943_v31, %v4107_v48  ;;  %v4148_v3 = vadd.f32 %v8943_v31, %v4108_v13  ;;  %v4070_v19 = vmul.f32 %v8917_v26, %v8737_v30 }
 0xc19   : > { %v4171_v58 = vpack.c.bf16 %v4146_v50, %v4145_v14  ;;  %v4109_v59 = vmul.f32 %v8930_v20, %v4069_v24  ;;  %v4093_v43 = vmul.f32 %v8930_v20, %v4053_v34  ;;  %v4094_v25 = vmul.f32 %v8930_v20, %v4054_v22 }
 0xc1a   : > { %v4172_v11 = vpack.c.bf16 %v4148_v3, %v4147_v17  ;;  %v4110_v8 = vmul.f32 %v8930_v20, %v4070_v19  ;;  %v4071_v27 = vmul.f32 %v8917_v26, %v8741_v16  ;;  %v4072_v51 = vmul.f32 %v8917_v26, %v8745_v18 }
 0xc1b   : > { %v4058_v29 = vmul.f32 %v8917_v26, %v8827_v46  ;;  %v4059_v30 = vmul.f32 %v8917_v26, %v8833_v12  ;;  %5701 = vmatprep.subr.bf16.mxu0 %v4171_v58  ;;  %v4164_v45 = vpack.c.bf16 %v4132_v33, %v4131_v49  ;;  %v4149_v38 = vadd.f32 %v8943_v31, %v4109_v59 }
 0xc1c   : > { %5702 = vmatpush3.bf16.msra.mxu0 %v4163_v4  ;;  %v4150_v6 = vadd.f32 %v8943_v31, %v4110_v8  ;;  %v4133_v54 = vadd.f32 %v8943_v31, %v4093_v43  ;;  %v4111_v16 = vmul.f32 %v8930_v20, %v4071_v27  ;;  %v4112_v5 = vmul.f32 %v8930_v20, %v4072_v51 }
 0xc1d   : > { %5703 = vmatprep.subr.bf16.mxu0 %v4172_v11  ;;  %v4134_v18 = vadd.f32 %v8943_v31, %v4094_v25  ;;  %v4095_v46 = vmul.f32 %v8930_v20, %v4055_v28  ;;  %v4073_v12 = vmul.f32 %v8917_v26, %v8749_v39  ;;  %v4074_v34 = vmul.f32 %v8917_v26, %v8752_v61 }
 0xc1e   : > { %v4173_v22 = vpack.c.bf16 %v4150_v6, %v4149_v38  ;;  %v4151_v35 = vadd.f32 %v8943_v31, %v4111_v16  ;;  %v4152_v41 = vadd.f32 %v8943_v31, %v4112_v5  ;;  %v4096_v7 = vmul.f32 %v8930_v20, %v4056_v1 }
 0xc1f   : > { %v4060_v57 = vmul.f32 %v8917_v26, %v8840_v55  ;;  %v4113_v9 = vmul.f32 %v8930_v20, %v4073_v12  ;;  %v4114_v28 = vmul.f32 %v8930_v20, %v4074_v34  ;;  %v4097_v0 = vmul.f32 %v8930_v20, %v4057_v52  ;;  %v5998_v34 = vld [vmem:[%s6795_s2] ss:$8 sps:$4 sm:$0xff]  }
 0xc20   : > { %5704 = vmatpush3.bf16.msra.mxu0 %v4164_v45  ;;  %v4174_v39 = vpack.c.bf16 %v4152_v41, %v4151_v35  ;;  %v4098_v61 = vmul.f32 %v8930_v20, %v4058_v29  ;;  %v4075_v40 = vmul.f32 %v8917_v26, %v8755_v63  ;;  %v4076_v21 = vmul.f32 %v8917_v26, %v8758_v53  ;;  %v6010_v35 = vld [vmem:[#allocation13 + $0x8] sm:$0xff]   ;;  %v6012_v41 = vld [vmem:[#allocation13 + $0x18] sm:$0xff]  }
 0xc21   : > { %v4061_v1 = vmul.f32 %v8917_v26, %v8846_v62  ;;  %5705 = vmatprep.subr.bf16.mxu0 %v4173_v22  ;;  %v4165_v55 = vpack.c.bf16 %v4134_v18, %v4133_v54  ;;  %v4153_v56 = vadd.f32 %v8943_v31, %v4113_v9  ;;  %v4154_v37 = vadd.f32 %v8943_v31, %v4114_v28  ;;  %v6008_v22 = vld [vmem:[#allocation12 + $0x38] sm:$0xff]  }
 0xc22   : > { %v4135_v15 = vadd.f32 %v8943_v31, %v4095_v46  ;;  %v4136_v44 = vadd.f32 %v8943_v31, %v4096_v7  ;;  %v4115_v52 = vmul.f32 %v8930_v20, %v4075_v40  ;;  %v4116_v63 = vmul.f32 %v8930_v20, %v4076_v21  ;;  %5756 = vmatpush3.bf16.msra.mxu1 %v6008_v22  ;;  %v6013_v7 = vld [vmem:[#allocation13 + $0x20] sm:$0xff]  }
 0xc23   : > { %v4062_v53 = vmul.f32 %v8917_v26, %v8853_v47  ;;  %v4175_v48 = vpack.c.bf16 %v4154_v37, %v4153_v56  ;;  %v4077_v62 = vmul.f32 %v8917_v26, %v8761_v23  ;;  %v4078_v13 = vmul.f32 %v8917_v26, %v8764_v10  ;;  %v4778_v56 = vld [vmem:[%s9209_s11] ss:$0 sm:$0xff] }
 0xc24   : > { %5706 = vmatpush3.bf16.msra.mxu0 %v4165_v55  ;;  %v4137_v49 = vadd.f32 %v8943_v31, %v4097_v0  ;;  %v4138_v14 = vadd.f32 %v8943_v31, %v4098_v61  ;;  %v4155_v50 = vadd.f32 %v8943_v31, %v4115_v52  ;;  %v4156_v33 = vadd.f32 %v8943_v31, %v4116_v63  ;;  %v6016_v55 = vld [vmem:[#allocation13 + $0x38] sm:$0xff]  }
 0xc25   : > { %5707 = vmatprep.subr.bf16.mxu0 %v4174_v39  ;;  %v4099_v24 = vmul.f32 %v8930_v20, %v4059_v30  ;;  %v4100_v47 = vmul.f32 %v8930_v20, %v4060_v57  ;;  %v4117_v4 = vmul.f32 %v8930_v20, %v4077_v62  ;;  %v4118_v23 = vmul.f32 %v8930_v20, %v4078_v13  ;;  %v6014_v57 = vld [vmem:[#allocation13 + $0x28] sm:$0xff]  }
 0xc26   : > { %v4166_v17 = vpack.c.bf16 %v4136_v44, %v4135_v15  ;;  %v4176_v10 = vpack.c.bf16 %v4156_v33, %v4155_v50  ;;  %v4079_v3 = vmul.f32 %v8917_v26, %v8767_v36  ;;  %v4080_v19 = vmul.f32 %v8917_v26, %v8770_v2 }
 0xc27   : > { %v4157_v58 = vadd.f32 %v8943_v31, %v4117_v4  ;;  %v4158_v59 = vadd.f32 %v8943_v31, %v4118_v23  ;;  %v4063_v43 = vmul.f32 %v8917_v26, %v8859_v42  ;;  %v4064_v25 = vmul.f32 %v8917_v26, %v8866_v32 }
 0xc28   : > { %5708 = vmatpush3.bf16.msra.mxu0 %v4166_v17  ;;  %v4119_v11 = vmul.f32 %v8930_v20, %v4079_v3  ;;  %v4120_v8 = vmul.f32 %v8930_v20, %v4080_v19  ;;  %v4167_v36 = vpack.c.bf16 %v4138_v14, %v4137_v49  ;;  %v4139_v27 = vadd.f32 %v8943_v31, %v4099_v24 }
 0xc29   : > { %5709 = vmatprep.subr.bf16.mxu0 %v4175_v48  ;;  %v4140_v2 = vadd.f32 %v8943_v31, %v4100_v47  ;;  %v4177_v51 = vpack.c.bf16 %v4158_v59, %v4157_v58  ;;  %v4101_v29 = vmul.f32 %v8930_v20, %v4061_v1  ;;  %v4102_v30 = vmul.f32 %v8930_v20, %v4062_v53  ;;  %v6015_v1 = vld [vmem:[#allocation13 + $0x30] sm:$0xff]  }
 0xc2a   : > { %v4159_v42 = vadd.f32 %v8943_v31, %v4119_v11  ;;  %v4160_v32 = vadd.f32 %v8943_v31, %v4120_v8  ;;  %v4103_v54 = vmul.f32 %v8930_v20, %v4063_v43  ;;  %v4104_v16 = vmul.f32 %v8930_v20, %v4064_v25  ;;  %v6009_v20 = vld [vmem:[#allocation13] sm:$0xff]  }
 0xc2b   : > { %v4168_v45 = vpack.c.bf16 %v4140_v2, %v4139_v27  ;;  %v4141_v38 = vadd.f32 %v8943_v31, %v4101_v29  ;;  %v4142_v6 = vadd.f32 %v8943_v31, %v4102_v30 }
 0xc2c   : > { %5710 = vmatpush3.bf16.msra.mxu0 %v4167_v36  ;;  %v4178_v26 = vpack.c.bf16 %v4160_v32, %v4159_v42  ;;  %v4143_v18 = vadd.f32 %v8943_v31, %v4103_v54  ;;  %v4144_v46 = vadd.f32 %v8943_v31, %v4104_v16  ;;  %v6011_v31 = vld [vmem:[#allocation13 + $0x10] sm:$0xff]  }
 0xc2d   : > { %5711 = vmatprep.subr.bf16.mxu0 %v4176_v10  ;;  %v4169_v5 = vpack.c.bf16 %v4142_v6, %v4141_v38 }
 0xc2e   : > { %v4170_v12 = vpack.c.bf16 %v4144_v46, %v4143_v18 }
 0xc30   : > { %5712 = vmatpush3.bf16.msra.mxu0 %v4168_v45 }
 0xc31   : > { %5713 = vmatprep.subr.bf16.mxu0 %v4177_v51 }
 0xc34   : > { %5714 = vmatpush3.bf16.msra.mxu0 %v4169_v5 }
 0xc35   : > { %5715 = vmatprep.subr.bf16.mxu0 %v4178_v26 }
 0xc38   : > { %5716 = vmatpush3.bf16.msra.mxu0 %v4170_v12 }
 0xc39   : > { %5761 = vmatprep.subr.bf16.mxu0 %v6404_v60 }
 0xc3b   : > { %4222 = vmatmul.mubr.bf16.vlgmr.msra.gmra.mrb[0].mxu0 %v5998_v34 }
 0xc3c   : > { %5777 = vmatprep.mubr.msk.bf16.mxu0 %vm6405_vm0, %v6404_v60  ;;  %5762 = vmatpush3.bf16.msra.mxu0 %v6009_v20 }
 0xc3d   : > { %5763 = vmatprep.subr.bf16.mxu0 %v6404_v60 }
 0xc40   : > { %5764 = vmatpush3.bf16.msra.mxu0 %v6010_v35 }
 0xc41   : > { %5765 = vmatprep.subr.bf16.mxu0 %v6404_v60 }
 0xc44   : > { %5766 = vmatpush3.bf16.msra.mxu0 %v6011_v31 }
 0xc45   : > { %5767 = vmatprep.subr.bf16.mxu0 %v6404_v60 }
 0xc48   : > { %5768 = vmatpush3.bf16.msra.mxu0 %v6012_v41 }
 0xc49   : > { %5769 = vmatprep.subr.bf16.mxu0 %v6404_v60 }
 0xc4c   : > { %5770 = vmatpush3.bf16.msra.mxu0 %v6013_v7 }
 0xc4d   : > { %5771 = vmatprep.subr.bf16.mxu0 %v6404_v60 }
 0xc50   : > { %5772 = vmatpush3.bf16.msra.mxu0 %v6014_v57 }
 0xc51   : > { %5773 = vmatprep.subr.bf16.mxu0 %v6404_v60 }
 0xc54   : > { %5774 = vmatpush3.bf16.msra.mxu0 %v6015_v1 }
 0xc55   : > { %5775 = vmatprep.subr.bf16.mxu0 %v6404_v60  ;;  %v4787_v60 = vld [vmem:[%s9210_s0] ss:$0 sm:$0xff] }
 0xc58   : > { %5776 = vmatpush3.bf16.msra.mxu0 %v6016_v55 }
 0xd0e   : > { %v5717_v9 = vpop.f32.mrb[0].mxu0 }
 0xd0f   : > { %v5718_v28 = vpop.f32.mrb[1].mxu0 }
 0xd10   : > { %v5719_v0 = vadd.f32 %v5718_v28, %v5717_v9  ;;  %v5720_v39 = vpop.f32.mrb[2].mxu0 }
 0xd11   : > { %v5721_v61 = vpop.f32.mrb[3].mxu0 }
 0xd12   : > { %v5722_v40 = vadd.f32 %v5721_v61, %v5720_v39 }
 0xd14   : > { %v4230_v21 = vpack.c.bf16 %v5722_v40, %v5719_v0 }
 0xd16   : > { %5758 = vmatmul.mubr.bf16.vlgmr.msra.gmra.mrb[0].mxu1 %v4230_v21 }
 0xde9   : > { %v4336_v37 = vpop.f32.mrb[0].mxu1 }
 0xdea   : > { %v4337_v15 = vadd.f32 %v4778_v56, %v4336_v37  ;;  %v5759_v44 = vpop.f32.mrb[1].mxu1 }
 0xdeb   : > { %v4339_v52 = vpop.f32.mrb[2].mxu1 }
 0xdec   : > { %v4340_v63 = vadd.f32 %v4778_v56, %v4339_v52  ;;  %v5760_v53 = vpop.f32.mrb[3].mxu1  ;;  %v4343_v48 = vmax.f32 %v4337_v15, 0.0 }
 0xdee   : > { %v4344_v62 = vmax.f32 %v4340_v63, 0.0 }
 0xdf0   : > { %v4345_v13 = vpack.c.bf16 %v4344_v62, %v4343_v48 }
 0xdf2   : > { %5778 = vmatmul.mubr.bf16.vlgmr.msra.gmra.mrb[4].mxu0 %v4345_v13 }
 0xec5   : > { %v4451_v49 = vpop.f32.mrb[4].mxu0 }
 0xec6   : > { %v4452_v14 = vadd.f32 %v4787_v60, %v4451_v49  ;;  %v5779_v50 = vpop.f32.mrb[5].mxu0 }
 0xec7   : > { %v4454_v33 = vpop.f32.mrb[6].mxu0 }
 0xec8   : > { %4458 = vst [vmem:[%s566_s29] sm:$0xff] %v4452_v14  ;;  %v4455_v24 = vadd.f32 %v4787_v60, %v4454_v33  ;;  %v5780_v47 = vpop.f32.mrb[7].mxu0 }
 0xeca   : > { %4459 = vst [vmem:[%s566_s29 + $0x8] sm:$0xff] %v4455_v24 }
 0xecb   : > { %6322 = shalt.err (!%p6319_p4)
}
 0xecc   : > { %s6323_s18 = scalar_lea.hbm %s9080_s26, 256  ;;  %s6327_s15 = scalar_lea.hbm %s9212_s4, 512 }
 0xecd   : > { %p6324_p7 = scmp.ne.s32.totalorder %s9080_s26, %s6323_s18  ;;  %p6328_p3 = scmp.lt.u32.totalorder %s9080_s26, %s9212_s4 }
 0xece   : > { %p6329_p5 = scmp.lt.u32.totalorder %s6327_s15, %s6323_s18  ;;  %p6331_p1 = scmp.lt.u32.totalorder %s6323_s18, %s9080_s26 }
 0xecf   : > { %p6325_p9 = pnand %p6324_p7, %p9213_p0 }
 0xed0   : > { %p6330_p8 = por %p6329_p5, %p6328_p3 }
 0xed1   : > { %p6326_p2 = pneg %p6325_p9 }
 0xed2   : > { %p6332_p6 = por %p6331_p1, %p6330_p8 }
 0xed4   : > { %p6333_p10 = pnand %p6332_p6, %p6326_p2 }
 0xed6   : > { %6336 = shalt.err (!%p6333_p10)
}
 0xed7   : > { %s6407_s12 = smov 128   ;;  %s6408_s0 = smov 8  }
 0xed8   : > { %5803 = dma.vmem_to_hbm [thread:$0]  (%p9213_p0), %s9075_s27, 256, %s9080_s26, %s4461_s20, %s6407_s12, %s6407_s12, %s6408_s0  }
 0xed9 PF: > { %s9214_s29 = sld [smem:[#allocation22_spill]]  ;;  %s9215_s28 = sld [smem:[#allocation24_spill]] }
 0xeda   : > { %p9217_p13 = scmp.ge.s32.totalorder %s6391_s24, 2 }
 0xedf   : > { %s4489_s9 = sand.u32 1, %s9214_s29   ;;  %p9216_p11 = scmp.ne.s32.totalorder %s9215_s28, 0 }
 0xee0   : > { %s4490_s21 = scalar_lea.sflag [#allocation4], %s4489_s9 }
 0xee1   : > { %p5829_p12 = pnand %p9217_p13, %p9216_p11 }
 0xee3   : > { %6374 = dma.done.wait (!%p5829_p12), %s4490_s21, 256  }
 0xee4   : > { %6376 = vsyncadd (!%p5829_p12), %s4490_s21, 4294967040  ;;  %s9218_s24 = sld [smem:[#allocation25_spill]]  ;;  %s9219_s25 = sld [smem:[#allocation23_spill]] }
 0xee5   : > { %s9220_s23 = sld [smem:[#allocation26_spill]]  ;;  %s9221_s21 = smov %s6383_s22 }
 0xeea   : > { %p31_p4 = scmp.ge.s32.totalorder %s9218_s24, 4   ;;  %s9222_s22 = smov %s9219_s25 }
 0xeec   :  { %33 = sbr.rel (!%p31_p4) target bundleno = 17 (0x11), region = 166 }
 0xef3   :  { %4495 = vsyncpa [#allocation3], 1 }
 0xef4   :  { %4497 = vsyncpa [#allocation3 + $0x1], 1 }
 0xef5   :  { %4498 = vsyncpa [#allocation8], 1 }
 0xef6   :  { %4500 = vsyncpa [#allocation8 + $0x1], 1 }
 0xef7   :  { %4501 = vsyncpa [#allocation11], 1 }
 0xef8   :  { %4502 = vsyncpa [#allocation14], 1 }
 0xef9   :  { %4503 = vsyncpa [#allocation4], 1 }
 0xefa   :  { %4505 = vsyncpa [#allocation4 + $0x1], 1 }
 0xefb   :  { %4506 = vsyncpa [#allocation5], 1 }
 0xefc   :  { %4508 = vsyncpa [#allocation5 + $0x1], 1 }

</bundles_post_ra>
